<compile_context>
chip_gen: v6e
topology: v6e:2x2x1
jax: 0.10.0
libtpu: 0.0.40
codegen_flags: <defaults>
</compile_context>

<pallas_src>
import functools

import jax
import jax.numpy as jnp
from jax.experimental import pallas as pl
from jax.experimental.pallas import tpu as pltpu

INPUT_SIZE = 8
HIDDEN_SIZE = 32
FC_OUTPUT_SIZE = 5
NUM_LAYERS = 2

_VMEM = pl.BlockSpec(memory_space=pltpu.MemorySpace.VMEM)


# ---------------------------------------------------------------------------
# Fused Pallas kernel
# ---------------------------------------------------------------------------
def _lstm_cell(xproj_t, h, c, whh, H):
    """One LSTM step given the precomputed input projection (x_t @ Wih + b)."""
    gates = xproj_t + jnp.dot(h, whh, preferred_element_type=jnp.float32)
    # One "sigmoid" (EUP tanh form, no divide) + one tanh over the full
    # (B, 4H) tile, then static lane slices (PyTorch gate order: i, f, g, o).
    sig = 0.5 * jnp.tanh(0.5 * gates) + 0.5
    th = jnp.tanh(gates)
    i_g = sig[:, 0 * H:1 * H]
    f_g = sig[:, 1 * H:2 * H]
    g_g = th[:, 2 * H:3 * H]
    o_g = sig[:, 3 * H:4 * H]
    c_new = f_g * c + i_g * g_g
    h_new = o_g * jnp.tanh(c_new)
    return h_new, c_new


def _autoencoder_kernel(x2d_ref, wih_ref, whh_ref, b_ref, pw_ref, pb_ref,
                        out_ref, fc_out_ref, *, B, T):
    H = HIDDEN_SIZE
    G = 4 * H
    f32 = jnp.float32
    zeros_bh = jnp.zeros((B, H), f32)

    # ---- unpack collapsed weight slabs (static, 8-sublane-aligned slices) ---
    wih = wih_ref[...]                               # (72, 128)
    e_wih0 = wih[0:INPUT_SIZE, :]                    # (8, 128)
    e_wih1 = wih[INPUT_SIZE:INPUT_SIZE + H, :]       # (32, 128)
    d_wih1 = wih[INPUT_SIZE + H:INPUT_SIZE + 2 * H, :]

    whh = whh_ref[...]                               # (128, 128)
    e_whh0 = whh[0 * H:1 * H, :]
    e_whh1 = whh[1 * H:2 * H, :]
    d_whh0 = whh[2 * H:3 * H, :]
    d_whh1 = whh[3 * H:4 * H, :]

    b_all = b_ref[...]                               # (4, 128) folded biases
    # Hoisted bias broadcasts (done once, not per timestep).
    e_b1 = jnp.broadcast_to(b_all[1:2, :], (B, G))
    d_b0 = jnp.broadcast_to(b_all[2:3, :], (B, G))
    d_b1 = jnp.broadcast_to(b_all[3:4, :], (B, G))

    pw = pw_ref[...]                                 # (64, 8): fc_w(pad) ; out_w
    pb = pb_ref[...]                                 # (2, 8):  fc_b(pad) ; out_b

    # ---- Encoder L0 input projections: ONE batched matmul (off crit path) ---
    x2d = x2d_ref[...]                               # (T*B, 8), time-major rows
    xproj0_all = (jnp.dot(x2d, e_wih0, preferred_element_type=f32)
                  + jnp.broadcast_to(b_all[0:1, :], (T * B, G)))   # (T*B, 128)

    # ---- Encoder (L0 + L1 fused per step; static T -> fully unrolled) ------
    h0, c0 = zeros_bh, zeros_bh
    h1, c1 = zeros_bh, zeros_bh
    for t in range(T):
        xp0_t = xproj0_all[t * B:(t + 1) * B, :]
        h0, c0 = _lstm_cell(xp0_t, h0, c0, e_whh0, H)
        # L1 input projection consumed immediately (no enc0_seq list kept).
        xp1_t = jnp.dot(h0, e_wih1, preferred_element_type=f32) + e_b1
        h1, c1 = _lstm_cell(xp1_t, h1, c1, e_whh1, H)

    # ---- Bottleneck FC on hn[-1] (padded weight, slice result lanes) -------
    fc_full = (jnp.dot(h1, pw[0:H, :], preferred_element_type=f32)
               + jnp.broadcast_to(pb[0:1, :], (B, INPUT_SIZE)))
    fc_out_ref[...] = fc_full[:, 0:FC_OUTPUT_SIZE]

    # ---- Decoder (L0 + L1 fused per step); input is identically zero -------
    hd0, cd0 = h0, c0                                # encoder layer-0 final state
    hd1, cd1 = h1, c1                                # encoder layer-1 final state
    hd1_seq = []
    for t in range(T):
        # zero input -> gates = h @ Whh + (folded bias)
        hd0, cd0 = _lstm_cell(d_b0, hd0, cd0, d_whh0, H)
        xpd1_t = jnp.dot(hd0, d_wih1, preferred_element_type=f32) + d_b1
        hd1, cd1 = _lstm_cell(xpd1_t, hd1, cd1, d_whh1, H)
        hd1_seq.append(hd1)

    # ---- Deferred output projection: one matmul + one contiguous store -----
    h_stack = jnp.concatenate(hd1_seq, axis=0)       # (T*B, H)
    out_ref[...] = (jnp.dot(h_stack, pw[H:2 * H, :], preferred_element_type=f32)
                    + jnp.broadcast_to(pb[1:2, :], (T * B, INPUT_SIZE)))


# ---------------------------------------------------------------------------
# Wrapper: single fused pallas_call (weights packed into a few slabs)
# ---------------------------------------------------------------------------
def autoencoder_forward(x, params):
    """x: (B, T, input_size) -> (out (B, T, input_size), fc_out (B, 5))."""
    B, T, _ = x.shape
    (e0_wih, e0_whh, e0_b), (e1_wih, e1_whh, e1_b) = params["enc_lstm"]
    (_d0_wih, d0_whh, d0_b), (d1_wih, d1_whh, d1_b) = params["dec_lstm"]
    # _d0_wih is never used: decoder layer-0 input is identically zero.

    # Time-major 2-D view of x (512 B of layout plumbing in the wrapper).
    x2d = x.transpose(1, 0, 2).reshape(T * B, INPUT_SIZE)

    # Collapse 15 tiny weight operands into 5 slabs (fewer prologue DMAs).
    # When `params` is closed over under jit these concats constant-fold.
    wih_cat = jnp.concatenate([e0_wih, e1_wih, d1_wih], axis=0)          # (72, 128)
    whh_cat = jnp.concatenate([e0_whh, e1_whh, d0_whh, d1_whh], axis=0)  # (128, 128)
    b_cat = jnp.concatenate([e0_b, e1_b, d0_b, d1_b], axis=0)            # (4, 128)
    fc_w_pad = jnp.pad(params["fc_w"],
                       ((0, 0), (0, INPUT_SIZE - FC_OUTPUT_SIZE)))
    pw_cat = jnp.concatenate([fc_w_pad, params["dec_fc_w"]], axis=0)     # (64, 8)
    fc_b_pad = jnp.pad(params["fc_b"],
                       (0, INPUT_SIZE - FC_OUTPUT_SIZE)).reshape(1, INPUT_SIZE)
    pb_cat = jnp.concatenate(
        [fc_b_pad, params["dec_fc_b"].reshape(1, INPUT_SIZE)], axis=0)   # (2, 8)

    out2d, fc_out = pl.pallas_call(
        functools.partial(_autoencoder_kernel, B=B, T=T),
        out_shape=(jax.ShapeDtypeStruct((T * B, INPUT_SIZE), jnp.float32),
                   jax.ShapeDtypeStruct((B, FC_OUTPUT_SIZE), jnp.float32)),
        in_specs=[_VMEM] * 6,
        out_specs=(_VMEM, _VMEM),
    )(x2d, wih_cat, whh_cat, b_cat, pw_cat, pb_cat)

    out = out2d.reshape(T, B, INPUT_SIZE).transpose(1, 0, 2)             # (B, T, 8)
    return out, fc_out


# ---------------------------------------------------------------------------
# Deterministic parameter initialization (PyTorch-style uniform +-1/sqrt(H))
# ---------------------------------------------------------------------------
def init_params(key):
    k = 1.0 / jnp.sqrt(HIDDEN_SIZE)

    def uni(key, shape):
        return jax.random.uniform(key, shape, jnp.float32, -k, k)

    def lstm_stack(key, in0):
        layers = []
        for layer_idx in range(NUM_LAYERS):
            din = in0 if layer_idx == 0 else HIDDEN_SIZE
            key, k1, k2, k3, k4 = jax.random.split(key, 5)
            wih = uni(k1, (din, 4 * HIDDEN_SIZE))          # stored transposed
            whh = uni(k2, (HIDDEN_SIZE, 4 * HIDDEN_SIZE))  # stored transposed
            b = (uni(k3, (4 * HIDDEN_SIZE,))
                 + uni(k4, (4 * HIDDEN_SIZE,))).reshape(1, 4 * HIDDEN_SIZE)
            layers.append((wih, whh, b))
        return key, layers

    key, enc = lstm_stack(key, INPUT_SIZE)
    key, dec = lstm_stack(key, HIDDEN_SIZE)
    key, k1, k2, k3, k4 = jax.random.split(key, 5)
    return {
        "enc_lstm": enc,
        "dec_lstm": dec,
        "fc_w": uni(k1, (HIDDEN_SIZE, FC_OUTPUT_SIZE)),
        "fc_b": uni(k2, (FC_OUTPUT_SIZE,)),
        "dec_fc_w": uni(k3, (HIDDEN_SIZE, INPUT_SIZE)),
        "dec_fc_b": uni(k4, (INPUT_SIZE,)),
    }


# ---------------------------------------------------------------------------
# Pure-JAX reference (correctness checking only)
# ---------------------------------------------------------------------------
def _lstm_ref(x_btd, layer_params, h0, c0):
    B, T, _ = x_btd.shape
    h_finals, c_finals = [], []
    seq = x_btd
    H = HIDDEN_SIZE
    for layer_idx, (wih, whh, b) in enumerate(layer_params):
        h, c = h0[layer_idx], c0[layer_idx]
        outs = []
        for t in range(T):
            gates = seq[:, t, :] @ wih + h @ whh + b
            i_g = jax.nn.sigmoid(gates[:, 0 * H:1 * H])
            f_g = jax.nn.sigmoid(gates[:, 1 * H:2 * H])
            g_g = jnp.tanh(gates[:, 2 * H:3 * H])
            o_g = jax.nn.sigmoid(gates[:, 3 * H:4 * H])
            c = f_g * c + i_g * g_g
            h = o_g * jnp.tanh(c)
            outs.append(h)
        seq = jnp.stack(outs, axis=1)
        h_finals.append(h)
        c_finals.append(c)
    return seq, jnp.stack(h_finals), jnp.stack(c_finals)


def autoencoder_ref(x, params):
    B, T, _ = x.shape
    h0 = jnp.zeros((NUM_LAYERS, B, HIDDEN_SIZE), jnp.float32)
    c0 = jnp.zeros((NUM_LAYERS, B, HIDDEN_SIZE), jnp.float32)
    _, hn, cn = _lstm_ref(x, params["enc_lstm"], h0, c0)
    fc_out = hn[-1] @ params["fc_w"] + params["fc_b"]
    dec_in = jnp.zeros((B, T, HIDDEN_SIZE), jnp.float32)
    dec_seq, _, _ = _lstm_ref(dec_in, params["dec_lstm"], hn, cn)
    out = dec_seq @ params["dec_fc_w"] + params["dec_fc_b"]
    return out, fc_out


# ---------------------------------------------------------------------------
if __name__ == "__main__":
    key = jax.random.PRNGKey(0)
    key, pkey, xkey = jax.random.split(key, 3)
    params = init_params(pkey)

    B, T = 2, 8
    x = jax.random.normal(xkey, (B, T, INPUT_SIZE), dtype=jnp.float32)

    fwd = jax.jit(functools.partial(autoencoder_forward, params=params))
    out, fc_out = fwd(x)
    jax.block_until_ready((out, fc_out))

    ref_out, ref_fc = autoencoder_ref(x, params)
    assert out.shape == (B, T, INPUT_SIZE) and fc_out.shape == (B, FC_OUTPUT_SIZE)
    assert jnp.allclose(out, ref_out, atol=5e-5, rtol=5e-5)
    assert jnp.allclose(fc_out, ref_fc, atol=5e-5, rtol=5e-5)

    print("KERNEL_OK")
</pallas_src>

<mosaic_0001>
module attributes {stable_mosaic.version = 11 : i64} {
  func.func @_autoencoder_kernel(%arg0: memref<16x8xf32, #tpu.memory_space<vmem>>, %arg1: memref<72x128xf32, #tpu.memory_space<vmem>>, %arg2: memref<128x128xf32, #tpu.memory_space<vmem>>, %arg3: memref<4x128xf32, #tpu.memory_space<vmem>>, %arg4: memref<64x8xf32, #tpu.memory_space<vmem>>, %arg5: memref<2x8xf32, #tpu.memory_space<vmem>>, %arg6: memref<16x8xf32, #tpu.memory_space<vmem>>, %arg7: memref<2x5xf32, #tpu.memory_space<vmem>>) attributes {dimension_semantics = [], scalar_prefetch = 0 : i64, scratch_operands = 0 : i64, tpu.core_type = #tpu.core_type<tc>} {
    %cst = arith.constant 0.000000e+00 : f32
    %0 = vector.broadcast %cst : f32 to vector<2x32xf32>
    %c0 = arith.constant 0 : index
    %c0_0 = arith.constant 0 : index
    %1 = vector.load %arg1[%c0, %c0_0] : memref<72x128xf32, #tpu.memory_space<vmem>>, vector<72x128xf32>
    %2 = vector.extract_strided_slice %1 {offsets = [0, 0], sizes = [8, 128], strides = [1, 1]} : vector<72x128xf32> to vector<8x128xf32>
    %3 = vector.extract_strided_slice %1 {offsets = [8, 0], sizes = [32, 128], strides = [1, 1]} : vector<72x128xf32> to vector<32x128xf32>
    %4 = vector.extract_strided_slice %1 {offsets = [40, 0], sizes = [32, 128], strides = [1, 1]} : vector<72x128xf32> to vector<32x128xf32>
    %c0_1 = arith.constant 0 : index
    %c0_2 = arith.constant 0 : index
    %5 = vector.load %arg2[%c0_1, %c0_2] : memref<128x128xf32, #tpu.memory_space<vmem>>, vector<128x128xf32>
    %6 = vector.extract_strided_slice %5 {offsets = [0, 0], sizes = [32, 128], strides = [1, 1]} : vector<128x128xf32> to vector<32x128xf32>
    %7 = vector.extract_strided_slice %5 {offsets = [32, 0], sizes = [32, 128], strides = [1, 1]} : vector<128x128xf32> to vector<32x128xf32>
    %8 = vector.extract_strided_slice %5 {offsets = [64, 0], sizes = [32, 128], strides = [1, 1]} : vector<128x128xf32> to vector<32x128xf32>
    %9 = vector.extract_strided_slice %5 {offsets = [96, 0], sizes = [32, 128], strides = [1, 1]} : vector<128x128xf32> to vector<32x128xf32>
    %c0_3 = arith.constant 0 : index
    %c0_4 = arith.constant 0 : index
    %10 = vector.load %arg3[%c0_3, %c0_4] : memref<4x128xf32, #tpu.memory_space<vmem>>, vector<4x128xf32>
    %11 = vector.extract_strided_slice %10 {offsets = [1, 0], sizes = [1, 128], strides = [1, 1]} : vector<4x128xf32> to vector<1x128xf32>
    %12 = vector.shape_cast %11 : vector<1x128xf32> to vector<1x128xf32>
    %13 = vector.broadcast %12 : vector<1x128xf32> to vector<2x128xf32>
    %14 = vector.extract_strided_slice %10 {offsets = [2, 0], sizes = [1, 128], strides = [1, 1]} : vector<4x128xf32> to vector<1x128xf32>
    %15 = vector.shape_cast %14 : vector<1x128xf32> to vector<1x128xf32>
    %16 = vector.broadcast %15 : vector<1x128xf32> to vector<2x128xf32>
    %17 = vector.extract_strided_slice %10 {offsets = [3, 0], sizes = [1, 128], strides = [1, 1]} : vector<4x128xf32> to vector<1x128xf32>
    %18 = vector.shape_cast %17 : vector<1x128xf32> to vector<1x128xf32>
    %19 = vector.broadcast %18 : vector<1x128xf32> to vector<2x128xf32>
    %c0_5 = arith.constant 0 : index
    %c0_6 = arith.constant 0 : index
    %20 = vector.load %arg4[%c0_5, %c0_6] : memref<64x8xf32, #tpu.memory_space<vmem>>, vector<64x8xf32>
    %c0_7 = arith.constant 0 : index
    %c0_8 = arith.constant 0 : index
    %21 = vector.load %arg5[%c0_7, %c0_8] : memref<2x8xf32, #tpu.memory_space<vmem>>, vector<2x8xf32>
    %c0_9 = arith.constant 0 : index
    %c0_10 = arith.constant 0 : index
    %22 = vector.load %arg0[%c0_9, %c0_10] : memref<16x8xf32, #tpu.memory_space<vmem>>, vector<16x8xf32>
    %cst_11 = arith.constant dense<0.000000e+00> : vector<16x128xf32>
    %23 = tpu.matmul %22, %2, %cst_11 {dimension_numbers = #tpu.dot_dimension_numbers<[1], [0], [0], [1], [0, 0, 1, 1], [], []>} : vector<16x8xf32>, vector<8x128xf32>, vector<16x128xf32> -> vector<16x128xf32>
    %24 = vector.extract_strided_slice %10 {offsets = [0, 0], sizes = [1, 128], strides = [1, 1]} : vector<4x128xf32> to vector<1x128xf32>
    %25 = vector.shape_cast %24 : vector<1x128xf32> to vector<1x128xf32>
    %26 = vector.broadcast %25 : vector<1x128xf32> to vector<16x128xf32>
    %27 = arith.addf %23, %26 : vector<16x128xf32>
    %28 = vector.extract_strided_slice %27 {offsets = [0, 0], sizes = [2, 128], strides = [1, 1]} : vector<16x128xf32> to vector<2x128xf32>
    %cst_12 = arith.constant dense<0.000000e+00> : vector<2x128xf32>
    %29 = tpu.matmul %0, %6, %cst_12 {dimension_numbers = #tpu.dot_dimension_numbers<[1], [0], [0], [1], [0, 0, 1, 1], [], []>} : vector<2x32xf32>, vector<32x128xf32>, vector<2x128xf32> -> vector<2x128xf32>
    %30 = arith.addf %28, %29 : vector<2x128xf32>
    %cst_13 = arith.constant 5.000000e-01 : f32
    %31 = vector.broadcast %cst_13 : f32 to vector<2x128xf32>
    %32 = arith.mulf %31, %30 : vector<2x128xf32>
    %33 = math.tanh %32 : vector<2x128xf32>
    %cst_14 = arith.constant 5.000000e-01 : f32
    %34 = vector.broadcast %cst_14 : f32 to vector<2x128xf32>
    %35 = arith.mulf %34, %33 : vector<2x128xf32>
    %cst_15 = arith.constant 5.000000e-01 : f32
    %36 = vector.broadcast %cst_15 : f32 to vector<2x128xf32>
    %37 = arith.addf %35, %36 : vector<2x128xf32>
    %38 = math.tanh %30 : vector<2x128xf32>
    %39 = vector.extract_strided_slice %37 {offsets = [0, 0], sizes = [2, 32], strides = [1, 1]} : vector<2x128xf32> to vector<2x32xf32>
    %40 = vector.extract_strided_slice %37 {offsets = [0, 32], sizes = [2, 32], strides = [1, 1]} : vector<2x128xf32> to vector<2x32xf32>
    %41 = vector.extract_strided_slice %38 {offsets = [0, 64], sizes = [2, 32], strides = [1, 1]} : vector<2x128xf32> to vector<2x32xf32>
    %42 = vector.extract_strided_slice %37 {offsets = [0, 96], sizes = [2, 32], strides = [1, 1]} : vector<2x128xf32> to vector<2x32xf32>
    %43 = arith.mulf %40, %0 : vector<2x32xf32>
    %44 = arith.mulf %39, %41 : vector<2x32xf32>
    %45 = arith.addf %43, %44 : vector<2x32xf32>
    %46 = math.tanh %45 : vector<2x32xf32>
    %47 = arith.mulf %42, %46 : vector<2x32xf32>
    %cst_16 = arith.constant dense<0.000000e+00> : vector<2x128xf32>
    %48 = tpu.matmul %47, %3, %cst_16 {dimension_numbers = #tpu.dot_dimension_numbers<[1], [0], [0], [1], [0, 0, 1, 1], [], []>} : vector<2x32xf32>, vector<32x128xf32>, vector<2x128xf32> -> vector<2x128xf32>
    %49 = arith.addf %48, %13 : vector<2x128xf32>
    %cst_17 = arith.constant dense<0.000000e+00> : vector<2x128xf32>
    %50 = tpu.matmul %0, %7, %cst_17 {dimension_numbers = #tpu.dot_dimension_numbers<[1], [0], [0], [1], [0, 0, 1, 1], [], []>} : vector<2x32xf32>, vector<32x128xf32>, vector<2x128xf32> -> vector<2x128xf32>
    %51 = arith.addf %49, %50 : vector<2x128xf32>
    %cst_18 = arith.constant 5.000000e-01 : f32
    %52 = vector.broadcast %cst_18 : f32 to vector<2x128xf32>
    %53 = arith.mulf %52, %51 : vector<2x128xf32>
    %54 = math.tanh %53 : vector<2x128xf32>
    %cst_19 = arith.constant 5.000000e-01 : f32
    %55 = vector.broadcast %cst_19 : f32 to vector<2x128xf32>
    %56 = arith.mulf %55, %54 : vector<2x128xf32>
    %cst_20 = arith.constant 5.000000e-01 : f32
    %57 = vector.broadcast %cst_20 : f32 to vector<2x128xf32>
    %58 = arith.addf %56, %57 : vector<2x128xf32>
    %59 = math.tanh %51 : vector<2x128xf32>
    %60 = vector.extract_strided_slice %58 {offsets = [0, 0], sizes = [2, 32], strides = [1, 1]} : vector<2x128xf32> to vector<2x32xf32>
    %61 = vector.extract_strided_slice %58 {offsets = [0, 32], sizes = [2, 32], strides = [1, 1]} : vector<2x128xf32> to vector<2x32xf32>
    %62 = vector.extract_strided_slice %59 {offsets = [0, 64], sizes = [2, 32], strides = [1, 1]} : vector<2x128xf32> to vector<2x32xf32>
    %63 = vector.extract_strided_slice %58 {offsets = [0, 96], sizes = [2, 32], strides = [1, 1]} : vector<2x128xf32> to vector<2x32xf32>
    %64 = arith.mulf %61, %0 : vector<2x32xf32>
    %65 = arith.mulf %60, %62 : vector<2x32xf32>
    %66 = arith.addf %64, %65 : vector<2x32xf32>
    %67 = math.tanh %66 : vector<2x32xf32>
    %68 = arith.mulf %63, %67 : vector<2x32xf32>
    %69 = vector.extract_strided_slice %27 {offsets = [2, 0], sizes = [2, 128], strides = [1, 1]} : vector<16x128xf32> to vector<2x128xf32>
    %cst_21 = arith.constant dense<0.000000e+00> : vector<2x128xf32>
    %70 = tpu.matmul %47, %6, %cst_21 {dimension_numbers = #tpu.dot_dimension_numbers<[1], [0], [0], [1], [0, 0, 1, 1], [], []>} : vector<2x32xf32>, vector<32x128xf32>, vector<2x128xf32> -> vector<2x128xf32>
    %71 = arith.addf %69, %70 : vector<2x128xf32>
    %cst_22 = arith.constant 5.000000e-01 : f32
    %72 = vector.broadcast %cst_22 : f32 to vector<2x128xf32>
    %73 = arith.mulf %72, %71 : vector<2x128xf32>
    %74 = math.tanh %73 : vector<2x128xf32>
    %cst_23 = arith.constant 5.000000e-01 : f32
    %75 = vector.broadcast %cst_23 : f32 to vector<2x128xf32>
    %76 = arith.mulf %75, %74 : vector<2x128xf32>
    %cst_24 = arith.constant 5.000000e-01 : f32
    %77 = vector.broadcast %cst_24 : f32 to vector<2x128xf32>
    %78 = arith.addf %76, %77 : vector<2x128xf32>
    %79 = math.tanh %71 : vector<2x128xf32>
    %80 = vector.extract_strided_slice %78 {offsets = [0, 0], sizes = [2, 32], strides = [1, 1]} : vector<2x128xf32> to vector<2x32xf32>
    %81 = vector.extract_strided_slice %78 {offsets = [0, 32], sizes = [2, 32], strides = [1, 1]} : vector<2x128xf32> to vector<2x32xf32>
    %82 = vector.extract_strided_slice %79 {offsets = [0, 64], sizes = [2, 32], strides = [1, 1]} : vector<2x128xf32> to vector<2x32xf32>
    %83 = vector.extract_strided_slice %78 {offsets = [0, 96], sizes = [2, 32], strides = [1, 1]} : vector<2x128xf32> to vector<2x32xf32>
    %84 = arith.mulf %81, %45 : vector<2x32xf32>
    %85 = arith.mulf %80, %82 : vector<2x32xf32>
    %86 = arith.addf %84, %85 : vector<2x32xf32>
    %87 = math.tanh %86 : vector<2x32xf32>
    %88 = arith.mulf %83, %87 : vector<2x32xf32>
    %cst_25 = arith.constant dense<0.000000e+00> : vector<2x128xf32>
    %89 = tpu.matmul %88, %3, %cst_25 {dimension_numbers = #tpu.dot_dimension_numbers<[1], [0], [0], [1], [0, 0, 1, 1], [], []>} : vector<2x32xf32>, vector<32x128xf32>, vector<2x128xf32> -> vector<2x128xf32>
    %90 = arith.addf %89, %13 : vector<2x128xf32>
    %cst_26 = arith.constant dense<0.000000e+00> : vector<2x128xf32>
    %91 = tpu.matmul %68, %7, %cst_26 {dimension_numbers = #tpu.dot_dimension_numbers<[1], [0], [0], [1], [0, 0, 1, 1], [], []>} : vector<2x32xf32>, vector<32x128xf32>, vector<2x128xf32> -> vector<2x128xf32>
    %92 = arith.addf %90, %91 : vector<2x128xf32>
    %cst_27 = arith.constant 5.000000e-01 : f32
    %93 = vector.broadcast %cst_27 : f32 to vector<2x128xf32>
    %94 = arith.mulf %93, %92 : vector<2x128xf32>
    %95 = math.tanh %94 : vector<2x128xf32>
    %cst_28 = arith.constant 5.000000e-01 : f32
    %96 = vector.broadcast %cst_28 : f32 to vector<2x128xf32>
    %97 = arith.mulf %96, %95 : vector<2x128xf32>
    %cst_29 = arith.constant 5.000000e-01 : f32
    %98 = vector.broadcast %cst_29 : f32 to vector<2x128xf32>
    %99 = arith.addf %97, %98 : vector<2x128xf32>
    %100 = math.tanh %92 : vector<2x128xf32>
    %101 = vector.extract_strided_slice %99 {offsets = [0, 0], sizes = [2, 32], strides = [1, 1]} : vector<2x128xf32> to vector<2x32xf32>
    %102 = vector.extract_strided_slice %99 {offsets = [0, 32], sizes = [2, 32], strides = [1, 1]} : vector<2x128xf32> to vector<2x32xf32>
    %103 = vector.extract_strided_slice %100 {offsets = [0, 64], sizes = [2, 32], strides = [1, 1]} : vector<2x128xf32> to vector<2x32xf32>
    %104 = vector.extract_strided_slice %99 {offsets = [0, 96], sizes = [2, 32], strides = [1, 1]} : vector<2x128xf32> to vector<2x32xf32>
    %105 = arith.mulf %102, %66 : vector<2x32xf32>
    %106 = arith.mulf %101, %103 : vector<2x32xf32>
    %107 = arith.addf %105, %106 : vector<2x32xf32>
    %108 = math.tanh %107 : vector<2x32xf32>
    %109 = arith.mulf %104, %108 : vector<2x32xf32>
    %110 = vector.extract_strided_slice %27 {offsets = [4, 0], sizes = [2, 128], strides = [1, 1]} : vector<16x128xf32> to vector<2x128xf32>
    %cst_30 = arith.constant dense<0.000000e+00> : vector<2x128xf32>
    %111 = tpu.matmul %88, %6, %cst_30 {dimension_numbers = #tpu.dot_dimension_numbers<[1], [0], [0], [1], [0, 0, 1, 1], [], []>} : vector<2x32xf32>, vector<32x128xf32>, vector<2x128xf32> -> vector<2x128xf32>
    %112 = arith.addf %110, %111 : vector<2x128xf32>
    %cst_31 = arith.constant 5.000000e-01 : f32
    %113 = vector.broadcast %cst_31 : f32 to vector<2x128xf32>
    %114 = arith.mulf %113, %112 : vector<2x128xf32>
    %115 = math.tanh %114 : vector<2x128xf32>
    %cst_32 = arith.constant 5.000000e-01 : f32
    %116 = vector.broadcast %cst_32 : f32 to vector<2x128xf32>
    %117 = arith.mulf %116, %115 : vector<2x128xf32>
    %cst_33 = arith.constant 5.000000e-01 : f32
    %118 = vector.broadcast %cst_33 : f32 to vector<2x128xf32>
    %119 = arith.addf %117, %118 : vector<2x128xf32>
    %120 = math.tanh %112 : vector<2x128xf32>
    %121 = vector.extract_strided_slice %119 {offsets = [0, 0], sizes = [2, 32], strides = [1, 1]} : vector<2x128xf32> to vector<2x32xf32>
    %122 = vector.extract_strided_slice %119 {offsets = [0, 32], sizes = [2, 32], strides = [1, 1]} : vector<2x128xf32> to vector<2x32xf32>
    %123 = vector.extract_strided_slice %120 {offsets = [0, 64], sizes = [2, 32], strides = [1, 1]} : vector<2x128xf32> to vector<2x32xf32>
    %124 = vector.extract_strided_slice %119 {offsets = [0, 96], sizes = [2, 32], strides = [1, 1]} : vector<2x128xf32> to vector<2x32xf32>
    %125 = arith.mulf %122, %86 : vector<2x32xf32>
    %126 = arith.mulf %121, %123 : vector<2x32xf32>
    %127 = arith.addf %125, %126 : vector<2x32xf32>
    %128 = math.tanh %127 : vector<2x32xf32>
    %129 = arith.mulf %124, %128 : vector<2x32xf32>
    %cst_34 = arith.constant dense<0.000000e+00> : vector<2x128xf32>
    %130 = tpu.matmul %129, %3, %cst_34 {dimension_numbers = #tpu.dot_dimension_numbers<[1], [0], [0], [1], [0, 0, 1, 1], [], []>} : vector<2x32xf32>, vector<32x128xf32>, vector<2x128xf32> -> vector<2x128xf32>
    %131 = arith.addf %130, %13 : vector<2x128xf32>
    %cst_35 = arith.constant dense<0.000000e+00> : vector<2x128xf32>
    %132 = tpu.matmul %109, %7, %cst_35 {dimension_numbers = #tpu.dot_dimension_numbers<[1], [0], [0], [1], [0, 0, 1, 1], [], []>} : vector<2x32xf32>, vector<32x128xf32>, vector<2x128xf32> -> vector<2x128xf32>
    %133 = arith.addf %131, %132 : vector<2x128xf32>
    %cst_36 = arith.constant 5.000000e-01 : f32
    %134 = vector.broadcast %cst_36 : f32 to vector<2x128xf32>
    %135 = arith.mulf %134, %133 : vector<2x128xf32>
    %136 = math.tanh %135 : vector<2x128xf32>
    %cst_37 = arith.constant 5.000000e-01 : f32
    %137 = vector.broadcast %cst_37 : f32 to vector<2x128xf32>
    %138 = arith.mulf %137, %136 : vector<2x128xf32>
    %cst_38 = arith.constant 5.000000e-01 : f32
    %139 = vector.broadcast %cst_38 : f32 to vector<2x128xf32>
    %140 = arith.addf %138, %139 : vector<2x128xf32>
    %141 = math.tanh %133 : vector<2x128xf32>
    %142 = vector.extract_strided_slice %140 {offsets = [0, 0], sizes = [2, 32], strides = [1, 1]} : vector<2x128xf32> to vector<2x32xf32>
    %143 = vector.extract_strided_slice %140 {offsets = [0, 32], sizes = [2, 32], strides = [1, 1]} : vector<2x128xf32> to vector<2x32xf32>
    %144 = vector.extract_strided_slice %141 {offsets = [0, 64], sizes = [2, 32], strides = [1, 1]} : vector<2x128xf32> to vector<2x32xf32>
    %145 = vector.extract_strided_slice %140 {offsets = [0, 96], sizes = [2, 32], strides = [1, 1]} : vector<2x128xf32> to vector<2x32xf32>
    %146 = arith.mulf %143, %107 : vector<2x32xf32>
    %147 = arith.mulf %142, %144 : vector<2x32xf32>
    %148 = arith.addf %146, %147 : vector<2x32xf32>
    %149 = math.tanh %148 : vector<2x32xf32>
    %150 = arith.mulf %145, %149 : vector<2x32xf32>
    %151 = vector.extract_strided_slice %27 {offsets = [6, 0], sizes = [2, 128], strides = [1, 1]} : vector<16x128xf32> to vector<2x128xf32>
    %cst_39 = arith.constant dense<0.000000e+00> : vector<2x128xf32>
    %152 = tpu.matmul %129, %6, %cst_39 {dimension_numbers = #tpu.dot_dimension_numbers<[1], [0], [0], [1], [0, 0, 1, 1], [], []>} : vector<2x32xf32>, vector<32x128xf32>, vector<2x128xf32> -> vector<2x128xf32>
    %153 = arith.addf %151, %152 : vector<2x128xf32>
    %cst_40 = arith.constant 5.000000e-01 : f32
    %154 = vector.broadcast %cst_40 : f32 to vector<2x128xf32>
    %155 = arith.mulf %154, %153 : vector<2x128xf32>
    %156 = math.tanh %155 : vector<2x128xf32>
    %cst_41 = arith.constant 5.000000e-01 : f32
    %157 = vector.broadcast %cst_41 : f32 to vector<2x128xf32>
    %158 = arith.mulf %157, %156 : vector<2x128xf32>
    %cst_42 = arith.constant 5.000000e-01 : f32
    %159 = vector.broadcast %cst_42 : f32 to vector<2x128xf32>
    %160 = arith.addf %158, %159 : vector<2x128xf32>
    %161 = math.tanh %153 : vector<2x128xf32>
    %162 = vector.extract_strided_slice %160 {offsets = [0, 0], sizes = [2, 32], strides = [1, 1]} : vector<2x128xf32> to vector<2x32xf32>
    %163 = vector.extract_strided_slice %160 {offsets = [0, 32], sizes = [2, 32], strides = [1, 1]} : vector<2x128xf32> to vector<2x32xf32>
    %164 = vector.extract_strided_slice %161 {offsets = [0, 64], sizes = [2, 32], strides = [1, 1]} : vector<2x128xf32> to vector<2x32xf32>
    %165 = vector.extract_strided_slice %160 {offsets = [0, 96], sizes = [2, 32], strides = [1, 1]} : vector<2x128xf32> to vector<2x32xf32>
    %166 = arith.mulf %163, %127 : vector<2x32xf32>
    %167 = arith.mulf %162, %164 : vector<2x32xf32>
    %168 = arith.addf %166, %167 : vector<2x32xf32>
    %169 = math.tanh %168 : vector<2x32xf32>
    %170 = arith.mulf %165, %169 : vector<2x32xf32>
    %cst_43 = arith.constant dense<0.000000e+00> : vector<2x128xf32>
    %171 = tpu.matmul %170, %3, %cst_43 {dimension_numbers = #tpu.dot_dimension_numbers<[1], [0], [0], [1], [0, 0, 1, 1], [], []>} : vector<2x32xf32>, vector<32x128xf32>, vector<2x128xf32> -> vector<2x128xf32>
    %172 = arith.addf %171, %13 : vector<2x128xf32>
    %cst_44 = arith.constant dense<0.000000e+00> : vector<2x128xf32>
    %173 = tpu.matmul %150, %7, %cst_44 {dimension_numbers = #tpu.dot_dimension_numbers<[1], [0], [0], [1], [0, 0, 1, 1], [], []>} : vector<2x32xf32>, vector<32x128xf32>, vector<2x128xf32> -> vector<2x128xf32>
    %174 = arith.addf %172, %173 : vector<2x128xf32>
    %cst_45 = arith.constant 5.000000e-01 : f32
    %175 = vector.broadcast %cst_45 : f32 to vector<2x128xf32>
    %176 = arith.mulf %175, %174 : vector<2x128xf32>
    %177 = math.tanh %176 : vector<2x128xf32>
    %cst_46 = arith.constant 5.000000e-01 : f32
    %178 = vector.broadcast %cst_46 : f32 to vector<2x128xf32>
    %179 = arith.mulf %178, %177 : vector<2x128xf32>
    %cst_47 = arith.constant 5.000000e-01 : f32
    %180 = vector.broadcast %cst_47 : f32 to vector<2x128xf32>
    %181 = arith.addf %179, %180 : vector<2x128xf32>
    %182 = math.tanh %174 : vector<2x128xf32>
    %183 = vector.extract_strided_slice %181 {offsets = [0, 0], sizes = [2, 32], strides = [1, 1]} : vector<2x128xf32> to vector<2x32xf32>
    %184 = vector.extract_strided_slice %181 {offsets = [0, 32], sizes = [2, 32], strides = [1, 1]} : vector<2x128xf32> to vector<2x32xf32>
    %185 = vector.extract_strided_slice %182 {offsets = [0, 64], sizes = [2, 32], strides = [1, 1]} : vector<2x128xf32> to vector<2x32xf32>
    %186 = vector.extract_strided_slice %181 {offsets = [0, 96], sizes = [2, 32], strides = [1, 1]} : vector<2x128xf32> to vector<2x32xf32>
    %187 = arith.mulf %184, %148 : vector<2x32xf32>
    %188 = arith.mulf %183, %185 : vector<2x32xf32>
    %189 = arith.addf %187, %188 : vector<2x32xf32>
    %190 = math.tanh %189 : vector<2x32xf32>
    %191 = arith.mulf %186, %190 : vector<2x32xf32>
    %192 = vector.extract_strided_slice %27 {offsets = [8, 0], sizes = [2, 128], strides = [1, 1]} : vector<16x128xf32> to vector<2x128xf32>
    %cst_48 = arith.constant dense<0.000000e+00> : vector<2x128xf32>
    %193 = tpu.matmul %170, %6, %cst_48 {dimension_numbers = #tpu.dot_dimension_numbers<[1], [0], [0], [1], [0, 0, 1, 1], [], []>} : vector<2x32xf32>, vector<32x128xf32>, vector<2x128xf32> -> vector<2x128xf32>
    %194 = arith.addf %192, %193 : vector<2x128xf32>
    %cst_49 = arith.constant 5.000000e-01 : f32
    %195 = vector.broadcast %cst_49 : f32 to vector<2x128xf32>
    %196 = arith.mulf %195, %194 : vector<2x128xf32>
    %197 = math.tanh %196 : vector<2x128xf32>
    %cst_50 = arith.constant 5.000000e-01 : f32
    %198 = vector.broadcast %cst_50 : f32 to vector<2x128xf32>
    %199 = arith.mulf %198, %197 : vector<2x128xf32>
    %cst_51 = arith.constant 5.000000e-01 : f32
    %200 = vector.broadcast %cst_51 : f32 to vector<2x128xf32>
    %201 = arith.addf %199, %200 : vector<2x128xf32>
    %202 = math.tanh %194 : vector<2x128xf32>
    %203 = vector.extract_strided_slice %201 {offsets = [0, 0], sizes = [2, 32], strides = [1, 1]} : vector<2x128xf32> to vector<2x32xf32>
    %204 = vector.extract_strided_slice %201 {offsets = [0, 32], sizes = [2, 32], strides = [1, 1]} : vector<2x128xf32> to vector<2x32xf32>
    %205 = vector.extract_strided_slice %202 {offsets = [0, 64], sizes = [2, 32], strides = [1, 1]} : vector<2x128xf32> to vector<2x32xf32>
    %206 = vector.extract_strided_slice %201 {offsets = [0, 96], sizes = [2, 32], strides = [1, 1]} : vector<2x128xf32> to vector<2x32xf32>
    %207 = arith.mulf %204, %168 : vector<2x32xf32>
    %208 = arith.mulf %203, %205 : vector<2x32xf32>
    %209 = arith.addf %207, %208 : vector<2x32xf32>
    %210 = math.tanh %209 : vector<2x32xf32>
    %211 = arith.mulf %206, %210 : vector<2x32xf32>
    %cst_52 = arith.constant dense<0.000000e+00> : vector<2x128xf32>
    %212 = tpu.matmul %211, %3, %cst_52 {dimension_numbers = #tpu.dot_dimension_numbers<[1], [0], [0], [1], [0, 0, 1, 1], [], []>} : vector<2x32xf32>, vector<32x128xf32>, vector<2x128xf32> -> vector<2x128xf32>
    %213 = arith.addf %212, %13 : vector<2x128xf32>
    %cst_53 = arith.constant dense<0.000000e+00> : vector<2x128xf32>
    %214 = tpu.matmul %191, %7, %cst_53 {dimension_numbers = #tpu.dot_dimension_numbers<[1], [0], [0], [1], [0, 0, 1, 1], [], []>} : vector<2x32xf32>, vector<32x128xf32>, vector<2x128xf32> -> vector<2x128xf32>
    %215 = arith.addf %213, %214 : vector<2x128xf32>
    %cst_54 = arith.constant 5.000000e-01 : f32
    %216 = vector.broadcast %cst_54 : f32 to vector<2x128xf32>
    %217 = arith.mulf %216, %215 : vector<2x128xf32>
    %218 = math.tanh %217 : vector<2x128xf32>
    %cst_55 = arith.constant 5.000000e-01 : f32
    %219 = vector.broadcast %cst_55 : f32 to vector<2x128xf32>
    %220 = arith.mulf %219, %218 : vector<2x128xf32>
    %cst_56 = arith.constant 5.000000e-01 : f32
    %221 = vector.broadcast %cst_56 : f32 to vector<2x128xf32>
    %222 = arith.addf %220, %221 : vector<2x128xf32>
    %223 = math.tanh %215 : vector<2x128xf32>
    %224 = vector.extract_strided_slice %222 {offsets = [0, 0], sizes = [2, 32], strides = [1, 1]} : vector<2x128xf32> to vector<2x32xf32>
    %225 = vector.extract_strided_slice %222 {offsets = [0, 32], sizes = [2, 32], strides = [1, 1]} : vector<2x128xf32> to vector<2x32xf32>
    %226 = vector.extract_strided_slice %223 {offsets = [0, 64], sizes = [2, 32], strides = [1, 1]} : vector<2x128xf32> to vector<2x32xf32>
    %227 = vector.extract_strided_slice %222 {offsets = [0, 96], sizes = [2, 32], strides = [1, 1]} : vector<2x128xf32> to vector<2x32xf32>
    %228 = arith.mulf %225, %189 : vector<2x32xf32>
    %229 = arith.mulf %224, %226 : vector<2x32xf32>
    %230 = arith.addf %228, %229 : vector<2x32xf32>
    %231 = math.tanh %230 : vector<2x32xf32>
    %232 = arith.mulf %227, %231 : vector<2x32xf32>
    %233 = vector.extract_strided_slice %27 {offsets = [10, 0], sizes = [2, 128], strides = [1, 1]} : vector<16x128xf32> to vector<2x128xf32>
    %cst_57 = arith.constant dense<0.000000e+00> : vector<2x128xf32>
    %234 = tpu.matmul %211, %6, %cst_57 {dimension_numbers = #tpu.dot_dimension_numbers<[1], [0], [0], [1], [0, 0, 1, 1], [], []>} : vector<2x32xf32>, vector<32x128xf32>, vector<2x128xf32> -> vector<2x128xf32>
    %235 = arith.addf %233, %234 : vector<2x128xf32>
    %cst_58 = arith.constant 5.000000e-01 : f32
    %236 = vector.broadcast %cst_58 : f32 to vector<2x128xf32>
    %237 = arith.mulf %236, %235 : vector<2x128xf32>
    %238 = math.tanh %237 : vector<2x128xf32>
    %cst_59 = arith.constant 5.000000e-01 : f32
    %239 = vector.broadcast %cst_59 : f32 to vector<2x128xf32>
    %240 = arith.mulf %239, %238 : vector<2x128xf32>
    %cst_60 = arith.constant 5.000000e-01 : f32
    %241 = vector.broadcast %cst_60 : f32 to vector<2x128xf32>
    %242 = arith.addf %240, %241 : vector<2x128xf32>
    %243 = math.tanh %235 : vector<2x128xf32>
    %244 = vector.extract_strided_slice %242 {offsets = [0, 0], sizes = [2, 32], strides = [1, 1]} : vector<2x128xf32> to vector<2x32xf32>
    %245 = vector.extract_strided_slice %242 {offsets = [0, 32], sizes = [2, 32], strides = [1, 1]} : vector<2x128xf32> to vector<2x32xf32>
    %246 = vector.extract_strided_slice %243 {offsets = [0, 64], sizes = [2, 32], strides = [1, 1]} : vector<2x128xf32> to vector<2x32xf32>
    %247 = vector.extract_strided_slice %242 {offsets = [0, 96], sizes = [2, 32], strides = [1, 1]} : vector<2x128xf32> to vector<2x32xf32>
    %248 = arith.mulf %245, %209 : vector<2x32xf32>
    %249 = arith.mulf %244, %246 : vector<2x32xf32>
    %250 = arith.addf %248, %249 : vector<2x32xf32>
    %251 = math.tanh %250 : vector<2x32xf32>
    %252 = arith.mulf %247, %251 : vector<2x32xf32>
    %cst_61 = arith.constant dense<0.000000e+00> : vector<2x128xf32>
    %253 = tpu.matmul %252, %3, %cst_61 {dimension_numbers = #tpu.dot_dimension_numbers<[1], [0], [0], [1], [0, 0, 1, 1], [], []>} : vector<2x32xf32>, vector<32x128xf32>, vector<2x128xf32> -> vector<2x128xf32>
    %254 = arith.addf %253, %13 : vector<2x128xf32>
    %cst_62 = arith.constant dense<0.000000e+00> : vector<2x128xf32>
    %255 = tpu.matmul %232, %7, %cst_62 {dimension_numbers = #tpu.dot_dimension_numbers<[1], [0], [0], [1], [0, 0, 1, 1], [], []>} : vector<2x32xf32>, vector<32x128xf32>, vector<2x128xf32> -> vector<2x128xf32>
    %256 = arith.addf %254, %255 : vector<2x128xf32>
    %cst_63 = arith.constant 5.000000e-01 : f32
    %257 = vector.broadcast %cst_63 : f32 to vector<2x128xf32>
    %258 = arith.mulf %257, %256 : vector<2x128xf32>
    %259 = math.tanh %258 : vector<2x128xf32>
    %cst_64 = arith.constant 5.000000e-01 : f32
    %260 = vector.broadcast %cst_64 : f32 to vector<2x128xf32>
    %261 = arith.mulf %260, %259 : vector<2x128xf32>
    %cst_65 = arith.constant 5.000000e-01 : f32
    %262 = vector.broadcast %cst_65 : f32 to vector<2x128xf32>
    %263 = arith.addf %261, %262 : vector<2x128xf32>
    %264 = math.tanh %256 : vector<2x128xf32>
    %265 = vector.extract_strided_slice %263 {offsets = [0, 0], sizes = [2, 32], strides = [1, 1]} : vector<2x128xf32> to vector<2x32xf32>
    %266 = vector.extract_strided_slice %263 {offsets = [0, 32], sizes = [2, 32], strides = [1, 1]} : vector<2x128xf32> to vector<2x32xf32>
    %267 = vector.extract_strided_slice %264 {offsets = [0, 64], sizes = [2, 32], strides = [1, 1]} : vector<2x128xf32> to vector<2x32xf32>
    %268 = vector.extract_strided_slice %263 {offsets = [0, 96], sizes = [2, 32], strides = [1, 1]} : vector<2x128xf32> to vector<2x32xf32>
    %269 = arith.mulf %266, %230 : vector<2x32xf32>
    %270 = arith.mulf %265, %267 : vector<2x32xf32>
    %271 = arith.addf %269, %270 : vector<2x32xf32>
    %272 = math.tanh %271 : vector<2x32xf32>
    %273 = arith.mulf %268, %272 : vector<2x32xf32>
    %274 = vector.extract_strided_slice %27 {offsets = [12, 0], sizes = [2, 128], strides = [1, 1]} : vector<16x128xf32> to vector<2x128xf32>
    %cst_66 = arith.constant dense<0.000000e+00> : vector<2x128xf32>
    %275 = tpu.matmul %252, %6, %cst_66 {dimension_numbers = #tpu.dot_dimension_numbers<[1], [0], [0], [1], [0, 0, 1, 1], [], []>} : vector<2x32xf32>, vector<32x128xf32>, vector<2x128xf32> -> vector<2x128xf32>
    %276 = arith.addf %274, %275 : vector<2x128xf32>
    %cst_67 = arith.constant 5.000000e-01 : f32
    %277 = vector.broadcast %cst_67 : f32 to vector<2x128xf32>
    %278 = arith.mulf %277, %276 : vector<2x128xf32>
    %279 = math.tanh %278 : vector<2x128xf32>
    %cst_68 = arith.constant 5.000000e-01 : f32
    %280 = vector.broadcast %cst_68 : f32 to vector<2x128xf32>
    %281 = arith.mulf %280, %279 : vector<2x128xf32>
    %cst_69 = arith.constant 5.000000e-01 : f32
    %282 = vector.broadcast %cst_69 : f32 to vector<2x128xf32>
    %283 = arith.addf %281, %282 : vector<2x128xf32>
    %284 = math.tanh %276 : vector<2x128xf32>
    %285 = vector.extract_strided_slice %283 {offsets = [0, 0], sizes = [2, 32], strides = [1, 1]} : vector<2x128xf32> to vector<2x32xf32>
    %286 = vector.extract_strided_slice %283 {offsets = [0, 32], sizes = [2, 32], strides = [1, 1]} : vector<2x128xf32> to vector<2x32xf32>
    %287 = vector.extract_strided_slice %284 {offsets = [0, 64], sizes = [2, 32], strides = [1, 1]} : vector<2x128xf32> to vector<2x32xf32>
    %288 = vector.extract_strided_slice %283 {offsets = [0, 96], sizes = [2, 32], strides = [1, 1]} : vector<2x128xf32> to vector<2x32xf32>
    %289 = arith.mulf %286, %250 : vector<2x32xf32>
    %290 = arith.mulf %285, %287 : vector<2x32xf32>
    %291 = arith.addf %289, %290 : vector<2x32xf32>
    %292 = math.tanh %291 : vector<2x32xf32>
    %293 = arith.mulf %288, %292 : vector<2x32xf32>
    %cst_70 = arith.constant dense<0.000000e+00> : vector<2x128xf32>
    %294 = tpu.matmul %293, %3, %cst_70 {dimension_numbers = #tpu.dot_dimension_numbers<[1], [0], [0], [1], [0, 0, 1, 1], [], []>} : vector<2x32xf32>, vector<32x128xf32>, vector<2x128xf32> -> vector<2x128xf32>
    %295 = arith.addf %294, %13 : vector<2x128xf32>
    %cst_71 = arith.constant dense<0.000000e+00> : vector<2x128xf32>
    %296 = tpu.matmul %273, %7, %cst_71 {dimension_numbers = #tpu.dot_dimension_numbers<[1], [0], [0], [1], [0, 0, 1, 1], [], []>} : vector<2x32xf32>, vector<32x128xf32>, vector<2x128xf32> -> vector<2x128xf32>
    %297 = arith.addf %295, %296 : vector<2x128xf32>
    %cst_72 = arith.constant 5.000000e-01 : f32
    %298 = vector.broadcast %cst_72 : f32 to vector<2x128xf32>
    %299 = arith.mulf %298, %297 : vector<2x128xf32>
    %300 = math.tanh %299 : vector<2x128xf32>
    %cst_73 = arith.constant 5.000000e-01 : f32
    %301 = vector.broadcast %cst_73 : f32 to vector<2x128xf32>
    %302 = arith.mulf %301, %300 : vector<2x128xf32>
    %cst_74 = arith.constant 5.000000e-01 : f32
    %303 = vector.broadcast %cst_74 : f32 to vector<2x128xf32>
    %304 = arith.addf %302, %303 : vector<2x128xf32>
    %305 = math.tanh %297 : vector<2x128xf32>
    %306 = vector.extract_strided_slice %304 {offsets = [0, 0], sizes = [2, 32], strides = [1, 1]} : vector<2x128xf32> to vector<2x32xf32>
    %307 = vector.extract_strided_slice %304 {offsets = [0, 32], sizes = [2, 32], strides = [1, 1]} : vector<2x128xf32> to vector<2x32xf32>
    %308 = vector.extract_strided_slice %305 {offsets = [0, 64], sizes = [2, 32], strides = [1, 1]} : vector<2x128xf32> to vector<2x32xf32>
    %309 = vector.extract_strided_slice %304 {offsets = [0, 96], sizes = [2, 32], strides = [1, 1]} : vector<2x128xf32> to vector<2x32xf32>
    %310 = arith.mulf %307, %271 : vector<2x32xf32>
    %311 = arith.mulf %306, %308 : vector<2x32xf32>
    %312 = arith.addf %310, %311 : vector<2x32xf32>
    %313 = math.tanh %312 : vector<2x32xf32>
    %314 = arith.mulf %309, %313 : vector<2x32xf32>
    %315 = vector.extract_strided_slice %27 {offsets = [14, 0], sizes = [2, 128], strides = [1, 1]} : vector<16x128xf32> to vector<2x128xf32>
    %cst_75 = arith.constant dense<0.000000e+00> : vector<2x128xf32>
    %316 = tpu.matmul %293, %6, %cst_75 {dimension_numbers = #tpu.dot_dimension_numbers<[1], [0], [0], [1], [0, 0, 1, 1], [], []>} : vector<2x32xf32>, vector<32x128xf32>, vector<2x128xf32> -> vector<2x128xf32>
    %317 = arith.addf %315, %316 : vector<2x128xf32>
    %cst_76 = arith.constant 5.000000e-01 : f32
    %318 = vector.broadcast %cst_76 : f32 to vector<2x128xf32>
    %319 = arith.mulf %318, %317 : vector<2x128xf32>
    %320 = math.tanh %319 : vector<2x128xf32>
    %cst_77 = arith.constant 5.000000e-01 : f32
    %321 = vector.broadcast %cst_77 : f32 to vector<2x128xf32>
    %322 = arith.mulf %321, %320 : vector<2x128xf32>
    %cst_78 = arith.constant 5.000000e-01 : f32
    %323 = vector.broadcast %cst_78 : f32 to vector<2x128xf32>
    %324 = arith.addf %322, %323 : vector<2x128xf32>
    %325 = math.tanh %317 : vector<2x128xf32>
    %326 = vector.extract_strided_slice %324 {offsets = [0, 0], sizes = [2, 32], strides = [1, 1]} : vector<2x128xf32> to vector<2x32xf32>
    %327 = vector.extract_strided_slice %324 {offsets = [0, 32], sizes = [2, 32], strides = [1, 1]} : vector<2x128xf32> to vector<2x32xf32>
    %328 = vector.extract_strided_slice %325 {offsets = [0, 64], sizes = [2, 32], strides = [1, 1]} : vector<2x128xf32> to vector<2x32xf32>
    %329 = vector.extract_strided_slice %324 {offsets = [0, 96], sizes = [2, 32], strides = [1, 1]} : vector<2x128xf32> to vector<2x32xf32>
    %330 = arith.mulf %327, %291 : vector<2x32xf32>
    %331 = arith.mulf %326, %328 : vector<2x32xf32>
    %332 = arith.addf %330, %331 : vector<2x32xf32>
    %333 = math.tanh %332 : vector<2x32xf32>
    %334 = arith.mulf %329, %333 : vector<2x32xf32>
    %cst_79 = arith.constant dense<0.000000e+00> : vector<2x128xf32>
    %335 = tpu.matmul %334, %3, %cst_79 {dimension_numbers = #tpu.dot_dimension_numbers<[1], [0], [0], [1], [0, 0, 1, 1], [], []>} : vector<2x32xf32>, vector<32x128xf32>, vector<2x128xf32> -> vector<2x128xf32>
    %336 = arith.addf %335, %13 : vector<2x128xf32>
    %cst_80 = arith.constant dense<0.000000e+00> : vector<2x128xf32>
    %337 = tpu.matmul %314, %7, %cst_80 {dimension_numbers = #tpu.dot_dimension_numbers<[1], [0], [0], [1], [0, 0, 1, 1], [], []>} : vector<2x32xf32>, vector<32x128xf32>, vector<2x128xf32> -> vector<2x128xf32>
    %338 = arith.addf %336, %337 : vector<2x128xf32>
    %cst_81 = arith.constant 5.000000e-01 : f32
    %339 = vector.broadcast %cst_81 : f32 to vector<2x128xf32>
    %340 = arith.mulf %339, %338 : vector<2x128xf32>
    %341 = math.tanh %340 : vector<2x128xf32>
    %cst_82 = arith.constant 5.000000e-01 : f32
    %342 = vector.broadcast %cst_82 : f32 to vector<2x128xf32>
    %343 = arith.mulf %342, %341 : vector<2x128xf32>
    %cst_83 = arith.constant 5.000000e-01 : f32
    %344 = vector.broadcast %cst_83 : f32 to vector<2x128xf32>
    %345 = arith.addf %343, %344 : vector<2x128xf32>
    %346 = math.tanh %338 : vector<2x128xf32>
    %347 = vector.extract_strided_slice %345 {offsets = [0, 0], sizes = [2, 32], strides = [1, 1]} : vector<2x128xf32> to vector<2x32xf32>
    %348 = vector.extract_strided_slice %345 {offsets = [0, 32], sizes = [2, 32], strides = [1, 1]} : vector<2x128xf32> to vector<2x32xf32>
    %349 = vector.extract_strided_slice %346 {offsets = [0, 64], sizes = [2, 32], strides = [1, 1]} : vector<2x128xf32> to vector<2x32xf32>
    %350 = vector.extract_strided_slice %345 {offsets = [0, 96], sizes = [2, 32], strides = [1, 1]} : vector<2x128xf32> to vector<2x32xf32>
    %351 = arith.mulf %348, %312 : vector<2x32xf32>
    %352 = arith.mulf %347, %349 : vector<2x32xf32>
    %353 = arith.addf %351, %352 : vector<2x32xf32>
    %354 = math.tanh %353 : vector<2x32xf32>
    %355 = arith.mulf %350, %354 : vector<2x32xf32>
    %356 = vector.extract_strided_slice %20 {offsets = [0, 0], sizes = [32, 8], strides = [1, 1]} : vector<64x8xf32> to vector<32x8xf32>
    %cst_84 = arith.constant dense<0.000000e+00> : vector<2x8xf32>
    %357 = tpu.matmul %355, %356, %cst_84 {dimension_numbers = #tpu.dot_dimension_numbers<[1], [0], [0], [1], [0, 0, 1, 1], [], []>} : vector<2x32xf32>, vector<32x8xf32>, vector<2x8xf32> -> vector<2x8xf32>
    %358 = vector.extract_strided_slice %21 {offsets = [0, 0], sizes = [1, 8], strides = [1, 1]} : vector<2x8xf32> to vector<1x8xf32>
    %359 = vector.shape_cast %358 : vector<1x8xf32> to vector<1x8xf32>
    %360 = vector.broadcast %359 : vector<1x8xf32> to vector<2x8xf32>
    %361 = arith.addf %357, %360 : vector<2x8xf32>
    %362 = vector.extract_strided_slice %361 {offsets = [0, 0], sizes = [2, 5], strides = [1, 1]} : vector<2x8xf32> to vector<2x5xf32>
    %c0_85 = arith.constant 0 : index
    %c0_86 = arith.constant 0 : index
    %363 = vector.load %arg7[%c0_85, %c0_86] : memref<2x5xf32, #tpu.memory_space<vmem>>, vector<2x5xf32>
    tpu.vector_store %arg7[%c0_85, %c0_86], %362 {strides = array<i32>} : memref<2x5xf32, #tpu.memory_space<vmem>>, vector<2x5xf32>,
    %cst_87 = arith.constant dense<0.000000e+00> : vector<2x128xf32>
    %364 = tpu.matmul %334, %8, %cst_87 {dimension_numbers = #tpu.dot_dimension_numbers<[1], [0], [0], [1], [0, 0, 1, 1], [], []>} : vector<2x32xf32>, vector<32x128xf32>, vector<2x128xf32> -> vector<2x128xf32>
    %365 = arith.addf %16, %364 : vector<2x128xf32>
    %cst_88 = arith.constant 5.000000e-01 : f32
    %366 = vector.broadcast %cst_88 : f32 to vector<2x128xf32>
    %367 = arith.mulf %366, %365 : vector<2x128xf32>
    %368 = math.tanh %367 : vector<2x128xf32>
    %cst_89 = arith.constant 5.000000e-01 : f32
    %369 = vector.broadcast %cst_89 : f32 to vector<2x128xf32>
    %370 = arith.mulf %369, %368 : vector<2x128xf32>
    %cst_90 = arith.constant 5.000000e-01 : f32
    %371 = vector.broadcast %cst_90 : f32 to vector<2x128xf32>
    %372 = arith.addf %370, %371 : vector<2x128xf32>
    %373 = math.tanh %365 : vector<2x128xf32>
    %374 = vector.extract_strided_slice %372 {offsets = [0, 0], sizes = [2, 32], strides = [1, 1]} : vector<2x128xf32> to vector<2x32xf32>
    %375 = vector.extract_strided_slice %372 {offsets = [0, 32], sizes = [2, 32], strides = [1, 1]} : vector<2x128xf32> to vector<2x32xf32>
    %376 = vector.extract_strided_slice %373 {offsets = [0, 64], sizes = [2, 32], strides = [1, 1]} : vector<2x128xf32> to vector<2x32xf32>
    %377 = vector.extract_strided_slice %372 {offsets = [0, 96], sizes = [2, 32], strides = [1, 1]} : vector<2x128xf32> to vector<2x32xf32>
    %378 = arith.mulf %375, %332 : vector<2x32xf32>
    %379 = arith.mulf %374, %376 : vector<2x32xf32>
    %380 = arith.addf %378, %379 : vector<2x32xf32>
    %381 = math.tanh %380 : vector<2x32xf32>
    %382 = arith.mulf %377, %381 : vector<2x32xf32>
    %cst_91 = arith.constant dense<0.000000e+00> : vector<2x128xf32>
    %383 = tpu.matmul %382, %4, %cst_91 {dimension_numbers = #tpu.dot_dimension_numbers<[1], [0], [0], [1], [0, 0, 1, 1], [], []>} : vector<2x32xf32>, vector<32x128xf32>, vector<2x128xf32> -> vector<2x128xf32>
    %384 = arith.addf %383, %19 : vector<2x128xf32>
    %cst_92 = arith.constant dense<0.000000e+00> : vector<2x128xf32>
    %385 = tpu.matmul %355, %9, %cst_92 {dimension_numbers = #tpu.dot_dimension_numbers<[1], [0], [0], [1], [0, 0, 1, 1], [], []>} : vector<2x32xf32>, vector<32x128xf32>, vector<2x128xf32> -> vector<2x128xf32>
    %386 = arith.addf %384, %385 : vector<2x128xf32>
    %cst_93 = arith.constant 5.000000e-01 : f32
    %387 = vector.broadcast %cst_93 : f32 to vector<2x128xf32>
    %388 = arith.mulf %387, %386 : vector<2x128xf32>
    %389 = math.tanh %388 : vector<2x128xf32>
    %cst_94 = arith.constant 5.000000e-01 : f32
    %390 = vector.broadcast %cst_94 : f32 to vector<2x128xf32>
    %391 = arith.mulf %390, %389 : vector<2x128xf32>
    %cst_95 = arith.constant 5.000000e-01 : f32
    %392 = vector.broadcast %cst_95 : f32 to vector<2x128xf32>
    %393 = arith.addf %391, %392 : vector<2x128xf32>
    %394 = math.tanh %386 : vector<2x128xf32>
    %395 = vector.extract_strided_slice %393 {offsets = [0, 0], sizes = [2, 32], strides = [1, 1]} : vector<2x128xf32> to vector<2x32xf32>
    %396 = vector.extract_strided_slice %393 {offsets = [0, 32], sizes = [2, 32], strides = [1, 1]} : vector<2x128xf32> to vector<2x32xf32>
    %397 = vector.extract_strided_slice %394 {offsets = [0, 64], sizes = [2, 32], strides = [1, 1]} : vector<2x128xf32> to vector<2x32xf32>
    %398 = vector.extract_strided_slice %393 {offsets = [0, 96], sizes = [2, 32], strides = [1, 1]} : vector<2x128xf32> to vector<2x32xf32>
    %399 = arith.mulf %396, %353 : vector<2x32xf32>
    %400 = arith.mulf %395, %397 : vector<2x32xf32>
    %401 = arith.addf %399, %400 : vector<2x32xf32>
    %402 = math.tanh %401 : vector<2x32xf32>
    %403 = arith.mulf %398, %402 : vector<2x32xf32>
    %cst_96 = arith.constant dense<0.000000e+00> : vector<2x128xf32>
    %404 = tpu.matmul %382, %8, %cst_96 {dimension_numbers = #tpu.dot_dimension_numbers<[1], [0], [0], [1], [0, 0, 1, 1], [], []>} : vector<2x32xf32>, vector<32x128xf32>, vector<2x128xf32> -> vector<2x128xf32>
    %405 = arith.addf %16, %404 : vector<2x128xf32>
    %cst_97 = arith.constant 5.000000e-01 : f32
    %406 = vector.broadcast %cst_97 : f32 to vector<2x128xf32>
    %407 = arith.mulf %406, %405 : vector<2x128xf32>
    %408 = math.tanh %407 : vector<2x128xf32>
    %cst_98 = arith.constant 5.000000e-01 : f32
    %409 = vector.broadcast %cst_98 : f32 to vector<2x128xf32>
    %410 = arith.mulf %409, %408 : vector<2x128xf32>
    %cst_99 = arith.constant 5.000000e-01 : f32
    %411 = vector.broadcast %cst_99 : f32 to vector<2x128xf32>
    %412 = arith.addf %410, %411 : vector<2x128xf32>
    %413 = math.tanh %405 : vector<2x128xf32>
    %414 = vector.extract_strided_slice %412 {offsets = [0, 0], sizes = [2, 32], strides = [1, 1]} : vector<2x128xf32> to vector<2x32xf32>
    %415 = vector.extract_strided_slice %412 {offsets = [0, 32], sizes = [2, 32], strides = [1, 1]} : vector<2x128xf32> to vector<2x32xf32>
    %416 = vector.extract_strided_slice %413 {offsets = [0, 64], sizes = [2, 32], strides = [1, 1]} : vector<2x128xf32> to vector<2x32xf32>
    %417 = vector.extract_strided_slice %412 {offsets = [0, 96], sizes = [2, 32], strides = [1, 1]} : vector<2x128xf32> to vector<2x32xf32>
    %418 = arith.mulf %415, %380 : vector<2x32xf32>
    %419 = arith.mulf %414, %416 : vector<2x32xf32>
    %420 = arith.addf %418, %419 : vector<2x32xf32>
    %421 = math.tanh %420 : vector<2x32xf32>
    %422 = arith.mulf %417, %421 : vector<2x32xf32>
    %cst_100 = arith.constant dense<0.000000e+00> : vector<2x128xf32>
    %423 = tpu.matmul %422, %4, %cst_100 {dimension_numbers = #tpu.dot_dimension_numbers<[1], [0], [0], [1], [0, 0, 1, 1], [], []>} : vector<2x32xf32>, vector<32x128xf32>, vector<2x128xf32> -> vector<2x128xf32>
    %424 = arith.addf %423, %19 : vector<2x128xf32>
    %cst_101 = arith.constant dense<0.000000e+00> : vector<2x128xf32>
    %425 = tpu.matmul %403, %9, %cst_101 {dimension_numbers = #tpu.dot_dimension_numbers<[1], [0], [0], [1], [0, 0, 1, 1], [], []>} : vector<2x32xf32>, vector<32x128xf32>, vector<2x128xf32> -> vector<2x128xf32>
    %426 = arith.addf %424, %425 : vector<2x128xf32>
    %cst_102 = arith.constant 5.000000e-01 : f32
    %427 = vector.broadcast %cst_102 : f32 to vector<2x128xf32>
    %428 = arith.mulf %427, %426 : vector<2x128xf32>
    %429 = math.tanh %428 : vector<2x128xf32>
    %cst_103 = arith.constant 5.000000e-01 : f32
    %430 = vector.broadcast %cst_103 : f32 to vector<2x128xf32>
    %431 = arith.mulf %430, %429 : vector<2x128xf32>
    %cst_104 = arith.constant 5.000000e-01 : f32
    %432 = vector.broadcast %cst_104 : f32 to vector<2x128xf32>
    %433 = arith.addf %431, %432 : vector<2x128xf32>
    %434 = math.tanh %426 : vector<2x128xf32>
    %435 = vector.extract_strided_slice %433 {offsets = [0, 0], sizes = [2, 32], strides = [1, 1]} : vector<2x128xf32> to vector<2x32xf32>
    %436 = vector.extract_strided_slice %433 {offsets = [0, 32], sizes = [2, 32], strides = [1, 1]} : vector<2x128xf32> to vector<2x32xf32>
    %437 = vector.extract_strided_slice %434 {offsets = [0, 64], sizes = [2, 32], strides = [1, 1]} : vector<2x128xf32> to vector<2x32xf32>
    %438 = vector.extract_strided_slice %433 {offsets = [0, 96], sizes = [2, 32], strides = [1, 1]} : vector<2x128xf32> to vector<2x32xf32>
    %439 = arith.mulf %436, %401 : vector<2x32xf32>
    %440 = arith.mulf %435, %437 : vector<2x32xf32>
    %441 = arith.addf %439, %440 : vector<2x32xf32>
    %442 = math.tanh %441 : vector<2x32xf32>
    %443 = arith.mulf %438, %442 : vector<2x32xf32>
    %cst_105 = arith.constant dense<0.000000e+00> : vector<2x128xf32>
    %444 = tpu.matmul %422, %8, %cst_105 {dimension_numbers = #tpu.dot_dimension_numbers<[1], [0], [0], [1], [0, 0, 1, 1], [], []>} : vector<2x32xf32>, vector<32x128xf32>, vector<2x128xf32> -> vector<2x128xf32>
    %445 = arith.addf %16, %444 : vector<2x128xf32>
    %cst_106 = arith.constant 5.000000e-01 : f32
    %446 = vector.broadcast %cst_106 : f32 to vector<2x128xf32>
    %447 = arith.mulf %446, %445 : vector<2x128xf32>
    %448 = math.tanh %447 : vector<2x128xf32>
    %cst_107 = arith.constant 5.000000e-01 : f32
    %449 = vector.broadcast %cst_107 : f32 to vector<2x128xf32>
    %450 = arith.mulf %449, %448 : vector<2x128xf32>
    %cst_108 = arith.constant 5.000000e-01 : f32
    %451 = vector.broadcast %cst_108 : f32 to vector<2x128xf32>
    %452 = arith.addf %450, %451 : vector<2x128xf32>
    %453 = math.tanh %445 : vector<2x128xf32>
    %454 = vector.extract_strided_slice %452 {offsets = [0, 0], sizes = [2, 32], strides = [1, 1]} : vector<2x128xf32> to vector<2x32xf32>
    %455 = vector.extract_strided_slice %452 {offsets = [0, 32], sizes = [2, 32], strides = [1, 1]} : vector<2x128xf32> to vector<2x32xf32>
    %456 = vector.extract_strided_slice %453 {offsets = [0, 64], sizes = [2, 32], strides = [1, 1]} : vector<2x128xf32> to vector<2x32xf32>
    %457 = vector.extract_strided_slice %452 {offsets = [0, 96], sizes = [2, 32], strides = [1, 1]} : vector<2x128xf32> to vector<2x32xf32>
    %458 = arith.mulf %455, %420 : vector<2x32xf32>
    %459 = arith.mulf %454, %456 : vector<2x32xf32>
    %460 = arith.addf %458, %459 : vector<2x32xf32>
    %461 = math.tanh %460 : vector<2x32xf32>
    %462 = arith.mulf %457, %461 : vector<2x32xf32>
    %cst_109 = arith.constant dense<0.000000e+00> : vector<2x128xf32>
    %463 = tpu.matmul %462, %4, %cst_109 {dimension_numbers = #tpu.dot_dimension_numbers<[1], [0], [0], [1], [0, 0, 1, 1], [], []>} : vector<2x32xf32>, vector<32x128xf32>, vector<2x128xf32> -> vector<2x128xf32>
    %464 = arith.addf %463, %19 : vector<2x128xf32>
    %cst_110 = arith.constant dense<0.000000e+00> : vector<2x128xf32>
    %465 = tpu.matmul %443, %9, %cst_110 {dimension_numbers = #tpu.dot_dimension_numbers<[1], [0], [0], [1], [0, 0, 1, 1], [], []>} : vector<2x32xf32>, vector<32x128xf32>, vector<2x128xf32> -> vector<2x128xf32>
    %466 = arith.addf %464, %465 : vector<2x128xf32>
    %cst_111 = arith.constant 5.000000e-01 : f32
    %467 = vector.broadcast %cst_111 : f32 to vector<2x128xf32>
    %468 = arith.mulf %467, %466 : vector<2x128xf32>
    %469 = math.tanh %468 : vector<2x128xf32>
    %cst_112 = arith.constant 5.000000e-01 : f32
    %470 = vector.broadcast %cst_112 : f32 to vector<2x128xf32>
    %471 = arith.mulf %470, %469 : vector<2x128xf32>
    %cst_113 = arith.constant 5.000000e-01 : f32
    %472 = vector.broadcast %cst_113 : f32 to vector<2x128xf32>
    %473 = arith.addf %471, %472 : vector<2x128xf32>
    %474 = math.tanh %466 : vector<2x128xf32>
    %475 = vector.extract_strided_slice %473 {offsets = [0, 0], sizes = [2, 32], strides = [1, 1]} : vector<2x128xf32> to vector<2x32xf32>
    %476 = vector.extract_strided_slice %473 {offsets = [0, 32], sizes = [2, 32], strides = [1, 1]} : vector<2x128xf32> to vector<2x32xf32>
    %477 = vector.extract_strided_slice %474 {offsets = [0, 64], sizes = [2, 32], strides = [1, 1]} : vector<2x128xf32> to vector<2x32xf32>
    %478 = vector.extract_strided_slice %473 {offsets = [0, 96], sizes = [2, 32], strides = [1, 1]} : vector<2x128xf32> to vector<2x32xf32>
    %479 = arith.mulf %476, %441 : vector<2x32xf32>
    %480 = arith.mulf %475, %477 : vector<2x32xf32>
    %481 = arith.addf %479, %480 : vector<2x32xf32>
    %482 = math.tanh %481 : vector<2x32xf32>
    %483 = arith.mulf %478, %482 : vector<2x32xf32>
    %cst_114 = arith.constant dense<0.000000e+00> : vector<2x128xf32>
    %484 = tpu.matmul %462, %8, %cst_114 {dimension_numbers = #tpu.dot_dimension_numbers<[1], [0], [0], [1], [0, 0, 1, 1], [], []>} : vector<2x32xf32>, vector<32x128xf32>, vector<2x128xf32> -> vector<2x128xf32>
    %485 = arith.addf %16, %484 : vector<2x128xf32>
    %cst_115 = arith.constant 5.000000e-01 : f32
    %486 = vector.broadcast %cst_115 : f32 to vector<2x128xf32>
    %487 = arith.mulf %486, %485 : vector<2x128xf32>
    %488 = math.tanh %487 : vector<2x128xf32>
    %cst_116 = arith.constant 5.000000e-01 : f32
    %489 = vector.broadcast %cst_116 : f32 to vector<2x128xf32>
    %490 = arith.mulf %489, %488 : vector<2x128xf32>
    %cst_117 = arith.constant 5.000000e-01 : f32
    %491 = vector.broadcast %cst_117 : f32 to vector<2x128xf32>
    %492 = arith.addf %490, %491 : vector<2x128xf32>
    %493 = math.tanh %485 : vector<2x128xf32>
    %494 = vector.extract_strided_slice %492 {offsets = [0, 0], sizes = [2, 32], strides = [1, 1]} : vector<2x128xf32> to vector<2x32xf32>
    %495 = vector.extract_strided_slice %492 {offsets = [0, 32], sizes = [2, 32], strides = [1, 1]} : vector<2x128xf32> to vector<2x32xf32>
    %496 = vector.extract_strided_slice %493 {offsets = [0, 64], sizes = [2, 32], strides = [1, 1]} : vector<2x128xf32> to vector<2x32xf32>
    %497 = vector.extract_strided_slice %492 {offsets = [0, 96], sizes = [2, 32], strides = [1, 1]} : vector<2x128xf32> to vector<2x32xf32>
    %498 = arith.mulf %495, %460 : vector<2x32xf32>
    %499 = arith.mulf %494, %496 : vector<2x32xf32>
    %500 = arith.addf %498, %499 : vector<2x32xf32>
    %501 = math.tanh %500 : vector<2x32xf32>
    %502 = arith.mulf %497, %501 : vector<2x32xf32>
    %cst_118 = arith.constant dense<0.000000e+00> : vector<2x128xf32>
    %503 = tpu.matmul %502, %4, %cst_118 {dimension_numbers = #tpu.dot_dimension_numbers<[1], [0], [0], [1], [0, 0, 1, 1], [], []>} : vector<2x32xf32>, vector<32x128xf32>, vector<2x128xf32> -> vector<2x128xf32>
    %504 = arith.addf %503, %19 : vector<2x128xf32>
    %cst_119 = arith.constant dense<0.000000e+00> : vector<2x128xf32>
    %505 = tpu.matmul %483, %9, %cst_119 {dimension_numbers = #tpu.dot_dimension_numbers<[1], [0], [0], [1], [0, 0, 1, 1], [], []>} : vector<2x32xf32>, vector<32x128xf32>, vector<2x128xf32> -> vector<2x128xf32>
    %506 = arith.addf %504, %505 : vector<2x128xf32>
    %cst_120 = arith.constant 5.000000e-01 : f32
    %507 = vector.broadcast %cst_120 : f32 to vector<2x128xf32>
    %508 = arith.mulf %507, %506 : vector<2x128xf32>
    %509 = math.tanh %508 : vector<2x128xf32>
    %cst_121 = arith.constant 5.000000e-01 : f32
    %510 = vector.broadcast %cst_121 : f32 to vector<2x128xf32>
    %511 = arith.mulf %510, %509 : vector<2x128xf32>
    %cst_122 = arith.constant 5.000000e-01 : f32
    %512 = vector.broadcast %cst_122 : f32 to vector<2x128xf32>
    %513 = arith.addf %511, %512 : vector<2x128xf32>
    %514 = math.tanh %506 : vector<2x128xf32>
    %515 = vector.extract_strided_slice %513 {offsets = [0, 0], sizes = [2, 32], strides = [1, 1]} : vector<2x128xf32> to vector<2x32xf32>
    %516 = vector.extract_strided_slice %513 {offsets = [0, 32], sizes = [2, 32], strides = [1, 1]} : vector<2x128xf32> to vector<2x32xf32>
    %517 = vector.extract_strided_slice %514 {offsets = [0, 64], sizes = [2, 32], strides = [1, 1]} : vector<2x128xf32> to vector<2x32xf32>
    %518 = vector.extract_strided_slice %513 {offsets = [0, 96], sizes = [2, 32], strides = [1, 1]} : vector<2x128xf32> to vector<2x32xf32>
    %519 = arith.mulf %516, %481 : vector<2x32xf32>
    %520 = arith.mulf %515, %517 : vector<2x32xf32>
    %521 = arith.addf %519, %520 : vector<2x32xf32>
    %522 = math.tanh %521 : vector<2x32xf32>
    %523 = arith.mulf %518, %522 : vector<2x32xf32>
    %cst_123 = arith.constant dense<0.000000e+00> : vector<2x128xf32>
    %524 = tpu.matmul %502, %8, %cst_123 {dimension_numbers = #tpu.dot_dimension_numbers<[1], [0], [0], [1], [0, 0, 1, 1], [], []>} : vector<2x32xf32>, vector<32x128xf32>, vector<2x128xf32> -> vector<2x128xf32>
    %525 = arith.addf %16, %524 : vector<2x128xf32>
    %cst_124 = arith.constant 5.000000e-01 : f32
    %526 = vector.broadcast %cst_124 : f32 to vector<2x128xf32>
    %527 = arith.mulf %526, %525 : vector<2x128xf32>
    %528 = math.tanh %527 : vector<2x128xf32>
    %cst_125 = arith.constant 5.000000e-01 : f32
    %529 = vector.broadcast %cst_125 : f32 to vector<2x128xf32>
    %530 = arith.mulf %529, %528 : vector<2x128xf32>
    %cst_126 = arith.constant 5.000000e-01 : f32
    %531 = vector.broadcast %cst_126 : f32 to vector<2x128xf32>
    %532 = arith.addf %530, %531 : vector<2x128xf32>
    %533 = math.tanh %525 : vector<2x128xf32>
    %534 = vector.extract_strided_slice %532 {offsets = [0, 0], sizes = [2, 32], strides = [1, 1]} : vector<2x128xf32> to vector<2x32xf32>
    %535 = vector.extract_strided_slice %532 {offsets = [0, 32], sizes = [2, 32], strides = [1, 1]} : vector<2x128xf32> to vector<2x32xf32>
    %536 = vector.extract_strided_slice %533 {offsets = [0, 64], sizes = [2, 32], strides = [1, 1]} : vector<2x128xf32> to vector<2x32xf32>
    %537 = vector.extract_strided_slice %532 {offsets = [0, 96], sizes = [2, 32], strides = [1, 1]} : vector<2x128xf32> to vector<2x32xf32>
    %538 = arith.mulf %535, %500 : vector<2x32xf32>
    %539 = arith.mulf %534, %536 : vector<2x32xf32>
    %540 = arith.addf %538, %539 : vector<2x32xf32>
    %541 = math.tanh %540 : vector<2x32xf32>
    %542 = arith.mulf %537, %541 : vector<2x32xf32>
    %cst_127 = arith.constant dense<0.000000e+00> : vector<2x128xf32>
    %543 = tpu.matmul %542, %4, %cst_127 {dimension_numbers = #tpu.dot_dimension_numbers<[1], [0], [0], [1], [0, 0, 1, 1], [], []>} : vector<2x32xf32>, vector<32x128xf32>, vector<2x128xf32> -> vector<2x128xf32>
    %544 = arith.addf %543, %19 : vector<2x128xf32>
    %cst_128 = arith.constant dense<0.000000e+00> : vector<2x128xf32>
    %545 = tpu.matmul %523, %9, %cst_128 {dimension_numbers = #tpu.dot_dimension_numbers<[1], [0], [0], [1], [0, 0, 1, 1], [], []>} : vector<2x32xf32>, vector<32x128xf32>, vector<2x128xf32> -> vector<2x128xf32>
    %546 = arith.addf %544, %545 : vector<2x128xf32>
    %cst_129 = arith.constant 5.000000e-01 : f32
    %547 = vector.broadcast %cst_129 : f32 to vector<2x128xf32>
    %548 = arith.mulf %547, %546 : vector<2x128xf32>
    %549 = math.tanh %548 : vector<2x128xf32>
    %cst_130 = arith.constant 5.000000e-01 : f32
    %550 = vector.broadcast %cst_130 : f32 to vector<2x128xf32>
    %551 = arith.mulf %550, %549 : vector<2x128xf32>
    %cst_131 = arith.constant 5.000000e-01 : f32
    %552 = vector.broadcast %cst_131 : f32 to vector<2x128xf32>
    %553 = arith.addf %551, %552 : vector<2x128xf32>
    %554 = math.tanh %546 : vector<2x128xf32>
    %555 = vector.extract_strided_slice %553 {offsets = [0, 0], sizes = [2, 32], strides = [1, 1]} : vector<2x128xf32> to vector<2x32xf32>
    %556 = vector.extract_strided_slice %553 {offsets = [0, 32], sizes = [2, 32], strides = [1, 1]} : vector<2x128xf32> to vector<2x32xf32>
    %557 = vector.extract_strided_slice %554 {offsets = [0, 64], sizes = [2, 32], strides = [1, 1]} : vector<2x128xf32> to vector<2x32xf32>
    %558 = vector.extract_strided_slice %553 {offsets = [0, 96], sizes = [2, 32], strides = [1, 1]} : vector<2x128xf32> to vector<2x32xf32>
    %559 = arith.mulf %556, %521 : vector<2x32xf32>
    %560 = arith.mulf %555, %557 : vector<2x32xf32>
    %561 = arith.addf %559, %560 : vector<2x32xf32>
    %562 = math.tanh %561 : vector<2x32xf32>
    %563 = arith.mulf %558, %562 : vector<2x32xf32>
    %cst_132 = arith.constant dense<0.000000e+00> : vector<2x128xf32>
    %564 = tpu.matmul %542, %8, %cst_132 {dimension_numbers = #tpu.dot_dimension_numbers<[1], [0], [0], [1], [0, 0, 1, 1], [], []>} : vector<2x32xf32>, vector<32x128xf32>, vector<2x128xf32> -> vector<2x128xf32>
    %565 = arith.addf %16, %564 : vector<2x128xf32>
    %cst_133 = arith.constant 5.000000e-01 : f32
    %566 = vector.broadcast %cst_133 : f32 to vector<2x128xf32>
    %567 = arith.mulf %566, %565 : vector<2x128xf32>
    %568 = math.tanh %567 : vector<2x128xf32>
    %cst_134 = arith.constant 5.000000e-01 : f32
    %569 = vector.broadcast %cst_134 : f32 to vector<2x128xf32>
    %570 = arith.mulf %569, %568 : vector<2x128xf32>
    %cst_135 = arith.constant 5.000000e-01 : f32
    %571 = vector.broadcast %cst_135 : f32 to vector<2x128xf32>
    %572 = arith.addf %570, %571 : vector<2x128xf32>
    %573 = math.tanh %565 : vector<2x128xf32>
    %574 = vector.extract_strided_slice %572 {offsets = [0, 0], sizes = [2, 32], strides = [1, 1]} : vector<2x128xf32> to vector<2x32xf32>
    %575 = vector.extract_strided_slice %572 {offsets = [0, 32], sizes = [2, 32], strides = [1, 1]} : vector<2x128xf32> to vector<2x32xf32>
    %576 = vector.extract_strided_slice %573 {offsets = [0, 64], sizes = [2, 32], strides = [1, 1]} : vector<2x128xf32> to vector<2x32xf32>
    %577 = vector.extract_strided_slice %572 {offsets = [0, 96], sizes = [2, 32], strides = [1, 1]} : vector<2x128xf32> to vector<2x32xf32>
    %578 = arith.mulf %575, %540 : vector<2x32xf32>
    %579 = arith.mulf %574, %576 : vector<2x32xf32>
    %580 = arith.addf %578, %579 : vector<2x32xf32>
    %581 = math.tanh %580 : vector<2x32xf32>
    %582 = arith.mulf %577, %581 : vector<2x32xf32>
    %cst_136 = arith.constant dense<0.000000e+00> : vector<2x128xf32>
    %583 = tpu.matmul %582, %4, %cst_136 {dimension_numbers = #tpu.dot_dimension_numbers<[1], [0], [0], [1], [0, 0, 1, 1], [], []>} : vector<2x32xf32>, vector<32x128xf32>, vector<2x128xf32> -> vector<2x128xf32>
    %584 = arith.addf %583, %19 : vector<2x128xf32>
    %cst_137 = arith.constant dense<0.000000e+00> : vector<2x128xf32>
    %585 = tpu.matmul %563, %9, %cst_137 {dimension_numbers = #tpu.dot_dimension_numbers<[1], [0], [0], [1], [0, 0, 1, 1], [], []>} : vector<2x32xf32>, vector<32x128xf32>, vector<2x128xf32> -> vector<2x128xf32>
    %586 = arith.addf %584, %585 : vector<2x128xf32>
    %cst_138 = arith.constant 5.000000e-01 : f32
    %587 = vector.broadcast %cst_138 : f32 to vector<2x128xf32>
    %588 = arith.mulf %587, %586 : vector<2x128xf32>
    %589 = math.tanh %588 : vector<2x128xf32>
    %cst_139 = arith.constant 5.000000e-01 : f32
    %590 = vector.broadcast %cst_139 : f32 to vector<2x128xf32>
    %591 = arith.mulf %590, %589 : vector<2x128xf32>
    %cst_140 = arith.constant 5.000000e-01 : f32
    %592 = vector.broadcast %cst_140 : f32 to vector<2x128xf32>
    %593 = arith.addf %591, %592 : vector<2x128xf32>
    %594 = math.tanh %586 : vector<2x128xf32>
    %595 = vector.extract_strided_slice %593 {offsets = [0, 0], sizes = [2, 32], strides = [1, 1]} : vector<2x128xf32> to vector<2x32xf32>
    %596 = vector.extract_strided_slice %593 {offsets = [0, 32], sizes = [2, 32], strides = [1, 1]} : vector<2x128xf32> to vector<2x32xf32>
    %597 = vector.extract_strided_slice %594 {offsets = [0, 64], sizes = [2, 32], strides = [1, 1]} : vector<2x128xf32> to vector<2x32xf32>
    %598 = vector.extract_strided_slice %593 {offsets = [0, 96], sizes = [2, 32], strides = [1, 1]} : vector<2x128xf32> to vector<2x32xf32>
    %599 = arith.mulf %596, %561 : vector<2x32xf32>
    %600 = arith.mulf %595, %597 : vector<2x32xf32>
    %601 = arith.addf %599, %600 : vector<2x32xf32>
    %602 = math.tanh %601 : vector<2x32xf32>
    %603 = arith.mulf %598, %602 : vector<2x32xf32>
    %cst_141 = arith.constant dense<0.000000e+00> : vector<2x128xf32>
    %604 = tpu.matmul %582, %8, %cst_141 {dimension_numbers = #tpu.dot_dimension_numbers<[1], [0], [0], [1], [0, 0, 1, 1], [], []>} : vector<2x32xf32>, vector<32x128xf32>, vector<2x128xf32> -> vector<2x128xf32>
    %605 = arith.addf %16, %604 : vector<2x128xf32>
    %cst_142 = arith.constant 5.000000e-01 : f32
    %606 = vector.broadcast %cst_142 : f32 to vector<2x128xf32>
    %607 = arith.mulf %606, %605 : vector<2x128xf32>
    %608 = math.tanh %607 : vector<2x128xf32>
    %cst_143 = arith.constant 5.000000e-01 : f32
    %609 = vector.broadcast %cst_143 : f32 to vector<2x128xf32>
    %610 = arith.mulf %609, %608 : vector<2x128xf32>
    %cst_144 = arith.constant 5.000000e-01 : f32
    %611 = vector.broadcast %cst_144 : f32 to vector<2x128xf32>
    %612 = arith.addf %610, %611 : vector<2x128xf32>
    %613 = math.tanh %605 : vector<2x128xf32>
    %614 = vector.extract_strided_slice %612 {offsets = [0, 0], sizes = [2, 32], strides = [1, 1]} : vector<2x128xf32> to vector<2x32xf32>
    %615 = vector.extract_strided_slice %612 {offsets = [0, 32], sizes = [2, 32], strides = [1, 1]} : vector<2x128xf32> to vector<2x32xf32>
    %616 = vector.extract_strided_slice %613 {offsets = [0, 64], sizes = [2, 32], strides = [1, 1]} : vector<2x128xf32> to vector<2x32xf32>
    %617 = vector.extract_strided_slice %612 {offsets = [0, 96], sizes = [2, 32], strides = [1, 1]} : vector<2x128xf32> to vector<2x32xf32>
    %618 = arith.mulf %615, %580 : vector<2x32xf32>
    %619 = arith.mulf %614, %616 : vector<2x32xf32>
    %620 = arith.addf %618, %619 : vector<2x32xf32>
    %621 = math.tanh %620 : vector<2x32xf32>
    %622 = arith.mulf %617, %621 : vector<2x32xf32>
    %cst_145 = arith.constant dense<0.000000e+00> : vector<2x128xf32>
    %623 = tpu.matmul %622, %4, %cst_145 {dimension_numbers = #tpu.dot_dimension_numbers<[1], [0], [0], [1], [0, 0, 1, 1], [], []>} : vector<2x32xf32>, vector<32x128xf32>, vector<2x128xf32> -> vector<2x128xf32>
    %624 = arith.addf %623, %19 : vector<2x128xf32>
    %cst_146 = arith.constant dense<0.000000e+00> : vector<2x128xf32>
    %625 = tpu.matmul %603, %9, %cst_146 {dimension_numbers = #tpu.dot_dimension_numbers<[1], [0], [0], [1], [0, 0, 1, 1], [], []>} : vector<2x32xf32>, vector<32x128xf32>, vector<2x128xf32> -> vector<2x128xf32>
    %626 = arith.addf %624, %625 : vector<2x128xf32>
    %cst_147 = arith.constant 5.000000e-01 : f32
    %627 = vector.broadcast %cst_147 : f32 to vector<2x128xf32>
    %628 = arith.mulf %627, %626 : vector<2x128xf32>
    %629 = math.tanh %628 : vector<2x128xf32>
    %cst_148 = arith.constant 5.000000e-01 : f32
    %630 = vector.broadcast %cst_148 : f32 to vector<2x128xf32>
    %631 = arith.mulf %630, %629 : vector<2x128xf32>
    %cst_149 = arith.constant 5.000000e-01 : f32
    %632 = vector.broadcast %cst_149 : f32 to vector<2x128xf32>
    %633 = arith.addf %631, %632 : vector<2x128xf32>
    %634 = math.tanh %626 : vector<2x128xf32>
    %635 = vector.extract_strided_slice %633 {offsets = [0, 0], sizes = [2, 32], strides = [1, 1]} : vector<2x128xf32> to vector<2x32xf32>
    %636 = vector.extract_strided_slice %633 {offsets = [0, 32], sizes = [2, 32], strides = [1, 1]} : vector<2x128xf32> to vector<2x32xf32>
    %637 = vector.extract_strided_slice %634 {offsets = [0, 64], sizes = [2, 32], strides = [1, 1]} : vector<2x128xf32> to vector<2x32xf32>
    %638 = vector.extract_strided_slice %633 {offsets = [0, 96], sizes = [2, 32], strides = [1, 1]} : vector<2x128xf32> to vector<2x32xf32>
    %639 = arith.mulf %636, %601 : vector<2x32xf32>
    %640 = arith.mulf %635, %637 : vector<2x32xf32>
    %641 = arith.addf %639, %640 : vector<2x32xf32>
    %642 = math.tanh %641 : vector<2x32xf32>
    %643 = arith.mulf %638, %642 : vector<2x32xf32>
    %cst_150 = arith.constant dense<0.000000e+00> : vector<2x128xf32>
    %644 = tpu.matmul %622, %8, %cst_150 {dimension_numbers = #tpu.dot_dimension_numbers<[1], [0], [0], [1], [0, 0, 1, 1], [], []>} : vector<2x32xf32>, vector<32x128xf32>, vector<2x128xf32> -> vector<2x128xf32>
    %645 = arith.addf %16, %644 : vector<2x128xf32>
    %cst_151 = arith.constant 5.000000e-01 : f32
    %646 = vector.broadcast %cst_151 : f32 to vector<2x128xf32>
    %647 = arith.mulf %646, %645 : vector<2x128xf32>
    %648 = math.tanh %647 : vector<2x128xf32>
    %cst_152 = arith.constant 5.000000e-01 : f32
    %649 = vector.broadcast %cst_152 : f32 to vector<2x128xf32>
    %650 = arith.mulf %649, %648 : vector<2x128xf32>
    %cst_153 = arith.constant 5.000000e-01 : f32
    %651 = vector.broadcast %cst_153 : f32 to vector<2x128xf32>
    %652 = arith.addf %650, %651 : vector<2x128xf32>
    %653 = math.tanh %645 : vector<2x128xf32>
    %654 = vector.extract_strided_slice %652 {offsets = [0, 0], sizes = [2, 32], strides = [1, 1]} : vector<2x128xf32> to vector<2x32xf32>
    %655 = vector.extract_strided_slice %652 {offsets = [0, 32], sizes = [2, 32], strides = [1, 1]} : vector<2x128xf32> to vector<2x32xf32>
    %656 = vector.extract_strided_slice %653 {offsets = [0, 64], sizes = [2, 32], strides = [1, 1]} : vector<2x128xf32> to vector<2x32xf32>
    %657 = vector.extract_strided_slice %652 {offsets = [0, 96], sizes = [2, 32], strides = [1, 1]} : vector<2x128xf32> to vector<2x32xf32>
    %658 = arith.mulf %655, %620 : vector<2x32xf32>
    %659 = arith.mulf %654, %656 : vector<2x32xf32>
    %660 = arith.addf %658, %659 : vector<2x32xf32>
    %661 = math.tanh %660 : vector<2x32xf32>
    %662 = arith.mulf %657, %661 : vector<2x32xf32>
    %cst_154 = arith.constant dense<0.000000e+00> : vector<2x128xf32>
    %663 = tpu.matmul %662, %4, %cst_154 {dimension_numbers = #tpu.dot_dimension_numbers<[1], [0], [0], [1], [0, 0, 1, 1], [], []>} : vector<2x32xf32>, vector<32x128xf32>, vector<2x128xf32> -> vector<2x128xf32>
    %664 = arith.addf %663, %19 : vector<2x128xf32>
    %cst_155 = arith.constant dense<0.000000e+00> : vector<2x128xf32>
    %665 = tpu.matmul %643, %9, %cst_155 {dimension_numbers = #tpu.dot_dimension_numbers<[1], [0], [0], [1], [0, 0, 1, 1], [], []>} : vector<2x32xf32>, vector<32x128xf32>, vector<2x128xf32> -> vector<2x128xf32>
    %666 = arith.addf %664, %665 : vector<2x128xf32>
    %cst_156 = arith.constant 5.000000e-01 : f32
    %667 = vector.broadcast %cst_156 : f32 to vector<2x128xf32>
    %668 = arith.mulf %667, %666 : vector<2x128xf32>
    %669 = math.tanh %668 : vector<2x128xf32>
    %cst_157 = arith.constant 5.000000e-01 : f32
    %670 = vector.broadcast %cst_157 : f32 to vector<2x128xf32>
    %671 = arith.mulf %670, %669 : vector<2x128xf32>
    %cst_158 = arith.constant 5.000000e-01 : f32
    %672 = vector.broadcast %cst_158 : f32 to vector<2x128xf32>
    %673 = arith.addf %671, %672 : vector<2x128xf32>
    %674 = math.tanh %666 : vector<2x128xf32>
    %675 = vector.extract_strided_slice %673 {offsets = [0, 0], sizes = [2, 32], strides = [1, 1]} : vector<2x128xf32> to vector<2x32xf32>
    %676 = vector.extract_strided_slice %673 {offsets = [0, 32], sizes = [2, 32], strides = [1, 1]} : vector<2x128xf32> to vector<2x32xf32>
    %677 = vector.extract_strided_slice %674 {offsets = [0, 64], sizes = [2, 32], strides = [1, 1]} : vector<2x128xf32> to vector<2x32xf32>
    %678 = vector.extract_strided_slice %673 {offsets = [0, 96], sizes = [2, 32], strides = [1, 1]} : vector<2x128xf32> to vector<2x32xf32>
    %679 = arith.mulf %676, %641 : vector<2x32xf32>
    %680 = arith.mulf %675, %677 : vector<2x32xf32>
    %681 = arith.addf %679, %680 : vector<2x32xf32>
    %682 = math.tanh %681 : vector<2x32xf32>
    %683 = arith.mulf %678, %682 : vector<2x32xf32>
    %684 = tpu.concatenate %403, %443, %483, %523, %563, %603, %643, %683 in 0 : vector<2x32xf32>, vector<2x32xf32>, vector<2x32xf32>, vector<2x32xf32>, vector<2x32xf32>, vector<2x32xf32>, vector<2x32xf32>, vector<2x32xf32> -> vector<16x32xf32>
    %685 = vector.extract_strided_slice %20 {offsets = [32, 0], sizes = [32, 8], strides = [1, 1]} : vector<64x8xf32> to vector<32x8xf32>
    %cst_159 = arith.constant dense<0.000000e+00> : vector<16x8xf32>
    %686 = tpu.matmul %684, %685, %cst_159 {dimension_numbers = #tpu.dot_dimension_numbers<[1], [0], [0], [1], [0, 0, 1, 1], [], []>} : vector<16x32xf32>, vector<32x8xf32>, vector<16x8xf32> -> vector<16x8xf32>
    %687 = vector.extract_strided_slice %21 {offsets = [1, 0], sizes = [1, 8], strides = [1, 1]} : vector<2x8xf32> to vector<1x8xf32>
    %688 = vector.shape_cast %687 : vector<1x8xf32> to vector<1x8xf32>
    %689 = vector.broadcast %688 : vector<1x8xf32> to vector<16x8xf32>
    %690 = arith.addf %686, %689 : vector<16x8xf32>
    %c0_160 = arith.constant 0 : index
    %c0_161 = arith.constant 0 : index
    %691 = vector.load %arg6[%c0_160, %c0_161] : memref<16x8xf32, #tpu.memory_space<vmem>>, vector<16x8xf32>
    tpu.vector_store %arg6[%c0_160, %c0_161], %690 {strides = array<i32>} : memref<16x8xf32, #tpu.memory_space<vmem>>, vector<16x8xf32>,
    return
  }
}

</mosaic_0001>

<bundles_post_ra>
// kernel: autoencoder_forward.1
= control target key start
LH: loop header
LB: loop body
LE: loop exit
PB: predicated region body
PF: predicated region fallthrough
CT: control target
= control target key end

     0   :  { %13 = vsyncpa [#allocation3], 0  ;;  %s6885_s0 = inlined_call_operand.vmem [shape: f32[16,8], index: 0, kind: input, shape index: {}]   ;;  %s6886_s1 = inlined_call_operand.hbm [shape: f32[72,128], index: 1, kind: input, shape index: {}]   ;;  %s6887_s2 = inlined_call_operand.hbm [shape: f32[128,128], index: 2, kind: input, shape index: {}]   ;;  %s6888_s3 = inlined_call_operand.vmem [shape: f32[4,128], index: 3, kind: input, shape index: {}]   ;;  %s6889_s4 = inlined_call_operand.hbm [shape: f32[64,8], index: 4, kind: input, shape index: {}]   ;;  %s6890_s5 = inlined_call_operand.vmem [shape: f32[2,8], index: 5, kind: input, shape index: {}]   ;;  %s6891_s6 = inlined_call_operand.vmem [shape: f32[16,8], index: 6, kind: output, shape index: {0}]   ;;  %s6892_s7 = inlined_call_operand.hbm [shape: f32[2,5], index: 7, kind: output, shape index: {1}]  }
   0x1   :  { %14 = vsyncpa [#allocation6], 0 }
   0x2   :  { %15 = vsyncpa [#allocation4], 0  ;;  %s5887_s24 = smov [#allocation5]   ;;  %s5888_s26 = smov [#allocation2]  }
   0x3   :  { %s35_s25 = sshll.u32 %s5887_s24, 4  ;;  %s23_s27 = sshll.u32 %s5888_s26, 4  ;;  %s36_s25 = int_to_ptr.vmem [resolvable:$true] %s35_s25  ;;  %s24_s27 = int_to_ptr.vmem [resolvable:$true] %s23_s27 }
   0x4   :  { %s5809_s28 = scalar_lea.vmem %s36_s25, 2048  ;;  %p5814_p1 = scmp.lt.s32.totalorder %s36_s25, %s36_s25 }
   0x5   :  { %p5810_p0 = scmp.ne.s32.totalorder %s36_s25, %s5809_s28  ;;  %p5815_p2 = scmp.lt.s32.totalorder %s5809_s28, %s5809_s28 }
   0x7   :  { %p5816_p3 = por %p5815_p2, %p5814_p1 }
   0x9   :  { %p5817_p4 = pnand %p5816_p3, %p5810_p0 }
   0xb   :  { %5820 = shalt.err (!%p5817_p4)
}
   0xc   :  { %s5889_s29 = smov 128   ;;  %s5890_s30 = smov 8  }
   0xd   :  { %41 = dma.hbm_to_vmem [thread:$0]  %s6887_s2, 2048, %s36_s25, [#allocation6], %s5889_s29, %s5889_s29, %s5890_s30  }
   0xe   :  { %s5829_s10 = scalar_lea.vmem %s24_s27, 1152  ;;  %p5834_p6 = scmp.lt.s32.totalorder %s24_s27, %s24_s27 }
   0xf   :  { %p5830_p5 = scmp.ne.s32.totalorder %s24_s27, %s5829_s10  ;;  %p5835_p7 = scmp.lt.s32.totalorder %s5829_s10, %s5829_s10 }
  0x11   :  { %p5836_p8 = por %p5835_p7, %p5834_p6 }
  0x13   :  { %p5837_p9 = pnand %p5836_p8, %p5830_p5 }
  0x15   :  { %5840 = shalt.err (!%p5837_p9)
}
  0x16   :  { %29 = dma.hbm_to_vmem [thread:$0]  %s6886_s1, 1152, %s24_s27, [#allocation3], %s5889_s29, %s5889_s29, %s5890_s30  }
  0x17   :  { %s5891_s13 = smov [#allocation7]  }
  0x18   :  { %s49_s14 = sshll.u32 %s5891_s13, 4  ;;  %s50_s14 = int_to_ptr.vmem [resolvable:$true] %s49_s14 }
  0x19   :  { %s5849_s15 = scalar_lea.vmem %s50_s14, 1024  ;;  %p5854_p11 = scmp.lt.s32.totalorder %s50_s14, %s50_s14 }
  0x1a   :  { %p5850_p10 = scmp.ne.s32.totalorder %s50_s14, %s5849_s15  ;;  %p5855_p12 = scmp.lt.s32.totalorder %s5849_s15, %s5849_s15 }
  0x1c   :  { %p5856_p13 = por %p5855_p12, %p5854_p11 }
  0x1e   :  { %p5857_p0 = pnand %p5856_p13, %p5850_p10 }
  0x20   :  { %5860 = shalt.err (!%p5857_p0)
}
  0x21   :  { %55 = dma.hbm_to_vmem [thread:$0]  %s6889_s4, 1024, %s50_s14, [#allocation6], %s5889_s29, %s5889_s29, %s5890_s30  }
  0x22   :  { %5881 = dma.done.wait [#allocation3], 1152  }
  0x23   :  { %5882 = vsyncadd [#allocation3], 4294966144 }
  0x24   :  { %5883 = dma.done.wait [#allocation6], 3072  }
  0x25   :  { %5884 = vsyncadd [#allocation6], 4294964224  ;;  %v93_v0 = vlaneseq  ;;  %v5892_v1 = vmov 0.0   ;;  %vm5893_vm0 = vmmov 0   ;;  %vm120_vm1 = vcmask 64512   ;;  %v67_v5 = vld [vmem:[#allocation2] sm:$0xff] }
  0x26   :  { %5024 = vmatprep.subr.mxu1 %v5892_v1  ;;  %5032 = vmatprep.mubr.msk.f32.mxu1 %vm5893_vm0, %v5892_v1  ;;  %v5953_v6 = vld [vmem:[#allocation5 + $0x18] sm:$0xff]  ;;  %v115_v8 = vld [vmem:[%s6885_s0 + $0x8] sm:$0xff]  ;;  %v5962_v9 = vld [vmem:[#allocation5 + $0x10] sm:$0xff]  ;;  %vm202_vm2 = vcmask 261120   ;;  %vm2453_vm3 = vcmask 33792   ;;  %vm4594_vm4 = vcmask 1041408  }
  0x27   :  { %v5949_v2 = vshrl.u32 %v93_v0, 7  ;;  %v114_v7 = vld [vmem:[%s6885_s0] sm:$0xff]  ;;  %5019 = vmatprep.subr.mxu0 %v67_v5  ;;  %5025 = vmatpush3.msra.mxu1 %v5953_v6  ;;  %v5972_v11 = vld [vmem:[#allocation5 + $0x8] sm:$0xff]  ;;  %v5983_v14 = vld [vmem:[#allocation5] sm:$0xff]  ;;  %s5894_s0 = smov 64   ;;  %vm4596_vm5 = vcmask 1043456  }
  0x28   :  { %5020 = vmatpush3.msra.mxu0 %v67_v5  ;;  %5021 = vmatprep.mubr.msk.f32.mxu0 %vm120_vm1, %v114_v7  ;;  %v5968_v10 = vld [vmem:[%s6888_s3] sm:$0xf]  ;;  %s5895_s3 = smov 32   ;;  %v6010_v35 = vld [vmem:[#allocation2 + $0x18] sm:$0xff]  ;;  %v6019_v38 = vld [vmem:[#allocation2 + $0x10] sm:$0xff]  ;;  %vm4598_vm6 = vcmask 1045504  }
  0x29   :  { %v99_v3 = vsub.s32 2, %v5949_v2  ;;  %v103_v4 = vsub.s32 3, %v5949_v2  ;;  %5026 = vmatprep.subr.mxu1 %v5892_v1  ;;  %5022 = vmatmul.mubr.msk.f32.vlgmr.msra.gmra.mxu0 %vm120_vm1, %v115_v8  ;;  %v118_v15 = vsub.s32 0, %v5949_v2  ;;  %v6008_v34 = vld [vmem:[#allocation2 + $0x20] sm:$0xff]  ;;  %v6016_v37 = vld [vmem:[#allocation5 + $0x30] sm:$0xff]  ;;  %v6022_v39 = vld [vmem:[#allocation5 + $0x28] sm:$0xff] }
  0x2a   :  { %5027 = vmatpush3.msra.mxu1 %v5962_v9  ;;  %5035 = vmatprep.subr.mxu0 %v5892_v1  ;;  %v6012_v36 = vld [vmem:[#allocation5 + $0x38] sm:$0xff]  ;;  %v6027_v40 = vld [vmem:[#allocation2 + $0x8] sm:$0xff]  ;;  %v95_v49 = vsub.s32 1, %v5949_v2  ;;  %s5896_s23 = smov [#allocation8]  }
  0x2b   :  { %v5975_v12 = vrot.slane %v5968_v10, %v99_v3  ;;  %v5978_v13 = vrot.slane %v5968_v10, %v103_v4  ;;  %5028 = vmatprep.subr.mxu1 %v5892_v1  ;;  %5043 = vmatprep.mubr.msk.f32.mxu0 %vm5893_vm0, %v5892_v1  ;;  %v119_v16 = vrot.slane %v5968_v10, %v118_v15  ;;  %v6037_v42 = vld [vmem:[#allocation5 + $0x20] sm:$0xff]  ;;  %s4702_s24 = sshll.u32 %s5896_s23, 4  ;;  %s4703_s24 = int_to_ptr.vmem [resolvable:$true] %s4702_s24 }
  0x2c   :  { %5029 = vmatpush3.msra.mxu1 %v5972_v11  ;;  %5036 = vmatpush3.msra.mxu0 %v6008_v34  ;;  %v6079_v51 = vrot.slane %v5968_v10, %v95_v49  ;;  %s5861_s25 = scalar_lea.vmem %s4703_s24, 32  ;;  %p5866_p2 = scmp.lt.s32.totalorder %s4703_s24, %s4703_s24 }
  0x2d   :  { %5030 = vmatprep.subr.mxu1 %v5892_v1  ;;  %5037 = vmatprep.subr.mxu0 %v5892_v1  ;;  %p5862_p1 = scmp.ne.s32.totalorder %s4703_s24, %s5861_s25  ;;  %p5867_p3 = scmp.lt.s32.totalorder %s5861_s25, %s5861_s25 }
  0x2e   :  { %5031 = vmatpush3.msra.mxu1 %v5983_v14  ;;  %5038 = vmatpush3.msra.mxu0 %v6010_v35 }
  0x2f   :  { %5033 = vmatmul.mubr.f32.vlgmr.msra.gmra.mxu1 %v5892_v1  ;;  %5046 = vmatprep.subr.mxu1 %v5892_v1  ;;  %p5868_p4 = por %p5867_p3, %p5866_p2 }
  0x30   :  { %5054 = vmatprep.mubr.msk.f32.mxu1 %vm5893_vm0, %v5892_v1  ;;  %5047 = vmatpush3.msra.mxu1 %v6012_v36 }
  0x31   :  { %5048 = vmatprep.subr.mxu1 %v5892_v1  ;;  %5039 = vmatprep.subr.mxu0 %v5892_v1  ;;  %p5869_p5 = pnand %p5868_p4, %p5862_p1 }
  0x32   :  { %5049 = vmatpush3.msra.mxu1 %v6016_v37  ;;  %5040 = vmatpush3.msra.mxu0 %v6019_v38 }
  0x33   :  { %5050 = vmatprep.subr.mxu1 %v5892_v1  ;;  %5041 = vmatprep.subr.mxu0 %v5892_v1 }
  0x34   :  { %5051 = vmatpush3.msra.mxu1 %v6022_v39  ;;  %5042 = vmatpush3.msra.mxu0 %v6027_v40 }
  0x35   :  { %5052 = vmatprep.subr.mxu1 %v5892_v1  ;;  %5057 = vmatprep.subr.mxu0 %v5892_v1 }
  0x36   :  { %5053 = vmatpush3.msra.mxu1 %v6037_v42 }
  0x37   :  { %5055 = vmatmul.mubr.f32.vlgmr.msra.gmra.mxu1 %v5892_v1  ;;  %5068 = vmatprep.subr.mxu1 %v5892_v1 }
  0x38   :  { %5069 = vmatpush3.msra.mxu1 %v6008_v34  ;;  %5076 = vmatprep.mubr.msk.f32.mxu1 %vm5893_vm0, %v5892_v1 }
  0x39   :  { %5070 = vmatprep.subr.mxu1 %v5892_v1 }
  0x3a   :  { %5071 = vmatpush3.msra.mxu1 %v6010_v35 }
  0x3b   :  { %5072 = vmatprep.subr.mxu1 %v5892_v1 }
  0x3c   :  { %5073 = vmatpush3.msra.mxu1 %v6019_v38 }
  0x3d   :  { %5074 = vmatprep.subr.mxu1 %v5892_v1 }
  0x3e   :  { %5075 = vmatpush3.msra.mxu1 %v6027_v40 }
  0x3f   :  { %5090 = vmatprep.subr.mxu1 %v5892_v1 }
  0xe9   :  { %v5023_v17 = vpop.f32.mrf.mxu0 }
  0xea   :  { %v5998_v18 = vadd.f32 %v5023_v17, %v119_v16 }
  0xeb   :  { %v193_v19 = vpop.f32.mrf.mxu0 }
  0xec   :  { %v6000_v20 = vadd.f32 %v193_v19, %v119_v16 }
  0xef   :  { %v272_v21 = vpop.f32.mrf.mxu1 }
  0xf0   :  { %v276_v22 = vadd.f32 %v272_v21, %v6000_v20 }
  0xf1   :  { %v5034_v23 = vpop.f32.mrf.mxu1 }
  0xf2   :  { %5584 = vtanh.f32 %v276_v22  ;;  %v277_v25 = vmul.f32 0.5, %v276_v22 }
  0xf4   :  { %5586 = vtanh.f32 %v277_v25 }
  0xf7   :  { %v440_v46 = vpop.f32.mrf.mxu1 }
  0xf9   :  { %v5056_v47 = vpop.f32.mrf.mxu1 }
  0xff   :  { %v5585_v24 = vpop.eup %5584 }
 0x100   :  { %284 = vrot.lane.b32.xlu0 %v5585_v24, %s5894_s0 }
 0x101   :  { %v5587_v26 = vpop.eup %5586 }
 0x102   :  { %v279_v27 = vmul.f32 0.5, %v5587_v26 }
 0x104   :  { %v280_v28 = vadd.f32 0.5, %v279_v27 }
 0x106   :  { %v282_v31 = vmul.f32 0.0, %v280_v28 }
 0x172   :  { %v285_v29 = vpop.permute.xlu0 %284 }
 0x173   :  { %v287_v30 = vmul.f32 %v285_v29, %v280_v28 }
 0x175   :  { %289 = vrot.lane.b32.xlu0 %v287_v30, %s5895_s3 }
 0x1e7   :  { %v290_v32 = vpop.permute.xlu0 %289 }
 0x1e8   :  { %v6005_v33 = vadd.f32 %v290_v32, %v282_v31 }
 0x1ea   :  { %5588 = vtanh.f32 %v6005_v33  ;;  %v547_v17 = vrot.slane %v6005_v33, 6 }
 0x1f7   :  { %v5589_v41 = vpop.eup %5588 }
 0x1f8   :  { %295 = vrot.lane.b32.xlu1 %v5589_v41, %s5894_s0 }
 0x26a   :  { %v296_v43 = vpop.permute.xlu1 %295 }
 0x26b   :  { %v298_v44 = vmul.f32 %v296_v43, %v280_v28 }
 0x26d   :  { %300 = vrot.lane.b32.xlu1 %v298_v44, %s5895_s3 }
 0x2df   :  { %v301_v45 = vpop.permute.xlu1 %300 }
 0x2e0   :  { %5044 = vmatmul.mubr.msk.f32.vlgmr.msra.gmra.mxu0 %vm202_vm2, %v301_v45 }
 0x2e1   :  { %5058 = vmatpush3.msra.mxu0 %v5953_v6  ;;  %5065 = vmatprep.mubr.msk.f32.mxu0 %vm5893_vm0, %v5892_v1 }
 0x2e2   :  { %5059 = vmatprep.subr.mxu0 %v5892_v1 }
 0x2e3   :  { %5060 = vmatpush3.msra.mxu0 %v5962_v9 }
 0x2e4   :  { %5061 = vmatprep.subr.mxu0 %v5892_v1 }
 0x2e5   :  { %5062 = vmatpush3.msra.mxu0 %v5972_v11 }
 0x2e6   :  { %5063 = vmatprep.subr.mxu0 %v5892_v1 }
 0x2e7   :  { %5064 = vmatpush3.msra.mxu0 %v5983_v14 }
 0x2e8   :  { %5066 = vmatmul.mubr.msk.f32.vlgmr.msra.gmra.mxu0 %vm202_vm2, %v301_v45  ;;  %5079 = vmatprep.subr.mxu0 %v5892_v1 }
 0x2e9   :  { %5080 = vmatpush3.msra.mxu0 %v6012_v36  ;;  %5087 = vmatprep.mubr.msk.f32.mxu0 %vm5893_vm0, %v5892_v1 }
 0x2ea   :  { %5081 = vmatprep.subr.mxu0 %v5892_v1 }
 0x2eb   :  { %5082 = vmatpush3.msra.mxu0 %v6016_v37 }
 0x2ec   :  { %5083 = vmatprep.subr.mxu0 %v5892_v1 }
 0x2ed   :  { %5084 = vmatpush3.msra.mxu0 %v6022_v39 }
 0x2ee   :  { %5085 = vmatprep.subr.mxu0 %v5892_v1 }
 0x2ef   :  { %5086 = vmatpush3.msra.mxu0 %v6037_v42 }
 0x2f0   :  { %5101 = vmatprep.subr.mxu0 %v5892_v1 }
 0x3a0   :  { %v370_v48 = vpop.f32.mrf.mxu0 }
 0x3a1   :  { %v371_v53 = vadd.f32 %v370_v48, %v6079_v51 }
 0x3a2   :  { %v5045_v50 = vpop.f32.mrf.mxu0 }
 0x3a3   :  { %v444_v57 = vadd.f32 %v440_v46, %v371_v53 }
 0x3a5   :  { %v445_v61 = vmul.f32 0.5, %v444_v57 }
 0x3a8   :  { %v533_v52 = vpop.f32.mrf.mxu0 }
 0x3a9   :  { %v538_v54 = vrot.slane %v533_v52, 6 }
 0x3aa   :  { %v5067_v55 = vpop.f32.mrf.mxu0 }
 0x3ab   :  { %v540_v56 = vadd.f32 %v538_v54, %v6000_v20 }
 0x3ad   :  { %5590 = vtanh.f32 %v540_v56  ;;  %v541_v60 = vmul.f32 0.5, %v540_v56 }
 0x3ae   :  { %5592 = vtanh.f32 %v444_v57 }
 0x3af   :  { %5594 = vtanh.f32 %v541_v60 }
 0x3b0   :  { %5596 = vtanh.f32 %v445_v61 }
 0x3ba   :  { %v5591_v58 = vpop.eup %5590 }
 0x3bb   :  { %551 = vrot.lane.b32.xlu0 %v5591_v58, %s5894_s0  ;;  %v5593_v59 = vpop.eup %5592 }
 0x3bc   :  { %v5595_v62 = vpop.eup %5594 }
 0x3bd   :  { %v543_v63 = vmul.f32 0.5, %v5595_v62  ;;  %v5597_v0 = vpop.eup %5596 }
 0x3be   :  { %v447_v3 = vmul.f32 0.5, %v5597_v0 }
 0x3bf   :  { %452 = vrot.lane.b32.xlu0 %v5593_v59, %s5894_s0  ;;  %v544_v4 = vadd.f32 0.5, %v543_v63 }
 0x3c0   :  { %v448_v8 = vadd.f32 0.5, %v447_v3 }
 0x3c1   :  { %v549_v19 = vmul.f32 %v547_v17, %v544_v4 }
 0x3c2   :  { %v450_v23 = vmul.f32 0.0, %v448_v8 }
 0x42d   :  { %v552_v5 = vpop.permute.xlu0 %551 }
 0x42e   :  { %v554_v7 = vmul.f32 %v552_v5, %v544_v4 }
 0x430   :  { %556 = vrot.lane.b32.xlu1 %v554_v7, %s5895_s3 }
 0x431   :  { %v453_v10 = vpop.permute.xlu0 %452 }
 0x432   :  { %v455_v16 = vmul.f32 %v453_v10, %v448_v8 }
 0x434   :  { %457 = vrot.lane.b32.xlu1 %v455_v16, %s5895_s3 }
 0x4a2   :  { %v557_v21 = vpop.permute.xlu1 %556 }
 0x4a3   :  { %v6088_v22 = vadd.f32 %v557_v21, %v549_v19 }
 0x4a5   :  { %5598 = vtanh.f32 %v6088_v22  ;;  %v820_v17 = vrot.slane %v6088_v22, 6 }
 0x4a6   :  { %v458_v24 = vpop.permute.xlu1 %457 }
 0x4a7   :  { %v6091_v25 = vadd.f32 %v458_v24, %v450_v23 }
 0x4a9   :  { %5600 = vtanh.f32 %v6091_v25 }
 0x4b2   :  { %v5599_v26 = vpop.eup %5598 }
 0x4b3   :  { %562 = vrot.lane.b32.xlu0 %v5599_v26, %s5894_s0 }
 0x4b6   :  { %v5601_v27 = vpop.eup %5600 }
 0x4b7   :  { %463 = vrot.lane.b32.xlu0 %v5601_v27, %s5894_s0 }
 0x525   :  { %v563_v28 = vpop.permute.xlu0 %562 }
 0x526   :  { %v565_v29 = vmul.f32 %v563_v28, %v544_v4 }
 0x528   :  { %v567_v30 = vrot.slane %v565_v29, 2 }
 0x529   :  { %v464_v31 = vpop.permute.xlu0 %463 }
 0x52a   :  { %568 = vrot.lane.b32.xlu1 %v567_v30, %s5895_s3  ;;  %v466_v32 = vmul.f32 %v464_v31, %v448_v8 }
 0x52e   :  { %643 = vrot.lane.b32.xlu1 %v466_v32, %s5895_s3 }
 0x59c   :  { %v569_v33 = vpop.permute.xlu1 %568 }
 0x59d   :  { %5077 = vmatmul.mubr.msk.f32.vlgmr.msra.gmra.mxu1 %vm202_vm2, %v569_v33 }
 0x59e   :  { %5091 = vmatpush3.msra.mxu1 %v5953_v6  ;;  %5098 = vmatprep.mubr.msk.f32.mxu1 %vm5893_vm0, %v5892_v1 }
 0x59f   :  { %5092 = vmatprep.subr.mxu1 %v5892_v1 }
 0x5a0   :  { %5093 = vmatpush3.msra.mxu1 %v5962_v9  ;;  %v644_v41 = vpop.permute.xlu1 %643 }
 0x5a1   :  { %5094 = vmatprep.subr.mxu1 %v5892_v1  ;;  %5088 = vmatmul.mubr.msk.f32.vlgmr.msra.gmra.mxu0 %vm202_vm2, %v644_v41 }
 0x5a2   :  { %5095 = vmatpush3.msra.mxu1 %v5972_v11  ;;  %5102 = vmatpush3.msra.mxu0 %v6008_v34 }
 0x5a3   :  { %5096 = vmatprep.subr.mxu1 %v5892_v1  ;;  %5103 = vmatprep.subr.mxu0 %v5892_v1 }
 0x5a4   :  { %5097 = vmatpush3.msra.mxu1 %v5983_v14  ;;  %5104 = vmatpush3.msra.mxu0 %v6010_v35 }
 0x5a5   :  { %5099 = vmatmul.mubr.msk.f32.vlgmr.msra.gmra.mxu1 %vm202_vm2, %v569_v33  ;;  %5112 = vmatprep.subr.mxu1 %v5892_v1 }
 0x5a6   :  { %5113 = vmatpush3.msra.mxu1 %v6012_v36  ;;  %5120 = vmatprep.mubr.msk.f32.mxu1 %vm5893_vm0, %v5892_v1 }
 0x5a7   :  { %5114 = vmatprep.subr.mxu1 %v5892_v1  ;;  %5105 = vmatprep.subr.mxu0 %v5892_v1 }
 0x5a8   :  { %5115 = vmatpush3.msra.mxu1 %v6016_v37  ;;  %5106 = vmatpush3.msra.mxu0 %v6019_v38 }
 0x5a9   :  { %5116 = vmatprep.subr.mxu1 %v5892_v1  ;;  %5107 = vmatprep.subr.mxu0 %v5892_v1 }
 0x5aa   :  { %5117 = vmatpush3.msra.mxu1 %v6022_v39  ;;  %5108 = vmatpush3.msra.mxu0 %v6027_v40 }
 0x5ab   :  { %5118 = vmatprep.subr.mxu1 %v5892_v1  ;;  %5109 = vmatprep.mubr.msk.f32.mxu0 %vm5893_vm0, %v5892_v1 }
 0x5ac   :  { %5119 = vmatpush3.msra.mxu1 %v6037_v42  ;;  %5123 = vmatprep.subr.mxu0 %v5892_v1 }
 0x5ad   :  { %5134 = vmatprep.subr.mxu1 %v5892_v1 }
 0x65d   :  { %v638_v43 = vpop.f32.mrf.mxu1 }
 0x65e   :  { %v639_v45 = vadd.f32 %v638_v43, %v6079_v51 }
 0x65f   :  { %v5078_v44 = vpop.f32.mrf.mxu1 }
 0x661   :  { %v713_v46 = vpop.f32.mrf.mxu0 }
 0x662   :  { %v717_v47 = vadd.f32 %v713_v46, %v639_v45 }
 0x663   :  { %v5089_v48 = vpop.f32.mrf.mxu0 }
 0x664   :  { %5602 = vtanh.f32 %v717_v47  ;;  %v718_v57 = vmul.f32 0.5, %v717_v47 }
 0x665   :  { %v806_v50 = vpop.f32.mrf.mxu1 }
 0x666   :  { %v811_v52 = vrot.slane %v806_v50, 4 }
 0x667   :  { %v5100_v53 = vpop.f32.mrf.mxu1 }
 0x668   :  { %v813_v54 = vadd.f32 %v811_v52, %v6000_v20 }
 0x66a   :  { %5604 = vtanh.f32 %v813_v54  ;;  %v814_v58 = vmul.f32 0.5, %v813_v54 }
 0x66b   :  { %5606 = vtanh.f32 %v718_v57 }
 0x66c   :  { %5608 = vtanh.f32 %v814_v58 }
 0x671   :  { %v5603_v55 = vpop.eup %5602 }
 0x672   :  { %725 = vrot.lane.b32.xlu1 %v5603_v55, %s5894_s0 }
 0x677   :  { %v5605_v56 = vpop.eup %5604 }
 0x678   :  { %824 = vrot.lane.b32.xlu0 %v5605_v56, %s5894_s0  ;;  %v5607_v59 = vpop.eup %5606 }
 0x679   :  { %v720_v60 = vmul.f32 0.5, %v5607_v59  ;;  %v5609_v61 = vpop.eup %5608 }
 0x67a   :  { %v816_v3 = vmul.f32 0.5, %v5609_v61 }
 0x67b   :  { %v721_v62 = vadd.f32 0.5, %v720_v60 }
 0x67c   :  { %v817_v4 = vadd.f32 0.5, %v816_v3 }
 0x67d   :  { %v723_v8 = vmul.f32 %v721_v62, %v6091_v25 }
 0x67e   :  { %v822_v19 = vmul.f32 %v820_v17, %v817_v4 }
 0x6e4   :  { %v726_v63 = vpop.permute.xlu1 %725 }
 0x6e5   :  { %v728_v0 = vmul.f32 %v726_v63, %v721_v62 }
 0x6e7   :  { %730 = vrot.lane.b32.xlu1 %v728_v0, %s5895_s3 }
 0x6ea   :  { %v825_v5 = vpop.permute.xlu0 %824 }
 0x6eb   :  { %v827_v7 = vmul.f32 %v825_v5, %v817_v4 }
 0x6ed   :  { %829 = vrot.lane.b32.xlu0 %v827_v7, %s5895_s3 }
 0x759   :  { %v731_v10 = vpop.permute.xlu1 %730 }
 0x75a   :  { %v6138_v16 = vadd.f32 %v731_v10, %v723_v8 }
 0x75c   :  { %5610 = vtanh.f32 %v6138_v16 }
 0x75f   :  { %v830_v21 = vpop.permute.xlu0 %829 }
 0x760   :  { %v6142_v23 = vadd.f32 %v830_v21, %v822_v19 }
 0x762   :  { %5612 = vtanh.f32 %v6142_v23  ;;  %v1093_v7 = vrot.slane %v6142_v23, 6 }
 0x769   :  { %v5611_v24 = vpop.eup %5610 }
 0x76a   :  { %736 = vrot.lane.b32.xlu1 %v5611_v24, %s5894_s0 }
 0x76f   :  { %v5613_v26 = vpop.eup %5612 }
 0x770   :  { %835 = vrot.lane.b32.xlu0 %v5613_v26, %s5894_s0 }
 0x7dc   :  { %v737_v25 = vpop.permute.xlu1 %736 }
 0x7dd   :  { %v739_v27 = vmul.f32 %v737_v25, %v721_v62 }
 0x7df   :  { %916 = vrot.lane.b32.xlu1 %v739_v27, %s5895_s3 }
 0x7e2   :  { %v836_v28 = vpop.permute.xlu0 %835 }
 0x7e3   :  { %v838_v22 = vmul.f32 %v836_v28, %v817_v4 }
 0x7e5   :  { %v840_v29 = vrot.slane %v838_v22, 4 }
 0x7e7   :  { %841 = vrot.lane.b32.xlu0 %v840_v29, %s5895_s3 }
 0x851   :  { %v917_v30 = vpop.permute.xlu1 %916 }
 0x852   :  { %5121 = vmatmul.mubr.msk.f32.vlgmr.msra.gmra.mxu1 %vm202_vm2, %v917_v30 }
 0x853   :  { %5135 = vmatpush3.msra.mxu1 %v6008_v34  ;;  %5142 = vmatprep.mubr.msk.f32.mxu1 %vm5893_vm0, %v5892_v1 }
 0x854   :  { %5136 = vmatprep.subr.mxu1 %v5892_v1 }
 0x855   :  { %5137 = vmatpush3.msra.mxu1 %v6010_v35 }
 0x856   :  { %5138 = vmatprep.subr.mxu1 %v5892_v1 }
 0x857   :  { %5139 = vmatpush3.msra.mxu1 %v6019_v38 }
 0x858   :  { %5140 = vmatprep.subr.mxu1 %v5892_v1 }
 0x859   :  { %v842_v31 = vpop.permute.xlu0 %841  ;;  %5141 = vmatpush3.msra.mxu1 %v6027_v40 }
 0x85a   :  { %5110 = vmatmul.mubr.msk.f32.vlgmr.msra.gmra.mxu0 %vm202_vm2, %v842_v31  ;;  %5156 = vmatprep.subr.mxu1 %v5892_v1 }
 0x85b   :  { %5124 = vmatpush3.msra.mxu0 %v5953_v6  ;;  %5131 = vmatprep.mubr.msk.f32.mxu0 %vm5893_vm0, %v5892_v1 }
 0x85c   :  { %5125 = vmatprep.subr.mxu0 %v5892_v1 }
 0x85d   :  { %5126 = vmatpush3.msra.mxu0 %v5962_v9 }
 0x85e   :  { %5127 = vmatprep.subr.mxu0 %v5892_v1 }
 0x85f   :  { %5128 = vmatpush3.msra.mxu0 %v5972_v11 }
 0x860   :  { %5129 = vmatprep.subr.mxu0 %v5892_v1 }
 0x861   :  { %5130 = vmatpush3.msra.mxu0 %v5983_v14 }
 0x862   :  { %5132 = vmatmul.mubr.msk.f32.vlgmr.msra.gmra.mxu0 %vm202_vm2, %v842_v31  ;;  %5145 = vmatprep.subr.mxu0 %v5892_v1 }
 0x863   :  { %5146 = vmatpush3.msra.mxu0 %v6012_v36  ;;  %5153 = vmatprep.mubr.msk.f32.mxu0 %vm5893_vm0, %v5892_v1 }
 0x864   :  { %5147 = vmatprep.subr.mxu0 %v5892_v1 }
 0x865   :  { %5148 = vmatpush3.msra.mxu0 %v6016_v37 }
 0x866   :  { %5149 = vmatprep.subr.mxu0 %v5892_v1 }
 0x867   :  { %5150 = vmatpush3.msra.mxu0 %v6022_v39 }
 0x868   :  { %5151 = vmatprep.subr.mxu0 %v5892_v1 }
 0x869   :  { %5152 = vmatpush3.msra.mxu0 %v6037_v42 }
 0x86a   :  { %5167 = vmatprep.subr.mxu0 %v5892_v1 }
 0x912   :  { %v986_v32 = vpop.f32.mrf.mxu1 }
 0x914   :  { %v5122_v33 = vpop.f32.mrf.mxu1 }
 0x91a   :  { %v911_v41 = vpop.f32.mrf.mxu0 }
 0x91b   :  { %v912_v43 = vadd.f32 %v911_v41, %v6079_v51 }
 0x91c   :  { %v5111_v44 = vpop.f32.mrf.mxu0 }
 0x91d   :  { %v990_v45 = vadd.f32 %v986_v32, %v912_v43 }
 0x91f   :  { %5614 = vtanh.f32 %v990_v45  ;;  %v991_v54 = vmul.f32 0.5, %v990_v45 }
 0x922   :  { %v1079_v46 = vpop.f32.mrf.mxu0 }
 0x923   :  { %v1084_v47 = vrot.slane %v1079_v46, 2 }
 0x924   :  { %v5133_v48 = vpop.f32.mrf.mxu0 }
 0x925   :  { %v1086_v50 = vadd.f32 %v1084_v47, %v6000_v20 }
 0x927   :  { %5616 = vtanh.f32 %v1086_v50  ;;  %v1087_v55 = vmul.f32 0.5, %v1086_v50 }
 0x928   :  { %5618 = vtanh.f32 %v991_v54 }
 0x929   :  { %5620 = vtanh.f32 %v1087_v55 }
 0x92c   :  { %v5615_v52 = vpop.eup %5614 }
 0x92d   :  { %998 = vrot.lane.b32.xlu1 %v5615_v52, %s5894_s0 }
 0x934   :  { %v5617_v53 = vpop.eup %5616 }
 0x935   :  { %1097 = vrot.lane.b32.xlu0 %v5617_v53, %s5894_s0  ;;  %v5619_v56 = vpop.eup %5618 }
 0x936   :  { %v993_v57 = vmul.f32 0.5, %v5619_v56  ;;  %v5621_v59 = vpop.eup %5620 }
 0x937   :  { %v1089_v20 = vmul.f32 0.5, %v5621_v59 }
 0x938   :  { %v994_v58 = vadd.f32 0.5, %v993_v57 }
 0x939   :  { %v1090_v62 = vadd.f32 0.5, %v1089_v20 }
 0x93a   :  { %v996_v3 = vmul.f32 %v994_v58, %v6138_v16 }
 0x93b   :  { %v1095_v8 = vmul.f32 %v1093_v7, %v1090_v62 }
 0x99f   :  { %v999_v60 = vpop.permute.xlu1 %998 }
 0x9a0   :  { %v1001_v61 = vmul.f32 %v999_v60, %v994_v58 }
 0x9a2   :  { %1003 = vrot.lane.b32.xlu1 %v1001_v61, %s5895_s3 }
 0x9a7   :  { %v1098_v63 = vpop.permute.xlu0 %1097 }
 0x9a8   :  { %v1100_v0 = vmul.f32 %v1098_v63, %v1090_v62 }
 0x9aa   :  { %1102 = vrot.lane.b32.xlu0 %v1100_v0, %s5895_s3 }
 0xa14   :  { %v1004_v4 = vpop.permute.xlu1 %1003 }
 0xa15   :  { %v6189_v5 = vadd.f32 %v1004_v4, %v996_v3 }
 0xa17   :  { %5622 = vtanh.f32 %v6189_v5 }
 0xa1c   :  { %v1103_v10 = vpop.permute.xlu0 %1102 }
 0xa1d   :  { %v6193_v17 = vadd.f32 %v1103_v10, %v1095_v8 }
 0xa1f   :  { %5624 = vtanh.f32 %v6193_v17  ;;  %v1363_v63 = vrot.slane %v6193_v17, 6 }
 0xa24   :  { %v5623_v19 = vpop.eup %5622 }
 0xa25   :  { %1009 = vrot.lane.b32.xlu1 %v5623_v19, %s5894_s0 }
 0xa2c   :  { %v5625_v21 = vpop.eup %5624 }
 0xa2d   :  { %1108 = vrot.lane.b32.xlu0 %v5625_v21, %s5894_s0 }
 0xa97   :  { %v1010_v16 = vpop.permute.xlu1 %1009 }
 0xa98   :  { %v1012_v24 = vmul.f32 %v1010_v16, %v994_v58 }
 0xa9a   :  { %1189 = vrot.lane.b32.xlu1 %v1012_v24, %s5895_s3 }
 0xa9f   :  { %v1109_v26 = vpop.permute.xlu0 %1108 }
 0xaa0   :  { %v1111_v25 = vmul.f32 %v1109_v26, %v1090_v62 }
 0xaa2   :  { %v1113_v27 = vrot.slane %v1111_v25, 6 }
 0xaa4   :  { %1114 = vrot.lane.b32.xlu0 %v1113_v27, %s5895_s3 }
 0xb0c   :  { %v1190_v23 = vpop.permute.xlu1 %1189 }
 0xb0d   :  { %5154 = vmatmul.mubr.msk.f32.vlgmr.msra.gmra.mxu0 %vm202_vm2, %v1190_v23 }
 0xb0e   :  { %5168 = vmatpush3.msra.mxu0 %v6008_v34  ;;  %5175 = vmatprep.mubr.msk.f32.mxu0 %vm5893_vm0, %v5892_v1 }
 0xb0f   :  { %5169 = vmatprep.subr.mxu0 %v5892_v1 }
 0xb10   :  { %5170 = vmatpush3.msra.mxu0 %v6010_v35 }
 0xb11   :  { %5171 = vmatprep.subr.mxu0 %v5892_v1 }
 0xb12   :  { %5172 = vmatpush3.msra.mxu0 %v6019_v38 }
 0xb13   :  { %5173 = vmatprep.subr.mxu0 %v5892_v1 }
 0xb14   :  { %5174 = vmatpush3.msra.mxu0 %v6027_v40 }
 0xb15   :  { %5189 = vmatprep.subr.mxu0 %v5892_v1 }
 0xb16   :  { %v1115_v28 = vpop.permute.xlu0 %1114 }
 0xb17   :  { %5143 = vmatmul.mubr.msk.f32.vlgmr.msra.gmra.mxu1 %vm202_vm2, %v1115_v28 }
 0xb18   :  { %5157 = vmatpush3.msra.mxu1 %v5953_v6  ;;  %5164 = vmatprep.mubr.msk.f32.mxu1 %vm5893_vm0, %v5892_v1 }
 0xb19   :  { %5158 = vmatprep.subr.mxu1 %v5892_v1 }
 0xb1a   :  { %5159 = vmatpush3.msra.mxu1 %v5962_v9 }
 0xb1b   :  { %5160 = vmatprep.subr.mxu1 %v5892_v1 }
 0xb1c   :  { %5161 = vmatpush3.msra.mxu1 %v5972_v11 }
 0xb1d   :  { %5162 = vmatprep.subr.mxu1 %v5892_v1 }
 0xb1e   :  { %5163 = vmatpush3.msra.mxu1 %v5983_v14 }
 0xb1f   :  { %5165 = vmatmul.mubr.msk.f32.vlgmr.msra.gmra.mxu1 %vm202_vm2, %v1115_v28  ;;  %5178 = vmatprep.subr.mxu1 %v5892_v1 }
 0xb20   :  { %5179 = vmatpush3.msra.mxu1 %v6012_v36  ;;  %5186 = vmatprep.mubr.msk.f32.mxu1 %vm5893_vm0, %v5892_v1 }
 0xb21   :  { %5180 = vmatprep.subr.mxu1 %v5892_v1 }
 0xb22   :  { %5181 = vmatpush3.msra.mxu1 %v6016_v37 }
 0xb23   :  { %5182 = vmatprep.subr.mxu1 %v5892_v1 }
 0xb24   :  { %5183 = vmatpush3.msra.mxu1 %v6022_v39 }
 0xb25   :  { %5184 = vmatprep.subr.mxu1 %v5892_v1 }
 0xb26   :  { %5185 = vmatpush3.msra.mxu1 %v6037_v42 }
 0xb27   :  { %5200 = vmatprep.subr.mxu1 %v5892_v1 }
 0xbcd   :  { %v1259_v22 = vpop.f32.mrf.mxu0 }
 0xbcf   :  { %v5155_v29 = vpop.f32.mrf.mxu0 }
 0xbd7   :  { %v1184_v30 = vpop.f32.mrf.mxu1 }
 0xbd8   :  { %v1185_v31 = vadd.f32 %v1184_v30, %v6079_v51 }
 0xbd9   :  { %v5144_v32 = vpop.f32.mrf.mxu1 }
 0xbda   :  { %v1263_v33 = vadd.f32 %v1259_v22, %v1185_v31 }
 0xbdc   :  { %5626 = vtanh.f32 %v1263_v33  ;;  %v1264_v47 = vmul.f32 0.5, %v1263_v33 }
 0xbdf   :  { %v1352_v41 = vpop.f32.mrf.mxu1 }
 0xbe0   :  { %v1356_v43 = vadd.f32 %v1352_v41, %v5998_v18 }
 0xbe1   :  { %v5166_v44 = vpop.f32.mrf.mxu1 }
 0xbe2   :  { %5628 = vtanh.f32 %v1356_v43  ;;  %v1357_v48 = vmul.f32 0.5, %v1356_v43 }
 0xbe3   :  { %5630 = vtanh.f32 %v1264_v47 }
 0xbe4   :  { %5632 = vtanh.f32 %v1357_v48 }
 0xbe9   :  { %v5627_v45 = vpop.eup %5626 }
 0xbea   :  { %1271 = vrot.lane.b32.xlu1 %v5627_v45, %s5894_s0 }
 0xbef   :  { %v5629_v46 = vpop.eup %5628 }
 0xbf0   :  { %1367 = vrot.lane.b32.xlu0 %v5629_v46, %s5894_s0  ;;  %v5631_v50 = vpop.eup %5630 }
 0xbf1   :  { %v1266_v52 = vmul.f32 0.5, %v5631_v50  ;;  %v5633_v53 = vpop.eup %5632 }
 0xbf2   :  { %v1359_v56 = vmul.f32 0.5, %v5633_v53 }
 0xbf3   :  { %v1267_v54 = vadd.f32 0.5, %v1266_v52 }
 0xbf4   :  { %v1360_v58 = vadd.f32 0.5, %v1359_v56 }
 0xbf5   :  { %v1269_v61 = vmul.f32 %v1267_v54, %v6189_v5 }
 0xbf6   :  { %v1365_v0 = vmul.f32 %v1363_v63, %v1360_v58 }
 0xc5c   :  { %v1272_v55 = vpop.permute.xlu1 %1271 }
 0xc5d   :  { %v1274_v57 = vmul.f32 %v1272_v55, %v1267_v54 }
 0xc5f   :  { %1276 = vrot.lane.b32.xlu1 %v1274_v57, %s5895_s3 }
 0xc62   :  { %v1368_v59 = vpop.permute.xlu0 %1367 }
 0xc63   :  { %v1370_v60 = vmul.f32 %v1368_v59, %v1360_v58 }
 0xc65   :  { %1372 = vrot.lane.b32.xlu0 %v1370_v60, %s5895_s3 }
 0xcd1   :  { %v1277_v20 = vpop.permute.xlu1 %1276 }
 0xcd2   :  { %v6240_v62 = vadd.f32 %v1277_v20, %v1269_v61 }
 0xcd4   :  { %5634 = vtanh.f32 %v6240_v62 }
 0xcd7   :  { %v1373_v3 = vpop.permute.xlu0 %1372 }
 0xcd8   :  { %v6244_v4 = vadd.f32 %v1373_v3, %v1365_v0 }
 0xcda   :  { %5636 = vtanh.f32 %v6244_v4 }
 0xce1   :  { %v5635_v7 = vpop.eup %5634 }
 0xce2   :  { %1282 = vrot.lane.b32.xlu1 %v5635_v7, %s5894_s0 }
 0xce7   :  { %v5637_v8 = vpop.eup %5636 }
 0xce8   :  { %1378 = vrot.lane.b32.xlu0 %v5637_v8, %s5894_s0 }
 0xd54   :  { %v1283_v5 = vpop.permute.xlu1 %1282 }
 0xd55   :  { %v1285_v10 = vmul.f32 %v1283_v5, %v1267_v54 }
 0xd57   :  { %1458 = vrot.lane.b32.xlu1 %v1285_v10, %s5895_s3 }
 0xd5a   :  { %v1379_v19 = vpop.permute.xlu0 %1378 }
 0xd5b   :  { %v1381_v17 = vmul.f32 %v1379_v19, %v1360_v58  ;;  %v1635_v58 = vrot.slane %v6244_v4, 6 }
 0xd5d   :  { %1383 = vrot.lane.b32.xlu0 %v1381_v17, %s5895_s3 }
 0xdc9   :  { %v1459_v21 = vpop.permute.xlu1 %1458 }
 0xdca   :  { %5187 = vmatmul.mubr.msk.f32.vlgmr.msra.gmra.mxu1 %vm202_vm2, %v1459_v21 }
 0xdcb   :  { %5201 = vmatpush3.msra.mxu1 %v6008_v34  ;;  %5208 = vmatprep.mubr.msk.f32.mxu1 %vm5893_vm0, %v5892_v1 }
 0xdcc   :  { %5202 = vmatprep.subr.mxu1 %v5892_v1 }
 0xdcd   :  { %5203 = vmatpush3.msra.mxu1 %v6010_v35 }
 0xdce   :  { %5204 = vmatprep.subr.mxu1 %v5892_v1 }
 0xdcf   :  { %v1384_v16 = vpop.permute.xlu0 %1383  ;;  %5205 = vmatpush3.msra.mxu1 %v6019_v38 }
 0xdd0   :  { %5176 = vmatmul.mubr.msk.f32.vlgmr.msra.gmra.mxu0 %vm202_vm2, %v1384_v16  ;;  %5206 = vmatprep.subr.mxu1 %v5892_v1 }
 0xdd1   :  { %5190 = vmatpush3.msra.mxu0 %v5953_v6  ;;  %5197 = vmatprep.mubr.msk.f32.mxu0 %vm5893_vm0, %v5892_v1 }
 0xdd2   :  { %5191 = vmatprep.subr.mxu0 %v5892_v1  ;;  %5207 = vmatpush3.msra.mxu1 %v6027_v40 }
 0xdd3   :  { %5192 = vmatpush3.msra.mxu0 %v5962_v9  ;;  %5222 = vmatprep.subr.mxu1 %v5892_v1 }
 0xdd4   :  { %5193 = vmatprep.subr.mxu0 %v5892_v1 }
 0xdd5   :  { %5194 = vmatpush3.msra.mxu0 %v5972_v11 }
 0xdd6   :  { %5195 = vmatprep.subr.mxu0 %v5892_v1 }
 0xdd7   :  { %5196 = vmatpush3.msra.mxu0 %v5983_v14 }
 0xdd8   :  { %5198 = vmatmul.mubr.msk.f32.vlgmr.msra.gmra.mxu0 %vm202_vm2, %v1384_v16  ;;  %5211 = vmatprep.subr.mxu0 %v5892_v1 }
 0xdd9   :  { %5212 = vmatpush3.msra.mxu0 %v6012_v36  ;;  %5219 = vmatprep.mubr.msk.f32.mxu0 %vm5893_vm0, %v5892_v1 }
 0xdda   :  { %5213 = vmatprep.subr.mxu0 %v5892_v1 }
 0xddb   :  { %5214 = vmatpush3.msra.mxu0 %v6016_v37 }
 0xddc   :  { %5215 = vmatprep.subr.mxu0 %v5892_v1 }
 0xddd   :  { %5216 = vmatpush3.msra.mxu0 %v6022_v39 }
 0xdde   :  { %5217 = vmatprep.subr.mxu0 %v5892_v1 }
 0xddf   :  { %5218 = vmatpush3.msra.mxu0 %v6037_v42 }
 0xde0   :  { %5233 = vmatprep.subr.mxu0 %v5892_v1 }
 0xe8a   :  { %v1528_v6 = vpop.f32.mrf.mxu1 }
 0xe8c   :  { %v5188_v24 = vpop.f32.mrf.mxu1 }
 0xe90   :  { %v1453_v26 = vpop.f32.mrf.mxu0 }
 0xe91   :  { %v1454_v25 = vadd.f32 %v1453_v26, %v6079_v51 }
 0xe92   :  { %v5177_v27 = vpop.f32.mrf.mxu0 }
 0xe93   :  { %v1532_v23 = vadd.f32 %v1528_v6, %v1454_v25 }
 0xe95   :  { %5638 = vtanh.f32 %v1532_v23  ;;  %v1533_v33 = vmul.f32 0.5, %v1532_v23 }
 0xe98   :  { %v1621_v28 = vpop.f32.mrf.mxu0 }
 0xe99   :  { %v1626_v22 = vrot.slane %v1621_v28, 6 }
 0xe9a   :  { %v5199_v29 = vpop.f32.mrf.mxu0 }
 0xe9b   :  { %v1628_v30 = vadd.f32 %v1626_v22, %v5998_v18 }
 0xe9d   :  { %5640 = vtanh.f32 %v1628_v30  ;;  %v1629_v41 = vmul.f32 0.5, %v1628_v30 }
 0xe9e   :  { %5642 = vtanh.f32 %v1533_v33 }
 0xe9f   :  { %5644 = vtanh.f32 %v1629_v41 }
 0xea2   :  { %v5639_v31 = vpop.eup %5638 }
 0xea3   :  { %1540 = vrot.lane.b32.xlu1 %v5639_v31, %s5894_s0 }
 0xeaa   :  { %v5641_v32 = vpop.eup %5640 }
 0xeab   :  { %1639 = vrot.lane.b32.xlu0 %v5641_v32, %s5894_s0  ;;  %v5643_v43 = vpop.eup %5642 }
 0xeac   :  { %v1535_v44 = vmul.f32 0.5, %v5643_v43  ;;  %v5645_v46 = vpop.eup %5644 }
 0xead   :  { %v1631_v50 = vmul.f32 0.5, %v5645_v46 }
 0xeae   :  { %v1536_v45 = vadd.f32 0.5, %v1535_v44 }
 0xeaf   :  { %v1632_v52 = vadd.f32 0.5, %v1631_v50 }
 0xeb0   :  { %v1538_v55 = vmul.f32 %v1536_v45, %v6240_v62 }
 0xeb1   :  { %v1637_v59 = vmul.f32 %v1635_v58, %v1632_v52  ;;  %v5780_v58 = vld [vmem:[#allocation2 + $0x8] sm:$0xff] }
 0xf15   :  { %v1541_v47 = vpop.permute.xlu1 %1540 }
 0xf16   :  { %v1543_v48 = vmul.f32 %v1541_v47, %v1536_v45 }
 0xf18   :  { %1545 = vrot.lane.b32.xlu1 %v1543_v48, %s5895_s3 }
 0xf1d   :  { %v1640_v53 = vpop.permute.xlu0 %1639 }
 0xf1e   :  { %v1642_v54 = vmul.f32 %v1640_v53, %v1632_v52 }
 0xf20   :  { %1644 = vrot.lane.b32.xlu0 %v1642_v54, %s5895_s3 }
 0xf8a   :  { %v1546_v56 = vpop.permute.xlu1 %1545 }
 0xf8b   :  { %v6291_v57 = vadd.f32 %v1546_v56, %v1538_v55  ;;  %v5777_v55 = vld [vmem:[#allocation2 + $0x20] sm:$0xff]  ;;  %v5778_v56 = vld [vmem:[#allocation2 + $0x18] sm:$0xff] }
 0xf8d   :  { %5646 = vtanh.f32 %v6291_v57 }
 0xf92   :  { %v1645_v60 = vpop.permute.xlu0 %1644 }
 0xf93   :  { %v6295_v61 = vadd.f32 %v1645_v60, %v1637_v59  ;;  %v5781_v60 = vld [vmem:[#allocation5 + $0x10] sm:$0xff] }
 0xf95   :  { %5648 = vtanh.f32 %v6295_v61  ;;  %v1908_v33 = vrot.slane %v6295_v61, 6  ;;  %v5782_v61 = vld [vmem:[#allocation5 + $0x8] sm:$0xff] }
 0xf9a   :  { %v5647_v20 = vpop.eup %5646 }
 0xf9b   :  { %1551 = vrot.lane.b32.xlu1 %v5647_v20, %s5894_s0  ;;  %v5783_v20 = vld [vmem:[#allocation5] sm:$0xff] }
 0xfa2   :  { %v5649_v63 = vpop.eup %5648 }
 0xfa3   :  { %1650 = vrot.lane.b32.xlu0 %v5649_v63, %s5894_s0  ;;  %v5784_v63 = vld [vmem:[#allocation5 + $0x38] sm:$0xff] }
0x100d   :  { %v1552_v62 = vpop.permute.xlu1 %1551 }
0x100e   :  { %v1554_v0 = vmul.f32 %v1552_v62, %v1536_v45  ;;  %v5785_v62 = vld [vmem:[#allocation5 + $0x30] sm:$0xff] }
0x1010   :  { %1731 = vrot.lane.b32.xlu1 %v1554_v0, %s5895_s3  ;;  %v5786_v0 = vld [vmem:[#allocation5 + $0x28] sm:$0xff] }
0x1015   :  { %v1651_v3 = vpop.permute.xlu0 %1650 }
0x1016   :  { %v1653_v7 = vmul.f32 %v1651_v3, %v1632_v52  ;;  %v5787_v3 = vld [vmem:[#allocation5 + $0x20] sm:$0xff] }
0x1018   :  { %v1655_v8 = vrot.slane %v1653_v7, 2 }
0x101a   :  { %1656 = vrot.lane.b32.xlu0 %v1655_v8, %s5895_s3 }
0x1082   :  { %v1732_v4 = vpop.permute.xlu1 %1731 }
0x1083   :  { %5220 = vmatmul.mubr.msk.f32.vlgmr.msra.gmra.mxu0 %vm202_vm2, %v1732_v4 }
0x1084   :  { %5234 = vmatpush3.msra.mxu0 %v6008_v34  ;;  %5241 = vmatprep.mubr.msk.f32.mxu0 %vm5893_vm0, %v5892_v1  ;;  %v6314_v34 = vld [vmem:[#allocation5 + $0x18] sm:$0xff] }
0x1085   :  { %5235 = vmatprep.subr.mxu0 %v5892_v1 }
0x1086   :  { %5236 = vmatpush3.msra.mxu0 %v6010_v35 }
0x1087   :  { %5237 = vmatprep.subr.mxu0 %v5892_v1 }
0x1088   :  { %5238 = vmatpush3.msra.mxu0 %v6019_v38 }
0x1089   :  { %5239 = vmatprep.subr.mxu0 %v5892_v1 }
0x108a   :  { %5240 = vmatpush3.msra.mxu0 %v6027_v40 }
0x108b   :  { %5255 = vmatprep.subr.mxu0 %v5892_v1 }
0x108c   :  { %v1657_v5 = vpop.permute.xlu0 %1656 }
0x108d   :  { %5209 = vmatmul.mubr.msk.f32.vlgmr.msra.gmra.mxu1 %vm202_vm2, %v1657_v5 }
0x108e   :  { %5223 = vmatpush3.msra.mxu1 %v6314_v34  ;;  %5230 = vmatprep.mubr.msk.f32.mxu1 %vm5893_vm0, %v5892_v1 }
0x108f   :  { %5224 = vmatprep.subr.mxu1 %v5892_v1 }
0x1090   :  { %5225 = vmatpush3.msra.mxu1 %v5962_v9 }
0x1091   :  { %5226 = vmatprep.subr.mxu1 %v5892_v1 }
0x1092   :  { %5227 = vmatpush3.msra.mxu1 %v5972_v11 }
0x1093   :  { %5228 = vmatprep.subr.mxu1 %v5892_v1 }
0x1094   :  { %5229 = vmatpush3.msra.mxu1 %v5983_v14 }
0x1095   :  { %5231 = vmatmul.mubr.msk.f32.vlgmr.msra.gmra.mxu1 %vm202_vm2, %v1657_v5  ;;  %5244 = vmatprep.subr.mxu1 %v5892_v1 }
0x1096   :  { %5245 = vmatpush3.msra.mxu1 %v6012_v36  ;;  %5252 = vmatprep.mubr.msk.f32.mxu1 %vm5893_vm0, %v5892_v1 }
0x1097   :  { %5246 = vmatprep.subr.mxu1 %v5892_v1 }
0x1098   :  { %5247 = vmatpush3.msra.mxu1 %v6016_v37 }
0x1099   :  { %5248 = vmatprep.subr.mxu1 %v5892_v1 }
0x109a   :  { %5249 = vmatpush3.msra.mxu1 %v6022_v39 }
0x109b   :  { %5250 = vmatprep.subr.mxu1 %v5892_v1 }
0x109c   :  { %5251 = vmatpush3.msra.mxu1 %v6037_v42 }
0x109d   :  { %5266 = vmatprep.subr.mxu1 %v5892_v1 }
0x1143   :  { %v1801_v9 = vpop.f32.mrf.mxu0 }
0x1145   :  { %v5221_v11 = vpop.f32.mrf.mxu0 }
0x114d   :  { %v1726_v14 = vpop.f32.mrf.mxu1 }
0x114e   :  { %v1727_v35 = vadd.f32 %v1726_v14, %v6079_v51 }
0x114f   :  { %v5210_v36 = vpop.f32.mrf.mxu1 }
0x1150   :  { %v1805_v38 = vadd.f32 %v1801_v9, %v1727_v35 }
0x1152   :  { %5650 = vtanh.f32 %v1805_v38  ;;  %v1806_v17 = vmul.f32 0.5, %v1805_v38 }
0x1155   :  { %v1894_v40 = vpop.f32.mrf.mxu1 }
0x1156   :  { %v1899_v37 = vrot.slane %v1894_v40, 4 }
0x1157   :  { %v5232_v10 = vpop.f32.mrf.mxu1 }
0x1158   :  { %v1901_v19 = vadd.f32 %v1899_v37, %v5998_v18 }
0x115a   :  { %5652 = vtanh.f32 %v1901_v19  ;;  %v1902_v21 = vmul.f32 0.5, %v1901_v19 }
0x115b   :  { %5654 = vtanh.f32 %v1806_v17 }
0x115c   :  { %5656 = vtanh.f32 %v1902_v21 }
0x115f   :  { %v5651_v39 = vpop.eup %5650 }
0x1160   :  { %1813 = vrot.lane.b32.xlu1 %v5651_v39, %s5894_s0 }
0x1167   :  { %v5653_v42 = vpop.eup %5652 }
0x1168   :  { %1912 = vrot.lane.b32.xlu0 %v5653_v42, %s5894_s0  ;;  %v5655_v16 = vpop.eup %5654 }
0x1169   :  { %v1808_v6 = vmul.f32 0.5, %v5655_v16  ;;  %v5657_v26 = vpop.eup %5656 }
0x116a   :  { %v1904_v23 = vmul.f32 0.5, %v5657_v26 }
0x116b   :  { %v1809_v24 = vadd.f32 0.5, %v1808_v6 }
0x116c   :  { %v1905_v28 = vadd.f32 0.5, %v1904_v23 }
0x116d   :  { %v1811_v30 = vmul.f32 %v1809_v24, %v6291_v57  ;;  %v5779_v57 = vld [vmem:[#allocation2 + $0x10] sm:$0xff] }
0x116e   :  { %v1910_v41 = vmul.f32 %v1908_v33, %v1905_v28 }
0x11d2   :  { %v1814_v25 = vpop.permute.xlu1 %1813 }
0x11d3   :  { %v1816_v27 = vmul.f32 %v1814_v25, %v1809_v24 }
0x11d5   :  { %1818 = vrot.lane.b32.xlu1 %v1816_v27, %s5895_s3 }
0x11da   :  { %v1913_v22 = vpop.permute.xlu0 %1912 }
0x11db   :  { %v1915_v29 = vmul.f32 %v1913_v22, %v1905_v28 }
0x11dd   :  { %1917 = vrot.lane.b32.xlu0 %v1915_v29, %s5895_s3 }
0x1247   :  { %v1819_v31 = vpop.permute.xlu1 %1818 }
0x1248   :  { %v6344_v32 = vadd.f32 %v1819_v31, %v1811_v30 }
0x124a   :  { %5658 = vtanh.f32 %v6344_v32 }
0x124f   :  { %v1918_v43 = vpop.permute.xlu0 %1917 }
0x1250   :  { %v6348_v44 = vadd.f32 %v1918_v43, %v1910_v41 }
0x1252   :  { %5660 = vtanh.f32 %v6348_v44 }
0x1257   :  { %v5659_v45 = vpop.eup %5658 }
0x1258   :  { %1824 = vrot.lane.b32.xlu1 %v5659_v45, %s5894_s0 }
0x125f   :  { %v5661_v46 = vpop.eup %5660 }
0x1260   :  { %1923 = vrot.lane.b32.xlu0 %v5661_v46, %s5894_s0 }
0x12ca   :  { %v1825_v47 = vpop.permute.xlu1 %1824 }
0x12cb   :  { %v1827_v48 = vmul.f32 %v1825_v47, %v1809_v24 }
0x12cd   :  { %2004 = vrot.lane.b32.xlu1 %v1827_v48, %s5895_s3  ;;  %v6398_v48 = vld [vmem:[#allocation5 + $0x50] sm:$0xff] }
0x12d2   :  { %v1924_v50 = vpop.permute.xlu0 %1923 }
0x12d3   :  { %v1926_v52 = vmul.f32 %v1924_v50, %v1905_v28  ;;  %v2181_v28 = vrot.slane %v6348_v44, 6  ;;  %v6395_v44 = vld [vmem:[#allocation5 + $0x58] sm:$0xff]  ;;  %v6404_v50 = vld [vmem:[#allocation5 + $0x48] sm:$0xff] }
0x12d5   :  { %v1928_v53 = vrot.slane %v1926_v52, 4  ;;  %v6408_v52 = vld [vmem:[#allocation5 + $0x40] sm:$0xff] }
0x12d7   :  { %1929 = vrot.lane.b32.xlu0 %v1928_v53, %s5895_s3 }
0x133f   :  { %v2005_v54 = vpop.permute.xlu1 %2004 }
0x1340   :  { %5253 = vmatmul.mubr.msk.f32.vlgmr.msra.gmra.mxu1 %vm202_vm2, %v2005_v54 }
0x1341   :  { %5267 = vmatpush3.msra.mxu1 %v5777_v55  ;;  %5274 = vmatprep.mubr.msk.f32.mxu1 %vm5893_vm0, %v5892_v1 }
0x1342   :  { %5268 = vmatprep.subr.mxu1 %v5892_v1 }
0x1343   :  { %5269 = vmatpush3.msra.mxu1 %v5778_v56 }
0x1344   :  { %5270 = vmatprep.subr.mxu1 %v5892_v1 }
0x1345   :  { %5271 = vmatpush3.msra.mxu1 %v5779_v57 }
0x1346   :  { %5272 = vmatprep.subr.mxu1 %v5892_v1 }
0x1347   :  { %5273 = vmatpush3.msra.mxu1 %v5780_v58 }
0x1348   :  { %5288 = vmatprep.subr.mxu1 %v5892_v1 }
0x1349   :  { %v1930_v59 = vpop.permute.xlu0 %1929 }
0x134a   :  { %5242 = vmatmul.mubr.msk.f32.vlgmr.msra.gmra.mxu0 %vm202_vm2, %v1930_v59 }
0x134b   :  { %5256 = vmatpush3.msra.mxu0 %v6314_v34  ;;  %5263 = vmatprep.mubr.msk.f32.mxu0 %vm5893_vm0, %v5892_v1 }
0x134c   :  { %5257 = vmatprep.subr.mxu0 %v5892_v1 }
0x134d   :  { %5258 = vmatpush3.msra.mxu0 %v5781_v60 }
0x134e   :  { %5259 = vmatprep.subr.mxu0 %v5892_v1 }
0x134f   :  { %5260 = vmatpush3.msra.mxu0 %v5782_v61 }
0x1350   :  { %5261 = vmatprep.subr.mxu0 %v5892_v1 }
0x1351   :  { %5262 = vmatpush3.msra.mxu0 %v5783_v20 }
0x1352   :  { %5264 = vmatmul.mubr.msk.f32.vlgmr.msra.gmra.mxu0 %vm202_vm2, %v1930_v59  ;;  %5277 = vmatprep.subr.mxu0 %v5892_v1 }
0x1353   :  { %5278 = vmatpush3.msra.mxu0 %v5784_v63  ;;  %5285 = vmatprep.mubr.msk.f32.mxu0 %vm5893_vm0, %v5892_v1 }
0x1354   :  { %5279 = vmatprep.subr.mxu0 %v5892_v1 }
0x1355   :  { %5280 = vmatpush3.msra.mxu0 %v5785_v62 }
0x1356   :  { %5281 = vmatprep.subr.mxu0 %v5892_v1 }
0x1357   :  { %5282 = vmatpush3.msra.mxu0 %v5786_v0 }
0x1358   :  { %5283 = vmatprep.subr.mxu0 %v5892_v1 }
0x1359   :  { %5284 = vmatpush3.msra.mxu0 %v5787_v3 }
0x135a   :  { %5299 = vmatprep.subr.mxu0 %v5892_v1 }
0x1400   :  { %v2074_v7 = vpop.f32.mrf.mxu1 }
0x1402   :  { %v5254_v8 = vpop.f32.mrf.mxu1 }
0x140a   :  { %v1999_v4 = vpop.f32.mrf.mxu0 }
0x140b   :  { %v2000_v5 = vadd.f32 %v1999_v4, %v6079_v51 }
0x140c   :  { %v5243_v34 = vpop.f32.mrf.mxu0 }
0x140d   :  { %v2078_v9 = vadd.f32 %v2074_v7, %v2000_v5 }
0x140f   :  { %5662 = vtanh.f32 %v2078_v9  ;;  %v2079_v37 = vmul.f32 0.5, %v2078_v9 }
0x1412   :  { %v2167_v11 = vpop.f32.mrf.mxu0 }
0x1413   :  { %v2172_v14 = vrot.slane %v2167_v11, 2 }
0x1414   :  { %v5265_v35 = vpop.f32.mrf.mxu0 }
0x1415   :  { %v2174_v36 = vadd.f32 %v2172_v14, %v5998_v18 }
0x1417   :  { %5664 = vtanh.f32 %v2174_v36  ;;  %v2175_v10 = vmul.f32 0.5, %v2174_v36 }
0x1418   :  { %5666 = vtanh.f32 %v2079_v37 }
0x1419   :  { %5668 = vtanh.f32 %v2175_v10 }
0x141c   :  { %v5663_v38 = vpop.eup %5662 }
0x141d   :  { %2086 = vrot.lane.b32.xlu1 %v5663_v38, %s5894_s0 }
0x1424   :  { %v5665_v40 = vpop.eup %5664 }
0x1425   :  { %2185 = vrot.lane.b32.xlu0 %v5665_v40, %s5894_s0  ;;  %v5667_v19 = vpop.eup %5666 }
0x1426   :  { %v2081_v39 = vmul.f32 0.5, %v5667_v19  ;;  %v5669_v17 = vpop.eup %5668 }
0x1427   :  { %v2177_v18 = vmul.f32 0.5, %v5669_v17  ;;  %v6434_v17 = vld [vmem:[#allocation5 + $0x78] sm:$0xff] }
0x1428   :  { %v2082_v42 = vadd.f32 0.5, %v2081_v39 }
0x1429   :  { %v2178_v6 = vadd.f32 0.5, %v2177_v18  ;;  %v106_v18 = vld [vmem:[#allocation7 + $0x8] sm:$0xff] }
0x142a   :  { %v2084_v25 = vmul.f32 %v2082_v42, %v6344_v32 }
0x142b   :  { %v2183_v22 = vmul.f32 %v2181_v28, %v2178_v6 }
0x148f   :  { %v2087_v21 = vpop.permute.xlu1 %2086 }
0x1490   :  { %v2089_v16 = vmul.f32 %v2087_v21, %v2082_v42  ;;  %v107_v21 = vld [vmem:[#allocation7 + $0x10] sm:$0xff] }
0x1492   :  { %2091 = vrot.lane.b32.xlu1 %v2089_v16, %s5895_s3  ;;  %v6437_v16 = vld [vmem:[#allocation5 + $0x70] sm:$0xff] }
0x1497   :  { %v2186_v24 = vpop.permute.xlu0 %2185 }
0x1498   :  { %v2188_v26 = vmul.f32 %v2186_v24, %v2178_v6 }
0x149a   :  { %2190 = vrot.lane.b32.xlu0 %v2188_v26, %s5895_s3 }
0x1504   :  { %v2092_v27 = vpop.permute.xlu1 %2091 }
0x1505   :  { %v6384_v23 = vadd.f32 %v2092_v27, %v2084_v25  ;;  %v105_v25 = vld [vmem:[#allocation7] sm:$0xff] }
0x1506   :  { %v6451_v27 = vld [vmem:[#allocation5 + $0x60] sm:$0xff] }
0x1507   :  { %5670 = vtanh.f32 %v6384_v23 }
0x150c   :  { %v2191_v29 = vpop.permute.xlu0 %2190 }
0x150d   :  { %v6388_v30 = vadd.f32 %v2191_v29, %v2183_v22 }
0x150f   :  { %5672 = vtanh.f32 %v6388_v30  ;;  %v2532_v36 = vrot.slane %v6388_v30, 6  ;;  %v6458_v30 = vld [vmem:[#allocation2 + $0x40] sm:$0xff] }
0x1514   :  { %v5671_v31 = vpop.eup %5670 }
0x1515   :  { %2097 = vrot.lane.b32.xlu1 %v5671_v31, %s5894_s0 }
0x151c   :  { %v5673_v33 = vpop.eup %5672 }
0x151d   :  { %2196 = vrot.lane.b32.xlu0 %v5673_v33, %s5894_s0  ;;  %v6462_v33 = vld [vmem:[#allocation2 + $0x38] sm:$0xff] }
0x1587   :  { %v2098_v32 = vpop.permute.xlu1 %2097 }
0x1588   :  { %v2100_v41 = vmul.f32 %v2098_v32, %v2082_v42  ;;  %v108_v42 = vld [vmem:[#allocation7 + $0x18] sm:$0xff]  ;;  %v6468_v32 = vld [vmem:[#allocation2 + $0x30] sm:$0xff] }
0x158a   :  { %2277 = vrot.lane.b32.xlu1 %v2100_v41, %s5895_s3  ;;  %v6474_v41 = vld [vmem:[#allocation2 + $0x28] sm:$0xff] }
0x158f   :  { %v2197_v43 = vpop.permute.xlu0 %2196 }
0x1590   :  { %v2199_v45 = vmul.f32 %v2197_v43, %v2178_v6  ;;  %v6441_v6 = vld [vmem:[#allocation5 + $0x68] sm:$0xff] }
0x1592   :  { %v2201_v46 = vrot.slane %v2199_v45, 6  ;;  %v113_v45 = vld [vmem:[%s6890_s5] sm:$0x3] }
0x1594   :  { %2202 = vrot.lane.b32.xlu0 %v2201_v46, %s5895_s3  ;;  %v2377_v46 = vrot.slane %v113_v45, %v118_v15 }
0x15fc   :  { %v2278_v47 = vpop.permute.xlu1 %2277 }
0x15fd   :  { %5286 = vmatmul.mubr.msk.f32.vlgmr.msra.gmra.mxu0 %vm202_vm2, %v2278_v47 }
0x15fe   :  { %5300 = vmatpush3.msra.mxu0 %v6395_v44  ;;  %5307 = vmatprep.mubr.msk.f32.mxu0 %vm5893_vm0, %v5892_v1 }
0x15ff   :  { %5301 = vmatprep.subr.mxu0 %v5892_v1 }
0x1600   :  { %5302 = vmatpush3.msra.mxu0 %v6398_v48 }
0x1601   :  { %5303 = vmatprep.subr.mxu0 %v5892_v1 }
0x1602   :  { %5304 = vmatpush3.msra.mxu0 %v6404_v50 }
0x1603   :  { %5305 = vmatprep.subr.mxu0 %v5892_v1 }
0x1604   :  { %5306 = vmatpush3.msra.mxu0 %v6408_v52 }
0x1605   :  { %5321 = vmatprep.subr.mxu0 %v5892_v1 }
0x1606   :  { %v2203_v53 = vpop.permute.xlu0 %2202 }
0x1607   :  { %5275 = vmatmul.mubr.msk.f32.vlgmr.msra.gmra.mxu1 %vm202_vm2, %v2203_v53  ;;  %5308 = vmatmul.mubr.msk.f32.vlgmr.msra.gmra.mxu0 %vm202_vm2, %v2203_v53 }
0x1608   :  { %5296 = vmatprep.mubr.msk.f32.mxu1 %vm5893_vm0, %v5892_v1  ;;  %5329 = vmatprep.mubr.msk.f32.mxu0 %vm5893_vm0, %v5892_v1 }
0x1609   :  { %5289 = vmatpush3.msra.mxu1 %v108_v42  ;;  %5322 = vmatpush3.msra.mxu0 %v6434_v17 }
0x160a   :  { %5290 = vmatprep.subr.mxu1 %v5892_v1  ;;  %5323 = vmatprep.subr.mxu0 %v5892_v1 }
0x160b   :  { %5291 = vmatpush3.msra.mxu1 %v107_v21  ;;  %5324 = vmatpush3.msra.mxu0 %v6437_v16 }
0x160c   :  { %5292 = vmatprep.subr.mxu1 %v5892_v1  ;;  %5325 = vmatprep.subr.mxu0 %v5892_v1 }
0x160d   :  { %5293 = vmatpush3.msra.mxu1 %v106_v18  ;;  %5326 = vmatpush3.msra.mxu0 %v6441_v6 }
0x160e   :  { %5294 = vmatprep.subr.mxu1 %v5892_v1  ;;  %5327 = vmatprep.subr.mxu0 %v5892_v1 }
0x160f   :  { %5295 = vmatpush3.msra.mxu1 %v105_v25  ;;  %5328 = vmatpush3.msra.mxu0 %v6451_v27 }
0x1610   :  { %5310 = vmatprep.subr.mxu1 %v5892_v1  ;;  %5343 = vmatprep.subr.mxu0 %v5892_v1 }
0x16bd   :  { %v2347_v54 = vpop.f32.mrf.mxu0 }
0x16bf   :  { %v5287_v55 = vpop.f32.mrf.mxu0 }
0x16c7   :  { %v2272_v56 = vpop.f32.mrf.mxu1  ;;  %v2521_v57 = vpop.f32.mrf.mxu0 }
0x16c8   :  { %v2273_v58 = vadd.f32 %v2272_v56, %v6079_v51  ;;  %v2525_v59 = vadd.f32 %v2521_v57, %v5975_v12 }
0x16c9   :  { %v5276_v60 = vpop.f32.mrf.mxu1  ;;  %v5309_v61 = vpop.f32.mrf.mxu0 }
0x16ca   :  { %v2351_v20 = vadd.f32 %v2347_v54, %v2273_v58  ;;  %5674 = vtanh.f32 %v2525_v59  ;;  %v2526_v0 = vmul.f32 0.5, %v2525_v59 }
0x16cc   :  { %5676 = vtanh.f32 %v2351_v20  ;;  %v2352_v3 = vmul.f32 0.5, %v2351_v20 }
0x16cd   :  { %5678 = vtanh.f32 %v2526_v0 }
0x16ce   :  { %5680 = vtanh.f32 %v2352_v3 }
0x16d7   :  { %v5675_v63 = vpop.eup %5674 }
0x16d8   :  { %2536 = vrot.lane.b32.xlu1 %v5675_v63, %s5894_s0 }
0x16d9   :  { %v5677_v62 = vpop.eup %5676 }
0x16da   :  { %2359 = vrot.lane.b32.xlu0 %v5677_v62, %s5894_s0  ;;  %v5679_v7 = vpop.eup %5678 }
0x16db   :  { %v5681_v8 = vpop.eup %5680  ;;  %v2528_v51 = vmul.f32 0.5, %v5679_v7 }
0x16dc   :  { %v2354_v4 = vmul.f32 0.5, %v5681_v8 }
0x16dd   :  { %v2529_v5 = vadd.f32 0.5, %v2528_v51 }
0x16de   :  { %v2355_v11 = vadd.f32 0.5, %v2354_v4 }
0x16df   :  { %v2534_v38 = vmul.f32 %v2532_v36, %v2529_v5 }
0x16e0   :  { %v2357_v10 = vmul.f32 %v2355_v11, %v6384_v23 }
0x174a   :  { %v2537_v34 = vpop.permute.xlu1 %2536 }
0x174b   :  { %v2539_v9 = vmul.f32 %v2537_v34, %v2529_v5 }
0x174c   :  { %v2360_v14 = vpop.permute.xlu0 %2359 }
0x174d   :  { %v2362_v35 = vmul.f32 %v2360_v14, %v2355_v11  ;;  %2541 = vrot.lane.b32.xlu1 %v2539_v9, %s5895_s3 }
0x174f   :  { %2364 = vrot.lane.b32.xlu0 %v2362_v35, %s5895_s3 }
0x17bf   :  { %v2542_v40 = vpop.permute.xlu1 %2541 }
0x17c0   :  { %v6427_v37 = vadd.f32 %v2542_v40, %v2534_v38 }
0x17c1   :  { %v2365_v19 = vpop.permute.xlu0 %2364 }
0x17c2   :  { %5682 = vtanh.f32 %v6427_v37  ;;  %v6431_v39 = vadd.f32 %v2365_v19, %v2357_v10 }
0x17c4   :  { %5684 = vtanh.f32 %v6431_v39 }
0x17cf   :  { %v5683_v24 = vpop.eup %5682 }
0x17d0   :  { %2547 = vrot.lane.b32.xlu1 %v5683_v24, %s5894_s0 }
0x17d1   :  { %v5685_v26 = vpop.eup %5684 }
0x17d2   :  { %2370 = vrot.lane.b32.xlu0 %v5685_v26, %s5894_s0 }
0x1842   :  { %v2548_v23 = vpop.permute.xlu1 %2547 }
0x1843   :  { %v2550_v28 = vmul.f32 %v2548_v23, %v2529_v5 }
0x1844   :  { %v2371_v22 = vpop.permute.xlu0 %2370 }
0x1845   :  { %v2373_v29 = vmul.f32 %v2371_v22, %v2355_v11  ;;  %2552 = vrot.lane.b32.xlu1 %v2550_v28, %s5895_s3 }
0x1847   :  { %2379 = vrot.lane.b32.xlu0 %v2373_v29, %s5895_s3 }
0x18b7   :  { %v2553_v43 = vpop.permute.xlu1 %2552 }
0x18b9   :  { %v2380_v31 = vpop.permute.xlu0 %2379 }
0x18ba   :  { %5297 = vmatmul.mubr.msk.f32.vlgmr.msra.gmra.mxu1 %vm202_vm2, %v2380_v31  ;;  %5330 = vmatmul.mubr.msk.f32.vlgmr.msra.gmra.mxu0 %vm202_vm2, %v2380_v31 }
0x18bb   :  { %5311 = vmatpush3.msra.mxu1 %v6458_v30  ;;  %5318 = vmatprep.mubr.msk.f32.mxu1 %vm5893_vm0, %v5892_v1 }
0x18bc   :  { %5312 = vmatprep.subr.mxu1 %v5892_v1  ;;  %5344 = vmatpush3.msra.mxu0 %v6458_v30 }
0x18bd   :  { %5313 = vmatpush3.msra.mxu1 %v6462_v33  ;;  %5345 = vmatprep.subr.mxu0 %v5892_v1 }
0x18be   :  { %5314 = vmatprep.subr.mxu1 %v5892_v1  ;;  %5346 = vmatpush3.msra.mxu0 %v6462_v33 }
0x18bf   :  { %5315 = vmatpush3.msra.mxu1 %v6468_v32  ;;  %5347 = vmatprep.subr.mxu0 %v5892_v1 }
0x18c0   :  { %5316 = vmatprep.subr.mxu1 %v5892_v1  ;;  %5348 = vmatpush3.msra.mxu0 %v6468_v32 }
0x18c1   :  { %5317 = vmatpush3.msra.mxu1 %v6474_v41  ;;  %5349 = vmatprep.subr.mxu0 %v5892_v1 }
0x18c2   :  { %5319 = vmatmul.mubr.msk.f32.vlgmr.msra.gmra.mxu1 %vm202_vm2, %v2553_v43  ;;  %5332 = vmatprep.subr.mxu1 %v5892_v1 }
0x18c3   :  { %5333 = vmatpush3.msra.mxu1 %v6395_v44  ;;  %5340 = vmatprep.mubr.msk.f32.mxu1 %vm5893_vm0, %v5892_v1 }
0x18c4   :  { %5334 = vmatprep.subr.mxu1 %v5892_v1  ;;  %5350 = vmatpush3.msra.mxu0 %v6474_v41 }
0x18c5   :  { %5335 = vmatpush3.msra.mxu1 %v6398_v48  ;;  %5351 = vmatprep.mubr.msk.f32.mxu0 %vm5893_vm0, %v5892_v1 }
0x18c6   :  { %5336 = vmatprep.subr.mxu1 %v5892_v1  ;;  %5365 = vmatprep.subr.mxu0 %v5892_v1 }
0x18c7   :  { %5337 = vmatpush3.msra.mxu1 %v6404_v50 }
0x18c8   :  { %5338 = vmatprep.subr.mxu1 %v5892_v1 }
0x18c9   :  { %5339 = vmatpush3.msra.mxu1 %v6408_v52 }
0x18ca   :  { %5341 = vmatmul.mubr.msk.f32.vlgmr.msra.gmra.mxu1 %vm202_vm2, %v2553_v43  ;;  %5354 = vmatprep.subr.mxu1 %v5892_v1 }
0x18cb   :  { %5355 = vmatpush3.msra.mxu1 %v6434_v17  ;;  %5362 = vmatprep.mubr.msk.f32.mxu1 %vm5893_vm0, %v5892_v1 }
0x18cc   :  { %5356 = vmatprep.subr.mxu1 %v5892_v1 }
0x18cd   :  { %5357 = vmatpush3.msra.mxu1 %v6437_v16 }
0x18ce   :  { %5358 = vmatprep.subr.mxu1 %v5892_v1 }
0x18cf   :  { %5359 = vmatpush3.msra.mxu1 %v6441_v6 }
0x18d0   :  { %5360 = vmatprep.subr.mxu1 %v5892_v1 }
0x18d1   :  { %5361 = vmatpush3.msra.mxu1 %v6451_v27 }
0x18d2   :  { %5376 = vmatprep.subr.mxu1 %v5892_v1 }
0x197a   :  { %v2449_v47 = vpop.f32.mrf.mxu1  ;;  %v2692_v53 = vpop.f32.mrf.mxu0 }
0x197b   :  { %v2450_v54 = vadd.f32 %v2449_v47, %v2377_v46 }
0x197c   :  { %v5298_v55 = vpop.f32.mrf.mxu1  ;;  %v5331_v56 = vpop.f32.mrf.mxu0 }
0x197d   :  { %2454 = vst.msk [vmem:[#allocation8] sm:$0x3] %vm2453_vm3, %v2450_v54 }
0x1982   :  { %v2622_v57 = vpop.f32.mrf.mxu1 }
0x1983   :  { %v2623_v58 = vadd.f32 %v2622_v57, %v5978_v13 }
0x1984   :  { %v5320_v59 = vpop.f32.mrf.mxu1 }
0x1985   :  { %v2696_v60 = vadd.f32 %v2692_v53, %v2623_v58 }
0x1987   :  { %5686 = vtanh.f32 %v2696_v60  ;;  %v2697_v0 = vmul.f32 0.5, %v2696_v60 }
0x198a   :  { %v2785_v61 = vpop.f32.mrf.mxu1 }
0x198b   :  { %v2789_v20 = vadd.f32 %v2785_v61, %v5975_v12 }
0x198c   :  { %v5342_v63 = vpop.f32.mrf.mxu1 }
0x198d   :  { %5688 = vtanh.f32 %v2789_v20  ;;  %v2790_v3 = vmul.f32 0.5, %v2789_v20 }
0x198e   :  { %5690 = vtanh.f32 %v2697_v0 }
0x198f   :  { %5692 = vtanh.f32 %v2790_v3 }
0x1994   :  { %v5687_v62 = vpop.eup %5686 }
0x1995   :  { %2704 = vrot.lane.b32.xlu1 %v5687_v62, %s5894_s0 }
0x199a   :  { %v5689_v15 = vpop.eup %5688 }
0x199b   :  { %2797 = vrot.lane.b32.xlu0 %v5689_v15, %s5894_s0  ;;  %v5691_v7 = vpop.eup %5690 }
0x199c   :  { %v2699_v8 = vmul.f32 0.5, %v5691_v7  ;;  %v5693_v51 = vpop.eup %5692 }
0x199d   :  { %v2792_v9 = vmul.f32 0.5, %v5693_v51 }
0x199e   :  { %v2700_v4 = vadd.f32 0.5, %v2699_v8 }
0x199f   :  { %v2793_v11 = vadd.f32 0.5, %v2792_v9 }
0x19a0   :  { %v2702_v36 = vmul.f32 %v2700_v4, %v6431_v39 }
0x19a1   :  { %v2795_v10 = vmul.f32 %v2793_v11, %v6427_v37 }
0x1a07   :  { %v2705_v5 = vpop.permute.xlu1 %2704 }
0x1a08   :  { %v2707_v34 = vmul.f32 %v2705_v5, %v2700_v4 }
0x1a0a   :  { %2709 = vrot.lane.b32.xlu1 %v2707_v34, %s5895_s3 }
0x1a0d   :  { %v2798_v14 = vpop.permute.xlu0 %2797 }
0x1a0e   :  { %v2800_v35 = vmul.f32 %v2798_v14, %v2793_v11 }
0x1a10   :  { %2802 = vrot.lane.b32.xlu0 %v2800_v35, %s5895_s3 }
0x1a7c   :  { %v2710_v38 = vpop.permute.xlu1 %2709 }
0x1a7d   :  { %v6522_v40 = vadd.f32 %v2710_v38, %v2702_v36 }
0x1a7f   :  { %5694 = vtanh.f32 %v6522_v40 }
0x1a82   :  { %v2803_v19 = vpop.permute.xlu0 %2802 }
0x1a83   :  { %v6526_v42 = vadd.f32 %v2803_v19, %v2795_v10 }
0x1a85   :  { %5696 = vtanh.f32 %v6526_v42 }
0x1a8c   :  { %v5695_v21 = vpop.eup %5694 }
0x1a8d   :  { %2715 = vrot.lane.b32.xlu1 %v5695_v21, %s5894_s0 }
0x1a92   :  { %v5697_v18 = vpop.eup %5696 }
0x1a93   :  { %2808 = vrot.lane.b32.xlu0 %v5697_v18, %s5894_s0 }
0x1aff   :  { %v2716_v24 = vpop.permute.xlu1 %2715 }
0x1b00   :  { %v6531_v39 = vmul.f32 %v2716_v24, %v2700_v4 }
0x1b02   :  { %2888 = vrot.lane.b32.xlu1 %v6531_v39, %s5895_s3 }
0x1b05   :  { %v2809_v26 = vpop.permute.xlu0 %2808 }
0x1b06   :  { %v2811_v25 = vmul.f32 %v2809_v26, %v2793_v11 }
0x1b08   :  { %2813 = vrot.lane.b32.xlu0 %v2811_v25, %s5895_s3 }
0x1b74   :  { %v2889_v37 = vpop.permute.xlu1 %2888 }
0x1b75   :  { %5363 = vmatmul.mubr.msk.f32.vlgmr.msra.gmra.mxu1 %vm202_vm2, %v2889_v37 }
0x1b76   :  { %5377 = vmatpush3.msra.mxu1 %v6458_v30  ;;  %5384 = vmatprep.mubr.msk.f32.mxu1 %vm5893_vm0, %v5892_v1 }
0x1b77   :  { %5378 = vmatprep.subr.mxu1 %v5892_v1 }
0x1b78   :  { %5379 = vmatpush3.msra.mxu1 %v6462_v33 }
0x1b79   :  { %5380 = vmatprep.subr.mxu1 %v5892_v1 }
0x1b7a   :  { %v2814_v23 = vpop.permute.xlu0 %2813  ;;  %5381 = vmatpush3.msra.mxu1 %v6468_v32 }
0x1b7b   :  { %5352 = vmatmul.mubr.msk.f32.vlgmr.msra.gmra.mxu0 %vm202_vm2, %v2814_v23  ;;  %5382 = vmatprep.subr.mxu1 %v5892_v1 }
0x1b7c   :  { %5366 = vmatpush3.msra.mxu0 %v6395_v44  ;;  %5373 = vmatprep.mubr.msk.f32.mxu0 %vm5893_vm0, %v5892_v1 }
0x1b7d   :  { %5367 = vmatprep.subr.mxu0 %v5892_v1  ;;  %5383 = vmatpush3.msra.mxu1 %v6474_v41 }
0x1b7e   :  { %5368 = vmatpush3.msra.mxu0 %v6398_v48  ;;  %5398 = vmatprep.subr.mxu1 %v5892_v1 }
0x1b7f   :  { %5369 = vmatprep.subr.mxu0 %v5892_v1 }
0x1b80   :  { %5370 = vmatpush3.msra.mxu0 %v6404_v50 }
0x1b81   :  { %5371 = vmatprep.subr.mxu0 %v5892_v1 }
0x1b82   :  { %5372 = vmatpush3.msra.mxu0 %v6408_v52 }
0x1b83   :  { %5374 = vmatmul.mubr.msk.f32.vlgmr.msra.gmra.mxu0 %vm202_vm2, %v2814_v23  ;;  %5387 = vmatprep.subr.mxu0 %v5892_v1 }
0x1b84   :  { %5388 = vmatpush3.msra.mxu0 %v6434_v17  ;;  %5395 = vmatprep.mubr.msk.f32.mxu0 %vm5893_vm0, %v5892_v1 }
0x1b85   :  { %5389 = vmatprep.subr.mxu0 %v5892_v1 }
0x1b86   :  { %5390 = vmatpush3.msra.mxu0 %v6437_v16 }
0x1b87   :  { %5391 = vmatprep.subr.mxu0 %v5892_v1 }
0x1b88   :  { %5392 = vmatpush3.msra.mxu0 %v6441_v6 }
0x1b89   :  { %5393 = vmatprep.subr.mxu0 %v5892_v1 }
0x1b8a   :  { %5394 = vmatpush3.msra.mxu0 %v6451_v27 }
0x1b8b   :  { %5409 = vmatprep.subr.mxu0 %v5892_v1 }
0x1c35   :  { %v2958_v28 = vpop.f32.mrf.mxu1 }
0x1c37   :  { %v5364_v22 = vpop.f32.mrf.mxu1 }
0x1c3b   :  { %v2883_v29 = vpop.f32.mrf.mxu0 }
0x1c3c   :  { %v2884_v31 = vadd.f32 %v2883_v29, %v5978_v13 }
0x1c3d   :  { %v5353_v43 = vpop.f32.mrf.mxu0 }
0x1c3e   :  { %v2962_v45 = vadd.f32 %v2958_v28, %v2884_v31 }
0x1c40   :  { %5698 = vtanh.f32 %v2962_v45  ;;  %v2963_v56 = vmul.f32 0.5, %v2962_v45 }
0x1c43   :  { %v3051_v46 = vpop.f32.mrf.mxu0 }
0x1c44   :  { %v3055_v47 = vadd.f32 %v3051_v46, %v5975_v12 }
0x1c45   :  { %v5375_v53 = vpop.f32.mrf.mxu0 }
0x1c46   :  { %5700 = vtanh.f32 %v3055_v47  ;;  %v3056_v57 = vmul.f32 0.5, %v3055_v47 }
0x1c47   :  { %5702 = vtanh.f32 %v2963_v56 }
0x1c48   :  { %5704 = vtanh.f32 %v3056_v57 }
0x1c4d   :  { %v5699_v54 = vpop.eup %5698 }
0x1c4e   :  { %2970 = vrot.lane.b32.xlu1 %v5699_v54, %s5894_s0 }
0x1c53   :  { %v5701_v55 = vpop.eup %5700 }
0x1c54   :  { %3063 = vrot.lane.b32.xlu0 %v5701_v55, %s5894_s0  ;;  %v5703_v58 = vpop.eup %5702 }
0x1c55   :  { %v2965_v59 = vmul.f32 0.5, %v5703_v58  ;;  %v5705_v60 = vpop.eup %5704 }
0x1c56   :  { %v3058_v62 = vmul.f32 0.5, %v5705_v60 }
0x1c57   :  { %v2966_v61 = vadd.f32 0.5, %v2965_v59 }
0x1c58   :  { %v3059_v15 = vadd.f32 0.5, %v3058_v62 }
0x1c59   :  { %v2968_v7 = vmul.f32 %v2966_v61, %v6522_v40 }
0x1c5a   :  { %v3061_v4 = vmul.f32 %v3059_v15, %v6526_v42 }
0x1cc0   :  { %v2971_v20 = vpop.permute.xlu1 %2970 }
0x1cc1   :  { %v2973_v63 = vmul.f32 %v2971_v20, %v2966_v61 }
0x1cc3   :  { %2975 = vrot.lane.b32.xlu1 %v2973_v63, %s5895_s3 }
0x1cc6   :  { %v3064_v0 = vpop.permute.xlu0 %3063 }
0x1cc7   :  { %v3066_v3 = vmul.f32 %v3064_v0, %v3059_v15 }
0x1cc9   :  { %3068 = vrot.lane.b32.xlu0 %v3066_v3, %s5895_s3 }
0x1d35   :  { %v2976_v8 = vpop.permute.xlu1 %2975 }
0x1d36   :  { %v6576_v51 = vadd.f32 %v2976_v8, %v2968_v7 }
0x1d38   :  { %5706 = vtanh.f32 %v6576_v51 }
0x1d3b   :  { %v3069_v5 = vpop.permute.xlu0 %3068 }
0x1d3c   :  { %v6580_v34 = vadd.f32 %v3069_v5, %v3061_v4 }
0x1d3e   :  { %5708 = vtanh.f32 %v6580_v34 }
0x1d45   :  { %v5707_v9 = vpop.eup %5706 }
0x1d46   :  { %2981 = vrot.lane.b32.xlu1 %v5707_v9, %s5894_s0 }
0x1d4b   :  { %v5709_v11 = vpop.eup %5708 }
0x1d4c   :  { %3074 = vrot.lane.b32.xlu0 %v5709_v11, %s5894_s0 }
0x1db8   :  { %v2982_v14 = vpop.permute.xlu1 %2981 }
0x1db9   :  { %v6585_v35 = vmul.f32 %v2982_v14, %v2966_v61 }
0x1dbb   :  { %3154 = vrot.lane.b32.xlu1 %v6585_v35, %s5895_s3  ;;  %v4581_v3 = vrot.slane %v6585_v35, 6 }
0x1dbd   :  { %v4595_v4 = vsel %vm4594_vm4, %v6531_v39, %v4581_v3 }
0x1dbe   :  { %v3075_v36 = vpop.permute.xlu0 %3074 }
0x1dbf   :  { %v3077_v38 = vmul.f32 %v3075_v36, %v3059_v15 }
0x1dc1   :  { %3079 = vrot.lane.b32.xlu0 %v3077_v38, %s5895_s3 }
0x1e2d   :  { %v3155_v40 = vpop.permute.xlu1 %3154 }
0x1e2e   :  { %5396 = vmatmul.mubr.msk.f32.vlgmr.msra.gmra.mxu0 %vm202_vm2, %v3155_v40 }
0x1e2f   :  { %5410 = vmatpush3.msra.mxu0 %v6458_v30  ;;  %5417 = vmatprep.mubr.msk.f32.mxu0 %vm5893_vm0, %v5892_v1 }
0x1e30   :  { %5411 = vmatprep.subr.mxu0 %v5892_v1 }
0x1e31   :  { %5412 = vmatpush3.msra.mxu0 %v6462_v33 }
0x1e32   :  { %5413 = vmatprep.subr.mxu0 %v5892_v1 }
0x1e33   :  { %v3080_v10 = vpop.permute.xlu0 %3079  ;;  %5414 = vmatpush3.msra.mxu0 %v6468_v32 }
0x1e34   :  { %5385 = vmatmul.mubr.msk.f32.vlgmr.msra.gmra.mxu1 %vm202_vm2, %v3080_v10  ;;  %5415 = vmatprep.subr.mxu0 %v5892_v1 }
0x1e35   :  { %5399 = vmatpush3.msra.mxu1 %v6395_v44  ;;  %5406 = vmatprep.mubr.msk.f32.mxu1 %vm5893_vm0, %v5892_v1 }
0x1e36   :  { %5400 = vmatprep.subr.mxu1 %v5892_v1  ;;  %5416 = vmatpush3.msra.mxu0 %v6474_v41 }
0x1e37   :  { %5401 = vmatpush3.msra.mxu1 %v6398_v48  ;;  %5431 = vmatprep.subr.mxu0 %v5892_v1 }
0x1e38   :  { %5402 = vmatprep.subr.mxu1 %v5892_v1 }
0x1e39   :  { %5403 = vmatpush3.msra.mxu1 %v6404_v50 }
0x1e3a   :  { %5404 = vmatprep.subr.mxu1 %v5892_v1 }
0x1e3b   :  { %5405 = vmatpush3.msra.mxu1 %v6408_v52 }
0x1e3c   :  { %5407 = vmatmul.mubr.msk.f32.vlgmr.msra.gmra.mxu1 %vm202_vm2, %v3080_v10  ;;  %5420 = vmatprep.subr.mxu1 %v5892_v1 }
0x1e3d   :  { %5421 = vmatpush3.msra.mxu1 %v6434_v17  ;;  %5428 = vmatprep.mubr.msk.f32.mxu1 %vm5893_vm0, %v5892_v1 }
0x1e3e   :  { %5422 = vmatprep.subr.mxu1 %v5892_v1 }
0x1e3f   :  { %5423 = vmatpush3.msra.mxu1 %v6437_v16 }
0x1e40   :  { %5424 = vmatprep.subr.mxu1 %v5892_v1 }
0x1e41   :  { %5425 = vmatpush3.msra.mxu1 %v6441_v6 }
0x1e42   :  { %5426 = vmatprep.subr.mxu1 %v5892_v1 }
0x1e43   :  { %5427 = vmatpush3.msra.mxu1 %v6451_v27 }
0x1e44   :  { %5442 = vmatprep.subr.mxu1 %v5892_v1 }
0x1eee   :  { %v3224_v19 = vpop.f32.mrf.mxu0 }
0x1ef0   :  { %v5397_v42 = vpop.f32.mrf.mxu0 }
0x1ef4   :  { %v3149_v21 = vpop.f32.mrf.mxu1 }
0x1ef5   :  { %v3150_v18 = vadd.f32 %v3149_v21, %v5978_v13 }
0x1ef6   :  { %v5386_v24 = vpop.f32.mrf.mxu1 }
0x1ef7   :  { %v3228_v26 = vadd.f32 %v3224_v19, %v3150_v18 }
0x1ef9   :  { %5710 = vtanh.f32 %v3228_v26  ;;  %v3229_v29 = vmul.f32 0.5, %v3228_v26 }
0x1efc   :  { %v3317_v25 = vpop.f32.mrf.mxu1 }
0x1efd   :  { %v3321_v37 = vadd.f32 %v3317_v25, %v5975_v12 }
0x1efe   :  { %v5408_v23 = vpop.f32.mrf.mxu1 }
0x1eff   :  { %5712 = vtanh.f32 %v3321_v37  ;;  %v3322_v31 = vmul.f32 0.5, %v3321_v37 }
0x1f00   :  { %5714 = vtanh.f32 %v3229_v29 }
0x1f01   :  { %5716 = vtanh.f32 %v3322_v31 }
0x1f06   :  { %v5711_v28 = vpop.eup %5710 }
0x1f07   :  { %3236 = vrot.lane.b32.xlu1 %v5711_v28, %s5894_s0 }
0x1f0c   :  { %v5713_v22 = vpop.eup %5712 }
0x1f0d   :  { %3329 = vrot.lane.b32.xlu0 %v5713_v22, %s5894_s0  ;;  %v5715_v43 = vpop.eup %5714 }
0x1f0e   :  { %v3231_v45 = vmul.f32 0.5, %v5715_v43  ;;  %v5717_v46 = vpop.eup %5716 }
0x1f0f   :  { %v3324_v55 = vmul.f32 0.5, %v5717_v46 }
0x1f10   :  { %v3232_v47 = vadd.f32 0.5, %v3231_v45 }
0x1f11   :  { %v3325_v56 = vadd.f32 0.5, %v3324_v55 }
0x1f12   :  { %v3234_v59 = vmul.f32 %v3232_v47, %v6576_v51 }
0x1f13   :  { %v3327_v20 = vmul.f32 %v3325_v56, %v6580_v34 }
0x1f79   :  { %v3237_v53 = vpop.permute.xlu1 %3236 }
0x1f7a   :  { %v3239_v54 = vmul.f32 %v3237_v53, %v3232_v47 }
0x1f7c   :  { %3241 = vrot.lane.b32.xlu1 %v3239_v54, %s5895_s3 }
0x1f7f   :  { %v3330_v57 = vpop.permute.xlu0 %3329 }
0x1f80   :  { %v3332_v58 = vmul.f32 %v3330_v57, %v3325_v56 }
0x1f82   :  { %3334 = vrot.lane.b32.xlu0 %v3332_v58, %s5895_s3 }
0x1fee   :  { %v3242_v60 = vpop.permute.xlu1 %3241 }
0x1fef   :  { %v6630_v61 = vadd.f32 %v3242_v60, %v3234_v59 }
0x1ff1   :  { %5718 = vtanh.f32 %v6630_v61 }
0x1ff4   :  { %v3335_v63 = vpop.permute.xlu0 %3334 }
0x1ff5   :  { %v6634_v62 = vadd.f32 %v3335_v63, %v3327_v20 }
0x1ff7   :  { %5720 = vtanh.f32 %v6634_v62 }
0x1ffe   :  { %v5719_v15 = vpop.eup %5718 }
0x1fff   :  { %3247 = vrot.lane.b32.xlu1 %v5719_v15, %s5894_s0 }
0x2004   :  { %v5721_v0 = vpop.eup %5720 }
0x2005   :  { %3340 = vrot.lane.b32.xlu0 %v5721_v0, %s5894_s0 }
0x2071   :  { %v3248_v7 = vpop.permute.xlu1 %3247 }
0x2072   :  { %v3250_v8 = vmul.f32 %v3248_v7, %v3232_v47 }
0x2074   :  { %v4583_v51 = vrot.slane %v3250_v8, 4  ;;  %3420 = vrot.lane.b32.xlu1 %v3250_v8, %s5895_s3 }
0x2076   :  { %v6644_v5 = vsel %vm4596_vm5, %v4595_v4, %v4583_v51 }
0x2077   :  { %v3341_v34 = vpop.permute.xlu0 %3340 }
0x2078   :  { %v3343_v9 = vmul.f32 %v3341_v34, %v3325_v56 }
0x207a   :  { %3345 = vrot.lane.b32.xlu0 %v3343_v9, %s5895_s3 }
0x20e6   :  { %v3421_v11 = vpop.permute.xlu1 %3420 }
0x20e7   :  { %5429 = vmatmul.mubr.msk.f32.vlgmr.msra.gmra.mxu1 %vm202_vm2, %v3421_v11 }
0x20e8   :  { %5443 = vmatpush3.msra.mxu1 %v6458_v30  ;;  %5450 = vmatprep.mubr.msk.f32.mxu1 %vm5893_vm0, %v5892_v1 }
0x20e9   :  { %5444 = vmatprep.subr.mxu1 %v5892_v1 }
0x20ea   :  { %5445 = vmatpush3.msra.mxu1 %v6462_v33 }
0x20eb   :  { %5446 = vmatprep.subr.mxu1 %v5892_v1 }
0x20ec   :  { %v3346_v39 = vpop.permute.xlu0 %3345  ;;  %5447 = vmatpush3.msra.mxu1 %v6468_v32 }
0x20ed   :  { %5418 = vmatmul.mubr.msk.f32.vlgmr.msra.gmra.mxu0 %vm202_vm2, %v3346_v39  ;;  %5448 = vmatprep.subr.mxu1 %v5892_v1 }
0x20ee   :  { %5432 = vmatpush3.msra.mxu0 %v6395_v44  ;;  %5439 = vmatprep.mubr.msk.f32.mxu0 %vm5893_vm0, %v5892_v1 }
0x20ef   :  { %5433 = vmatprep.subr.mxu0 %v5892_v1  ;;  %5449 = vmatpush3.msra.mxu1 %v6474_v41 }
0x20f0   :  { %5434 = vmatpush3.msra.mxu0 %v6398_v48  ;;  %5464 = vmatprep.subr.mxu1 %v5892_v1 }
0x20f1   :  { %5435 = vmatprep.subr.mxu0 %v5892_v1 }
0x20f2   :  { %5436 = vmatpush3.msra.mxu0 %v6404_v50 }
0x20f3   :  { %5437 = vmatprep.subr.mxu0 %v5892_v1 }
0x20f4   :  { %5438 = vmatpush3.msra.mxu0 %v6408_v52 }
0x20f5   :  { %5440 = vmatmul.mubr.msk.f32.vlgmr.msra.gmra.mxu0 %vm202_vm2, %v3346_v39  ;;  %5453 = vmatprep.subr.mxu0 %v5892_v1 }
0x20f6   :  { %5454 = vmatpush3.msra.mxu0 %v6434_v17  ;;  %5461 = vmatprep.mubr.msk.f32.mxu0 %vm5893_vm0, %v5892_v1 }
0x20f7   :  { %5455 = vmatprep.subr.mxu0 %v5892_v1 }
0x20f8   :  { %5456 = vmatpush3.msra.mxu0 %v6437_v16 }
0x20f9   :  { %5457 = vmatprep.subr.mxu0 %v5892_v1 }
0x20fa   :  { %5458 = vmatpush3.msra.mxu0 %v6441_v6 }
0x20fb   :  { %5459 = vmatprep.subr.mxu0 %v5892_v1 }
0x20fc   :  { %5460 = vmatpush3.msra.mxu0 %v6451_v27 }
0x20fd   :  { %5475 = vmatprep.subr.mxu0 %v5892_v1 }
0x21a7   :  { %v3490_v14 = vpop.f32.mrf.mxu1 }
0x21a9   :  { %v5430_v35 = vpop.f32.mrf.mxu1 }
0x21ad   :  { %v3415_v36 = vpop.f32.mrf.mxu0 }
0x21ae   :  { %v3416_v38 = vadd.f32 %v3415_v36, %v5978_v13 }
0x21af   :  { %v5419_v40 = vpop.f32.mrf.mxu0 }
0x21b0   :  { %v3494_v10 = vadd.f32 %v3490_v14, %v3416_v38 }
0x21b2   :  { %5722 = vtanh.f32 %v3494_v10  ;;  %v3495_v26 = vmul.f32 0.5, %v3494_v10 }
0x21b5   :  { %v3583_v19 = vpop.f32.mrf.mxu0 }
0x21b6   :  { %v3587_v42 = vadd.f32 %v3583_v19, %v5975_v12 }
0x21b7   :  { %v5441_v21 = vpop.f32.mrf.mxu0 }
0x21b8   :  { %5724 = vtanh.f32 %v3587_v42  ;;  %v3588_v25 = vmul.f32 0.5, %v3587_v42 }
0x21b9   :  { %5726 = vtanh.f32 %v3495_v26 }
0x21ba   :  { %5728 = vtanh.f32 %v3588_v25 }
0x21bf   :  { %v5723_v18 = vpop.eup %5722 }
0x21c0   :  { %3502 = vrot.lane.b32.xlu1 %v5723_v18, %s5894_s0 }
0x21c5   :  { %v5725_v24 = vpop.eup %5724 }
0x21c6   :  { %3595 = vrot.lane.b32.xlu0 %v5725_v24, %s5894_s0  ;;  %v5727_v37 = vpop.eup %5726 }
0x21c7   :  { %v3497_v23 = vmul.f32 0.5, %v5727_v37  ;;  %v5729_v28 = vpop.eup %5728 }
0x21c8   :  { %v3590_v43 = vmul.f32 0.5, %v5729_v28 }
0x21c9   :  { %v3498_v22 = vadd.f32 0.5, %v3497_v23 }
0x21ca   :  { %v3591_v45 = vadd.f32 0.5, %v3590_v43 }
0x21cb   :  { %v3500_v53 = vmul.f32 %v3498_v22, %v6630_v61 }
0x21cc   :  { %v3593_v56 = vmul.f32 %v3591_v45, %v6634_v62 }
0x2232   :  { %v3503_v29 = vpop.permute.xlu1 %3502 }
0x2233   :  { %v3505_v31 = vmul.f32 %v3503_v29, %v3498_v22 }
0x2235   :  { %3507 = vrot.lane.b32.xlu1 %v3505_v31, %s5895_s3 }
0x2238   :  { %v3596_v46 = vpop.permute.xlu0 %3595 }
0x2239   :  { %v3598_v47 = vmul.f32 %v3596_v46, %v3591_v45 }
0x223b   :  { %3600 = vrot.lane.b32.xlu0 %v3598_v47, %s5895_s3 }
0x22a7   :  { %v3508_v54 = vpop.permute.xlu1 %3507 }
0x22a8   :  { %v6687_v55 = vadd.f32 %v3508_v54, %v3500_v53 }
0x22aa   :  { %5730 = vtanh.f32 %v6687_v55 }
0x22ad   :  { %v3601_v57 = vpop.permute.xlu0 %3600 }
0x22ae   :  { %v6691_v58 = vadd.f32 %v3601_v57, %v3593_v56 }
0x22b0   :  { %5732 = vtanh.f32 %v6691_v58 }
0x22b7   :  { %v5731_v59 = vpop.eup %5730 }
0x22b8   :  { %3513 = vrot.lane.b32.xlu1 %v5731_v59, %s5894_s0 }
0x22bd   :  { %v5733_v60 = vpop.eup %5732 }
0x22be   :  { %3606 = vrot.lane.b32.xlu0 %v5733_v60, %s5894_s0 }
0x232a   :  { %v3514_v20 = vpop.permute.xlu1 %3513 }
0x232b   :  { %v3516_v61 = vmul.f32 %v3514_v20, %v3498_v22 }
0x232d   :  { %v4585_v63 = vrot.slane %v3516_v61, 2  ;;  %3686 = vrot.lane.b32.xlu1 %v3516_v61, %s5895_s3 }
0x232f   :  { %v6699_v62 = vsel %vm4598_vm6, %v6644_v5, %v4585_v63 }
0x2330   :  { %v3607_v15 = vpop.permute.xlu0 %3606 }
0x2331   :  { %v3609_v0 = vmul.f32 %v3607_v15, %v3591_v45 }
0x2333   :  { %3611 = vrot.lane.b32.xlu0 %v3609_v0, %s5895_s3 }
0x239f   :  { %v3687_v3 = vpop.permute.xlu1 %3686 }
0x23a0   :  { %5462 = vmatmul.mubr.msk.f32.vlgmr.msra.gmra.mxu0 %vm202_vm2, %v3687_v3 }
0x23a1   :  { %5476 = vmatpush3.msra.mxu0 %v6458_v30  ;;  %5483 = vmatprep.mubr.msk.f32.mxu0 %vm5893_vm0, %v5892_v1 }
0x23a2   :  { %5477 = vmatprep.subr.mxu0 %v5892_v1 }
0x23a3   :  { %5478 = vmatpush3.msra.mxu0 %v6462_v33 }
0x23a4   :  { %5479 = vmatprep.subr.mxu0 %v5892_v1 }
0x23a5   :  { %v3612_v7 = vpop.permute.xlu0 %3611  ;;  %5480 = vmatpush3.msra.mxu0 %v6468_v32 }
0x23a6   :  { %5451 = vmatmul.mubr.msk.f32.vlgmr.msra.gmra.mxu1 %vm202_vm2, %v3612_v7  ;;  %5481 = vmatprep.subr.mxu0 %v5892_v1 }
0x23a7   :  { %5465 = vmatpush3.msra.mxu1 %v6395_v44  ;;  %5472 = vmatprep.mubr.msk.f32.mxu1 %vm5893_vm0, %v5892_v1 }
0x23a8   :  { %5466 = vmatprep.subr.mxu1 %v5892_v1  ;;  %5482 = vmatpush3.msra.mxu0 %v6474_v41 }
0x23a9   :  { %5467 = vmatpush3.msra.mxu1 %v6398_v48  ;;  %5497 = vmatprep.subr.mxu0 %v5892_v1 }
0x23aa   :  { %5468 = vmatprep.subr.mxu1 %v5892_v1 }
0x23ab   :  { %5469 = vmatpush3.msra.mxu1 %v6404_v50 }
0x23ac   :  { %5470 = vmatprep.subr.mxu1 %v5892_v1 }
0x23ad   :  { %5471 = vmatpush3.msra.mxu1 %v6408_v52 }
0x23ae   :  { %5473 = vmatmul.mubr.msk.f32.vlgmr.msra.gmra.mxu1 %vm202_vm2, %v3612_v7  ;;  %5486 = vmatprep.subr.mxu1 %v5892_v1 }
0x23af   :  { %5487 = vmatpush3.msra.mxu1 %v6434_v17  ;;  %5494 = vmatprep.mubr.msk.f32.mxu1 %vm5893_vm0, %v5892_v1 }
0x23b0   :  { %5488 = vmatprep.subr.mxu1 %v5892_v1 }
0x23b1   :  { %5489 = vmatpush3.msra.mxu1 %v6437_v16 }
0x23b2   :  { %5490 = vmatprep.subr.mxu1 %v5892_v1 }
0x23b3   :  { %5491 = vmatpush3.msra.mxu1 %v6441_v6 }
0x23b4   :  { %5492 = vmatprep.subr.mxu1 %v5892_v1 }
0x23b5   :  { %5493 = vmatpush3.msra.mxu1 %v6451_v27 }
0x23b6   :  { %5508 = vmatprep.subr.mxu1 %v5892_v1 }
0x2460   :  { %v3756_v44 = vpop.f32.mrf.mxu0 }
0x2462   :  { %v5463_v48 = vpop.f32.mrf.mxu0 }
0x2466   :  { %v3681_v50 = vpop.f32.mrf.mxu1 }
0x2467   :  { %v3682_v52 = vadd.f32 %v3681_v50, %v5978_v13 }
0x2468   :  { %v5452_v8 = vpop.f32.mrf.mxu1 }
0x2469   :  { %v3760_v51 = vadd.f32 %v3756_v44, %v3682_v52 }
0x246b   :  { %5734 = vtanh.f32 %v3760_v51  ;;  %v3761_v39 = vmul.f32 0.5, %v3760_v51 }
0x246e   :  { %v3849_v4 = vpop.f32.mrf.mxu1 }
0x246f   :  { %v3853_v5 = vadd.f32 %v3849_v4, %v5975_v12 }
0x2470   :  { %v5474_v34 = vpop.f32.mrf.mxu1 }
0x2471   :  { %5736 = vtanh.f32 %v3853_v5  ;;  %v3854_v14 = vmul.f32 0.5, %v3853_v5 }
0x2472   :  { %5738 = vtanh.f32 %v3761_v39 }
0x2473   :  { %5740 = vtanh.f32 %v3854_v14 }
0x2478   :  { %v5735_v9 = vpop.eup %5734 }
0x2479   :  { %3768 = vrot.lane.b32.xlu1 %v5735_v9, %s5894_s0 }
0x247e   :  { %v5737_v11 = vpop.eup %5736 }
0x247f   :  { %3861 = vrot.lane.b32.xlu0 %v5737_v11, %s5894_s0  ;;  %v5739_v35 = vpop.eup %5738 }
0x2480   :  { %v3763_v36 = vmul.f32 0.5, %v5739_v35  ;;  %v5741_v38 = vpop.eup %5740 }
0x2481   :  { %v3856_v42 = vmul.f32 0.5, %v5741_v38 }
0x2482   :  { %v3764_v40 = vadd.f32 0.5, %v3763_v36 }
0x2483   :  { %v3857_v21 = vadd.f32 0.5, %v3856_v42  ;;  %v5792_v42 = vld [vmem:[#allocation2 + $0x40] sm:$0xff] }
0x2484   :  { %v3766_v26 = vmul.f32 %v3764_v40, %v6687_v55  ;;  %v6766_v55 = vld [vmem:[#allocation5 + $0x58] sm:$0xff] }
0x2485   :  { %v3859_v23 = vmul.f32 %v3857_v21, %v6691_v58 }
0x24eb   :  { %v3769_v10 = vpop.permute.xlu1 %3768 }
0x24ec   :  { %v3771_v19 = vmul.f32 %v3769_v10, %v3764_v40 }
0x24ee   :  { %3773 = vrot.lane.b32.xlu1 %v3771_v19, %s5895_s3 }
0x24f1   :  { %v3862_v18 = vpop.permute.xlu0 %3861 }
0x24f2   :  { %v3864_v24 = vmul.f32 %v3862_v18, %v3857_v21 }
0x24f4   :  { %3866 = vrot.lane.b32.xlu0 %v3864_v24, %s5895_s3  ;;  %v5794_v24 = vld [vmem:[#allocation2 + $0x30] sm:$0xff] }
0x2560   :  { %v3774_v25 = vpop.permute.xlu1 %3773 }
0x2561   :  { %v6742_v37 = vadd.f32 %v3774_v25, %v3766_v26  ;;  %v5795_v26 = vld [vmem:[#allocation2 + $0x28] sm:$0xff]  ;;  %v5796_v25 = vld [vmem:[#allocation5 + $0x78] sm:$0xff] }
0x2563   :  { %5742 = vtanh.f32 %v6742_v37 }
0x2566   :  { %v3867_v28 = vpop.permute.xlu0 %3866 }
0x2567   :  { %v6746_v22 = vadd.f32 %v3867_v28, %v3859_v23  ;;  %v5798_v23 = vld [vmem:[#allocation5 + $0x68] sm:$0xff]  ;;  %v5799_v28 = vld [vmem:[#allocation5 + $0x60] sm:$0xff] }
0x2569   :  { %5744 = vtanh.f32 %v6746_v22 }
0x2570   :  { %v5743_v29 = vpop.eup %5742 }
0x2571   :  { %3779 = vrot.lane.b32.xlu1 %v5743_v29, %s5894_s0 }
0x2576   :  { %v5745_v31 = vpop.eup %5744 }
0x2577   :  { %3872 = vrot.lane.b32.xlu0 %v5745_v31, %s5894_s0 }
0x25e3   :  { %v3780_v43 = vpop.permute.xlu1 %3779 }
0x25e4   :  { %v6751_v45 = vmul.f32 %v3780_v43, %v3764_v40 }
0x25e6   :  { %3952 = vrot.lane.b32.xlu1 %v6751_v45, %s5895_s3 }
0x25e9   :  { %v3873_v46 = vpop.permute.xlu0 %3872 }
0x25ea   :  { %v3875_v47 = vmul.f32 %v3873_v46, %v3857_v21  ;;  %v5793_v21 = vld [vmem:[#allocation2 + $0x38] sm:$0xff] }
0x25ec   :  { %3877 = vrot.lane.b32.xlu0 %v3875_v47, %s5895_s3 }
0x2658   :  { %v3953_v53 = vpop.permute.xlu1 %3952 }
0x2659   :  { %5495 = vmatmul.mubr.msk.f32.vlgmr.msra.gmra.mxu1 %vm202_vm2, %v3953_v53 }
0x265a   :  { %5509 = vmatpush3.msra.mxu1 %v6458_v30  ;;  %5516 = vmatprep.mubr.msk.f32.mxu1 %vm5893_vm0, %v5892_v1  ;;  %v6773_v30 = vld [vmem:[#allocation5 + $0x50] sm:$0xff] }
0x265b   :  { %5510 = vmatprep.subr.mxu1 %v5892_v1 }
0x265c   :  { %5511 = vmatpush3.msra.mxu1 %v6462_v33  ;;  %v6778_v33 = vld [vmem:[#allocation5 + $0x48] sm:$0xff] }
0x265d   :  { %5512 = vmatprep.subr.mxu1 %v5892_v1 }
0x265e   :  { %v3878_v54 = vpop.permute.xlu0 %3877  ;;  %5513 = vmatpush3.msra.mxu1 %v6468_v32  ;;  %v6782_v32 = vld [vmem:[#allocation5 + $0x40] sm:$0xff] }
0x265f   :  { %5484 = vmatmul.mubr.msk.f32.vlgmr.msra.gmra.mxu0 %vm202_vm2, %v3878_v54  ;;  %5514 = vmatprep.subr.mxu1 %v5892_v1 }
0x2660   :  { %5498 = vmatpush3.msra.mxu0 %v6766_v55  ;;  %5505 = vmatprep.mubr.msk.f32.mxu0 %vm5893_vm0, %v5892_v1 }
0x2661   :  { %5499 = vmatprep.subr.mxu0 %v5892_v1  ;;  %5515 = vmatpush3.msra.mxu1 %v6474_v41 }
0x2662   :  { %5500 = vmatpush3.msra.mxu0 %v6773_v30  ;;  %5530 = vmatprep.subr.mxu1 %v5892_v1 }
0x2663   :  { %5501 = vmatprep.subr.mxu0 %v5892_v1 }
0x2664   :  { %5502 = vmatpush3.msra.mxu0 %v6778_v33 }
0x2665   :  { %5503 = vmatprep.subr.mxu0 %v5892_v1 }
0x2666   :  { %5504 = vmatpush3.msra.mxu0 %v6782_v32 }
0x2667   :  { %5506 = vmatmul.mubr.msk.f32.vlgmr.msra.gmra.mxu0 %vm202_vm2, %v3878_v54  ;;  %5519 = vmatprep.subr.mxu0 %v5892_v1 }
0x2668   :  { %5520 = vmatpush3.msra.mxu0 %v6434_v17  ;;  %5527 = vmatprep.mubr.msk.f32.mxu0 %vm5893_vm0, %v5892_v1 }
0x2669   :  { %5521 = vmatprep.subr.mxu0 %v5892_v1 }
0x266a   :  { %5522 = vmatpush3.msra.mxu0 %v6437_v16 }
0x266b   :  { %5523 = vmatprep.subr.mxu0 %v5892_v1 }
0x266c   :  { %5524 = vmatpush3.msra.mxu0 %v6441_v6 }
0x266d   :  { %5525 = vmatprep.subr.mxu0 %v5892_v1 }
0x266e   :  { %5526 = vmatpush3.msra.mxu0 %v6451_v27 }
0x266f   :  { %5541 = vmatprep.subr.mxu0 %v5892_v1 }
0x2719   :  { %v4022_v41 = vpop.f32.mrf.mxu1 }
0x271b   :  { %v5496_v56 = vpop.f32.mrf.mxu1 }
0x271f   :  { %v3947_v17 = vpop.f32.mrf.mxu0 }
0x2720   :  { %v3948_v57 = vadd.f32 %v3947_v17, %v5978_v13 }
0x2721   :  { %v5485_v58 = vpop.f32.mrf.mxu0 }
0x2722   :  { %v4026_v59 = vadd.f32 %v4022_v41, %v3948_v57 }
0x2724   :  { %5746 = vtanh.f32 %v4026_v59  ;;  %v4027_v27 = vmul.f32 0.5, %v4026_v59 }
0x2727   :  { %v4115_v60 = vpop.f32.mrf.mxu0 }
0x2728   :  { %v4119_v16 = vadd.f32 %v4115_v60, %v5975_v12 }
0x2729   :  { %v5507_v20 = vpop.f32.mrf.mxu0 }
0x272a   :  { %5748 = vtanh.f32 %v4119_v16  ;;  %v4120_v63 = vmul.f32 0.5, %v4119_v16 }
0x272b   :  { %5750 = vtanh.f32 %v4027_v27 }
0x272c   :  { %5752 = vtanh.f32 %v4120_v63 }
0x2731   :  { %v5747_v6 = vpop.eup %5746 }
0x2732   :  { %4034 = vrot.lane.b32.xlu1 %v5747_v6, %s5894_s0 }
0x2737   :  { %v5749_v61 = vpop.eup %5748 }
0x2738   :  { %4127 = vrot.lane.b32.xlu0 %v5749_v61, %s5894_s0  ;;  %v5751_v15 = vpop.eup %5750 }
0x2739   :  { %v4029_v0 = vmul.f32 0.5, %v5751_v15  ;;  %v5753_v3 = vpop.eup %5752 }
0x273a   :  { %v4122_v50 = vmul.f32 0.5, %v5753_v3 }
0x273b   :  { %v4030_v7 = vadd.f32 0.5, %v4029_v0 }
0x273c   :  { %v4123_v52 = vadd.f32 0.5, %v4122_v50 }
0x273d   :  { %v4032_v4 = vmul.f32 %v4030_v7, %v6742_v37  ;;  %v5797_v37 = vld [vmem:[#allocation5 + $0x70] sm:$0xff] }
0x273e   :  { %v4125_v9 = vmul.f32 %v4123_v52, %v6746_v22 }
0x27a4   :  { %v4035_v44 = vpop.permute.xlu1 %4034 }
0x27a5   :  { %v4037_v48 = vmul.f32 %v4035_v44, %v4030_v7 }
0x27a7   :  { %4039 = vrot.lane.b32.xlu1 %v4037_v48, %s5895_s3 }
0x27aa   :  { %v4128_v8 = vpop.permute.xlu0 %4127 }
0x27ab   :  { %v4130_v51 = vmul.f32 %v4128_v8, %v4123_v52 }
0x27ad   :  { %4132 = vrot.lane.b32.xlu0 %v4130_v51, %s5895_s3 }
0x2819   :  { %v4040_v5 = vpop.permute.xlu1 %4039 }
0x281a   :  { %v6804_v34 = vadd.f32 %v4040_v5, %v4032_v4 }
0x281c   :  { %5754 = vtanh.f32 %v6804_v34 }
0x281f   :  { %v4133_v11 = vpop.permute.xlu0 %4132 }
0x2820   :  { %v6808_v39 = vadd.f32 %v4133_v11, %v4125_v9 }
0x2822   :  { %5756 = vtanh.f32 %v6808_v39 }
0x2829   :  { %v5755_v14 = vpop.eup %5754 }
0x282a   :  { %4045 = vrot.lane.b32.xlu1 %v5755_v14, %s5894_s0 }
0x282f   :  { %v5757_v35 = vpop.eup %5756 }
0x2830   :  { %4138 = vrot.lane.b32.xlu0 %v5757_v35, %s5894_s0 }
0x289c   :  { %v4046_v36 = vpop.permute.xlu1 %4045 }
0x289d   :  { %v6813_v38 = vmul.f32 %v4046_v36, %v4030_v7 }
0x289f   :  { %4218 = vrot.lane.b32.xlu1 %v6813_v38, %s5895_s3  ;;  %v4587_v44 = vrot.slane %v6813_v38, 6 }
0x28a1   :  { %v4600_v8 = vsel %vm4594_vm4, %v6751_v45, %v4587_v44 }
0x28a2   :  { %v4139_v40 = vpop.permute.xlu0 %4138 }
0x28a3   :  { %v4141_v10 = vmul.f32 %v4139_v40, %v4123_v52 }
0x28a5   :  { %4143 = vrot.lane.b32.xlu0 %v4141_v10, %s5895_s3 }
0x2911   :  { %v4219_v19 = vpop.permute.xlu1 %4218 }
0x2912   :  { %5528 = vmatmul.mubr.msk.f32.vlgmr.msra.gmra.mxu0 %vm202_vm2, %v4219_v19 }
0x2913   :  { %5542 = vmatpush3.msra.mxu0 %v5792_v42  ;;  %5549 = vmatprep.mubr.msk.f32.mxu0 %vm5893_vm0, %v5892_v1 }
0x2914   :  { %5543 = vmatprep.subr.mxu0 %v5892_v1 }
0x2915   :  { %5544 = vmatpush3.msra.mxu0 %v5793_v21 }
0x2916   :  { %5545 = vmatprep.subr.mxu0 %v5892_v1 }
0x2917   :  { %v4144_v18 = vpop.permute.xlu0 %4143  ;;  %5546 = vmatpush3.msra.mxu0 %v5794_v24 }
0x2918   :  { %5517 = vmatmul.mubr.msk.f32.vlgmr.msra.gmra.mxu1 %vm202_vm2, %v4144_v18  ;;  %5547 = vmatprep.subr.mxu0 %v5892_v1 }
0x2919   :  { %5531 = vmatpush3.msra.mxu1 %v6766_v55  ;;  %5538 = vmatprep.mubr.msk.f32.mxu1 %vm5893_vm0, %v5892_v1 }
0x291a   :  { %5532 = vmatprep.subr.mxu1 %v5892_v1  ;;  %5548 = vmatpush3.msra.mxu0 %v5795_v26 }
0x291b   :  { %5533 = vmatpush3.msra.mxu1 %v6773_v30 }
0x291c   :  { %5534 = vmatprep.subr.mxu1 %v5892_v1 }
0x291d   :  { %5535 = vmatpush3.msra.mxu1 %v6778_v33 }
0x291e   :  { %5536 = vmatprep.subr.mxu1 %v5892_v1 }
0x291f   :  { %5537 = vmatpush3.msra.mxu1 %v6782_v32 }
0x2920   :  { %5539 = vmatmul.mubr.msk.f32.vlgmr.msra.gmra.mxu1 %vm202_vm2, %v4144_v18  ;;  %5552 = vmatprep.subr.mxu1 %v5892_v1 }
0x2921   :  { %5553 = vmatpush3.msra.mxu1 %v5796_v25  ;;  %5560 = vmatprep.mubr.msk.f32.mxu1 %vm5893_vm0, %v5892_v1 }
0x2922   :  { %5554 = vmatprep.subr.mxu1 %v5892_v1 }
0x2923   :  { %5555 = vmatpush3.msra.mxu1 %v5797_v37  ;;  %v112_v37 = vld [vmem:[#allocation7 + $0x38] sm:$0xff] }
0x2924   :  { %5556 = vmatprep.subr.mxu1 %v5892_v1  ;;  %5563 = vmatprep.subr.mxu0 %v112_v37 }
0x2925   :  { %5557 = vmatpush3.msra.mxu1 %v5798_v23  ;;  %v111_v23 = vld [vmem:[#allocation7 + $0x30] sm:$0xff] }
0x2926   :  { %5558 = vmatprep.subr.mxu1 %v5892_v1 }
0x2927   :  { %5559 = vmatpush3.msra.mxu1 %v5799_v28  ;;  %v110_v28 = vld [vmem:[#allocation7 + $0x28] sm:$0xff] }
0x29d2   :  { %v4288_v22 = vpop.f32.mrf.mxu0 }
0x29d4   :  { %v5529_v29 = vpop.f32.mrf.mxu0 }
0x29d8   :  { %v4213_v31 = vpop.f32.mrf.mxu1 }
0x29d9   :  { %v4214_v43 = vadd.f32 %v4213_v31, %v5978_v13 }
0x29da   :  { %v5518_v46 = vpop.f32.mrf.mxu1 }
0x29db   :  { %v4292_v47 = vadd.f32 %v4288_v22, %v4214_v43  ;;  %v109_v22 = vld [vmem:[#allocation7 + $0x20] sm:$0xff] }
0x29dd   :  { %5758 = vtanh.f32 %v4292_v47  ;;  %v4293_v1 = vmul.f32 0.5, %v4292_v47 }
0x29e0   :  { %v4381_v53 = vpop.f32.mrf.mxu1 }
0x29e1   :  { %v4385_v54 = vadd.f32 %v4381_v53, %v5975_v12 }
0x29e2   :  { %v5540_v55 = vpop.f32.mrf.mxu1 }
0x29e3   :  { %5760 = vtanh.f32 %v4385_v54  ;;  %v4386_v32 = vmul.f32 0.5, %v4385_v54 }
0x29e4   :  { %5762 = vtanh.f32 %v4293_v1 }
0x29e5   :  { %5764 = vtanh.f32 %v4386_v32 }
0x29ea   :  { %v5759_v30 = vpop.eup %5758 }
0x29eb   :  { %4300 = vrot.lane.b32.xlu1 %v5759_v30, %s5894_s0 }
0x29f0   :  { %v5761_v33 = vpop.eup %5760 }
0x29f1   :  { %4393 = vrot.lane.b32.xlu0 %v5761_v33, %s5894_s0  ;;  %v5763_v41 = vpop.eup %5762 }
0x29f2   :  { %v4295_v56 = vmul.f32 0.5, %v5763_v41  ;;  %v5765_v17 = vpop.eup %5764 }
0x29f3   :  { %v4388_v60 = vmul.f32 0.5, %v5765_v17 }
0x29f4   :  { %v4296_v57 = vadd.f32 0.5, %v4295_v56 }
0x29f5   :  { %v4389_v12 = vadd.f32 0.5, %v4388_v60 }
0x29f6   :  { %v4298_v6 = vmul.f32 %v4296_v57, %v6804_v34 }
0x29f7   :  { %v4391_v63 = vmul.f32 %v4389_v12, %v6808_v39 }
0x2a5d   :  { %v4301_v58 = vpop.permute.xlu1 %4300 }
0x2a5e   :  { %v4303_v59 = vmul.f32 %v4301_v58, %v4296_v57 }
0x2a60   :  { %4305 = vrot.lane.b32.xlu1 %v4303_v59, %s5895_s3 }
0x2a63   :  { %v4394_v16 = vpop.permute.xlu0 %4393 }
0x2a64   :  { %v4396_v20 = vmul.f32 %v4394_v16, %v4389_v12 }
0x2a66   :  { %4398 = vrot.lane.b32.xlu0 %v4396_v20, %s5895_s3 }
0x2ad2   :  { %v4306_v61 = vpop.permute.xlu1 %4305 }
0x2ad3   :  { %v4308_v27 = vadd.f32 %v4306_v61, %v4298_v6 }
0x2ad5   :  { %5766 = vtanh.f32 %v4308_v27 }
0x2ad8   :  { %v4399_v15 = vpop.permute.xlu0 %4398 }
0x2ad9   :  { %v4401_v0 = vadd.f32 %v4399_v15, %v4391_v63 }
0x2adb   :  { %5768 = vtanh.f32 %v4401_v0 }
0x2ae2   :  { %v5767_v3 = vpop.eup %5766 }
0x2ae3   :  { %4311 = vrot.lane.b32.xlu1 %v5767_v3, %s5894_s0 }
0x2ae8   :  { %v5769_v7 = vpop.eup %5768 }
0x2ae9   :  { %4404 = vrot.lane.b32.xlu0 %v5769_v7, %s5894_s0 }
0x2b55   :  { %v4312_v48 = vpop.permute.xlu1 %4311 }
0x2b56   :  { %v4314_v50 = vmul.f32 %v4312_v48, %v4296_v57 }
0x2b58   :  { %v4589_v52 = vrot.slane %v4314_v50, 4  ;;  %4484 = vrot.lane.b32.xlu1 %v4314_v50, %s5895_s3 }
0x2b5a   :  { %v4601_v51 = vsel %vm4596_vm5, %v4600_v8, %v4589_v52 }
0x2b5b   :  { %v4405_v4 = vpop.permute.xlu0 %4404 }
0x2b5c   :  { %v4407_v5 = vmul.f32 %v4405_v4, %v4389_v12 }
0x2b5e   :  { %4409 = vrot.lane.b32.xlu0 %v4407_v5, %s5895_s3 }
0x2bca   :  { %v4485_v34 = vpop.permute.xlu1 %4484 }
0x2bcb   :  { %5561 = vmatmul.mubr.msk.f32.vlgmr.msra.gmra.mxu1 %vm202_vm2, %v4485_v34 }
0x2bd0   :  { %v4410_v9 = vpop.permute.xlu0 %4409 }
0x2bd1   :  { %5550 = vmatmul.mubr.msk.f32.vlgmr.msra.gmra.mxu0 %vm202_vm2, %v4410_v9 }
0x2bd2   :  { %5564 = vmatpush3.msra.mxu0 %v112_v37 }
0x2bd3   :  { %5565 = vmatprep.subr.mxu0 %v111_v23 }
0x2bd4   :  { %5566 = vmatpush3.msra.mxu0 %v111_v23 }
0x2bd5   :  { %5567 = vmatprep.subr.mxu0 %v110_v28 }
0x2bd6   :  { %5568 = vmatpush3.msra.mxu0 %v110_v28 }
0x2bd7   :  { %5569 = vmatprep.subr.mxu0 %v109_v22 }
0x2bd8   :  { %5570 = vmatpush3.msra.mxu0 %v109_v22 }
0x2c8b   :  { %v4554_v11 = vpop.f32.mrf.mxu1 }
0x2c8d   :  { %v5562_v39 = vpop.f32.mrf.mxu1 }
0x2c91   :  { %v4479_v14 = vpop.f32.mrf.mxu0 }
0x2c92   :  { %v4480_v35 = vadd.f32 %v4479_v14, %v5978_v13 }
0x2c93   :  { %v5551_v36 = vpop.f32.mrf.mxu0 }
0x2c94   :  { %v4558_v38 = vadd.f32 %v4554_v11, %v4480_v35 }
0x2c96   :  { %5770 = vtanh.f32 %v4558_v38  ;;  %v4559_v40 = vmul.f32 0.5, %v4558_v38 }
0x2c98   :  { %5772 = vtanh.f32 %v4559_v40 }
0x2ca3   :  { %v5771_v45 = vpop.eup %5770 }
0x2ca4   :  { %4566 = vrot.lane.b32.xlu0 %v5771_v45, %s5894_s0 }
0x2ca5   :  { %v5773_v10 = vpop.eup %5772 }
0x2ca6   :  { %v4561_v19 = vmul.f32 0.5, %v5773_v10 }
0x2ca8   :  { %v4562_v42 = vadd.f32 0.5, %v4561_v19 }
0x2caa   :  { %v4564_v24 = vmul.f32 %v4562_v42, %v4308_v27 }
0x2d16   :  { %v4567_v21 = vpop.permute.xlu0 %4566 }
0x2d17   :  { %v4569_v18 = vmul.f32 %v4567_v21, %v4562_v42 }
0x2d19   :  { %4571 = vrot.lane.b32.xlu1 %v4569_v18, %s5895_s3 }
0x2d1d   :  { %4609 = vrot.lane.b32.xlu1 %v6699_v62, %s5895_s3 }
0x2d8b   :  { %v4572_v13 = vpop.permute.xlu1 %4571 }
0x2d8c   :  { %v4574_v26 = vadd.f32 %v4572_v13, %v4564_v24 }
0x2d8e   :  { %5774 = vtanh.f32 %v4574_v26 }
0x2d8f   :  { %v4610_v25 = vpop.permute.xlu1 %4609 }
0x2d90   :  { %5571 = vmatprep.mubr.msk.f32.mxu0 %vm202_vm2, %v4610_v25 }
0x2d9b   :  { %v5775_v29 = vpop.eup %5774 }
0x2d9c   :  { %4577 = vrot.lane.b32.xlu0 %v5775_v29, %s5894_s0 }
0x2e0e   :  { %v4578_v62 = vpop.permute.xlu0 %4577 }
0x2e0f   :  { %v4580_v31 = vmul.f32 %v4578_v62, %v4562_v42 }
0x2e11   :  { %v4592_v43 = vrot.slane %v4580_v31, 2 }
0x2e13   :  { %v4602_v46 = vsel %vm4598_vm6, %v4601_v51, %v4592_v43 }
0x2e14   :  { %4611 = vrot.lane.b32.xlu0 %v4602_v46, %s5895_s3 }
0x2e86   :  { %v4612_v47 = vpop.permute.xlu0 %4611 }
0x2e87   :  { %5572 = vmatmul.mubr.msk.f32.vlgmr.msra.gmra.mxu0 %vm202_vm2, %v4612_v47 }
0x2e88   :  { %5872 = shalt.err (!%p5869_p5)
}
0x2e89   :  { %4705 = dma.vmem_to_hbm [thread:$0]  %s4703_s24, 32, %s6892_s7, [#allocation4]   ;;  %v5800_v53 = vld [vmem:[%s6890_s5] sm:$0x3] }
0x2e8a   :  { %v4606_v54 = vrot.slane %v5800_v53, %v95_v49 }
0x2f47   :  { %v5573_v55 = vpop.f32.mrf.mxu0 }
0x2f48   :  { %v4689_v30 = vadd.f32 %v5573_v55, %v4606_v54 }
0x2f49   :  { %v4683_v33 = vpop.f32.mrf.mxu0 }
0x2f4a   :  { %4693 = vst.msk [vmem:[%s6891_s6 + $0x8] sm:$0xff] %vm120_vm1, %v4689_v30  ;;  %v4684_v1 = vadd.f32 %v4683_v33, %v4606_v54 }
0x2f4c   :  { %4692 = vst.msk [vmem:[%s6891_s6] sm:$0xff] %vm120_vm1, %v4684_v1 }
0x2f4d   :  { %5885 = dma.done.wait [#allocation4], 32  }
0x2f4e   :  { %5886 = vsyncadd [#allocation4], 4294967264 }
0x2f4f   :  { %4711 = vsyncpa [#allocation3], 1 }
0x2f50   :  { %4712 = vsyncpa [#allocation6], 1 }
0x2f51   :  { %4713 = vsyncpa [#allocation4], 1 }

</bundles_post_ra>
